<compile_context>
chip_gen: v7x
topology: tpu7x:2x2x1
jax: 0.10.0
libtpu: 0.0.40
codegen_flags: <defaults>
</compile_context>

<pallas_src>
import math
import functools

import jax
import jax.numpy as jnp
from jax.experimental import pallas as pl
from jax.experimental.pallas import tpu as pltpu

LN_EPS = 1e-5  # PyTorch LayerNorm default eps


def _layer_norm(z, gain):
    mu = jnp.mean(z, axis=-1, keepdims=True)
    var = jnp.mean(jnp.square(z - mu), axis=-1, keepdims=True)
    return (z - mu) * jax.lax.rsqrt(var + LN_EPS) * gain


# ---------------------------------------------------------------------------
# Fused kernel: one (batch, query-row-tile) grid step does
#   LN -> Q/K/V proj -> in-register RoPE -> per-head attention -> proj +
#   residual -> LN -> GELU MLP -> residual.
# ---------------------------------------------------------------------------
def _block_kernel(xf_ref, xq_ref, gt_ref, wq_ref, wk_ref, wv_ref, sin_ref,
                  cos_ref, wp_ref, gc_ref, w1_ref, w2_ref, o_ref,
                  *, heads, head_dim, tq, compute_dtype):
    _, T, C = xf_ref.shape
    H, D = heads, head_dim
    half = D // 2
    cd = compute_dtype
    f32 = jnp.float32

    row0 = pl.multiple_of(pl.program_id(1) * tq, tq)
    gt = gt_ref[...]                                     # (1, C) f32

    # ln_time: all rows feed K/V, the query-row tile feeds Q / residual.
    x_full = xf_ref[0]                                   # (T, C) f32
    x_q = xq_ref[0]                                      # (tq, C) f32
    xn_full = _layer_norm(x_full, gt).astype(cd)
    xn_q = _layer_norm(x_q, gt).astype(cd)

    # Lane-dense projections, f32 accumulation.  1/sqrt(D) and the
    # interleaved -> rotate_half column permutation are pre-folded into wq/wk.
    q = jnp.dot(xn_q, wq_ref[...], preferred_element_type=f32)     # (tq, C)
    k = jnp.dot(xn_full, wk_ref[...], preferred_element_type=f32)  # (T, C)
    v = jnp.dot(xn_full, wv_ref[...], preferred_element_type=f32)  # (T, C)

    sin_k = sin_ref[...]                                 # (T, D)
    cos_k = cos_ref[...]
    sin_q = sin_ref[pl.ds(row0, tq), :]                  # (tq, D)
    cos_q = cos_ref[pl.ds(row0, tq), :]

    def rope(z, sin, cos):    # z: (rows, D) already in rotate_half layout
        z_rot = jnp.concatenate([-z[:, half:], z[:, :half]], axis=-1)
        return z * cos + z_rot * sin

    # Per-head attention with static lane slices (no (T,H,D)<->(H,T,D)
    # relayouts); score/prob temporaries live only within one head.
    head_out = []
    for h in range(H):
        c0 = h * D
        qh = rope(q[:, c0:c0 + D], sin_q, cos_q).astype(cd)        # (tq, D)
        kh = rope(k[:, c0:c0 + D], sin_k, cos_k).astype(cd)        # (T, D)
        vh = v[:, c0:c0 + D].astype(cd)                            # (T, D)
        s = jnp.einsum("qd,kd->qk", qh, kh, preferred_element_type=f32)
        p = jnp.exp(s - jnp.max(s, axis=-1, keepdims=True))
        p = p * pl.reciprocal(jnp.sum(p, axis=-1, keepdims=True), approx=True)
        head_out.append(
            jnp.dot(p.astype(cd), vh, preferred_element_type=f32))  # (tq, D)
    att = jnp.concatenate(head_out, axis=-1)                        # (tq, C)

    # Output projection + residual (f32).
    x1 = x_q + jnp.dot(att.astype(cd), wp_ref[...], preferred_element_type=f32)

    # ln_chan -> Linear(C,4C) -> exact GELU -> Linear(4C,C) -> residual.
    xc = _layer_norm(x1, gc_ref[...]).astype(cd)
    hid = jnp.dot(xc, w1_ref[...], preferred_element_type=f32)      # (tq, 4C)
    hid = 0.5 * hid * (1.0 + jax.lax.erf(hid * (1.0 / math.sqrt(2.0))))
    y = jnp.dot(hid.astype(cd), w2_ref[...], preferred_element_type=f32)
    o_ref[0] = (x1 + y).astype(o_ref.dtype)


# ---------------------------------------------------------------------------
# One-time parameter re-layout (call once at load time, reuse every forward):
# torch (out,in) -> (in,out), per-head interleaved -> rotate_half column
# permutation for Wq/Wk, 1/sqrt(D) folded into Wq, bf16 casts.
# ---------------------------------------------------------------------------
def prepare_block_params(params, *, heads, head_dim, compute_dtype=jnp.bfloat16):
    C = heads * head_dim
    D = head_dim
    cd = compute_dtype
    f32 = jnp.float32

    perm_head = jnp.concatenate([jnp.arange(0, D, 2), jnp.arange(1, D, 2)])
    perm = (jnp.arange(heads)[:, None] * D + perm_head[None, :]).reshape(C)
    scale = 1.0 / math.sqrt(D)

    return {
        "wq": (params["Wq"].T[:, perm] * scale).astype(cd),
        "wk": params["Wk"].T[:, perm].astype(cd),
        "wv": params["Wv"].T.astype(cd),
        "wp": params["Wproj"].T.astype(cd),
        "w1": params["W1"].T.astype(cd),
        "w2": params["W2"].T.astype(cd),
        "g_time": params["ln_time_w"].reshape(1, C).astype(f32),
        "g_chan": params["ln_chan_w"].reshape(1, C).astype(f32),
    }


def _pick_q_tile(T):
    if T <= 256:
        return T
    for cand in (256, 128, 64, 32, 16, 8):
        if T % cand == 0:
            return cand
    return T


# ---------------------------------------------------------------------------
# Wrapper: matches Block.forward(x) with time_mask=None, causal=False,
# memory=None, measure_entropy=False, eval mode (dropout off), rope=True, t0=0.
# ---------------------------------------------------------------------------
def block_forward(x, prep, *, heads, head_dim, compute_dtype=jnp.bfloat16,
                  q_tile=None):
    N, T, C = x.shape
    D = head_dim
    assert C == heads * head_dim
    tq = q_tile if q_tile is not None else _pick_q_tile(T)
    assert T % tq == 0 and (tq == T or tq % 8 == 0), (T, tq)
    n_qt = T // tq
    f32 = jnp.float32

    # RoPE tables (t0 = 0 on this path for both q and k), rotate_half layout,
    # shared across heads: only (T, D) f32.
    pos = jnp.arange(T, dtype=f32)[:, None]
    inv_freq = (10000.0 ** (-2.0 * jnp.arange(D // 2, dtype=f32) / D))[None, :]
    theta = pos * inv_freq                                      # (T, D//2)
    sin_tab = jnp.concatenate([jnp.sin(theta)] * 2, axis=-1)    # (T, D)
    cos_tab = jnp.concatenate([jnp.cos(theta)] * 2, axis=-1)

    kernel = functools.partial(_block_kernel, heads=heads, head_dim=D, tq=tq,
                               compute_dtype=compute_dtype)

    itemsize = jnp.dtype(compute_dtype).itemsize
    weight_bytes = 12 * C * C * itemsize        # Wq,Wk,Wv,Wproj (4C^2) + W1,W2 (8C^2)
    # Generous working-set estimate: weights (worst case 2x buffered), x/out
    # tiles double-buffered, f32 activations + per-head scores + tables.
    vmem_est = (2 * weight_bytes
                + 2 * (T + tq) * C * 4 + 2 * tq * C * 4
                + 4 * (3 * T * C + 16 * tq * C + 2 * tq * T + 4 * T * D))
    vmem_limit = int(min(max(2 * vmem_est, 24 * 2**20), 128 * 2**20))

    cost = pl.CostEstimate(
        flops=int(N * n_qt * (20 * tq * C * C + 4 * T * C * C + 4 * tq * T * C)),
        transcendentals=int(N * n_qt * (heads * tq * T + 4 * tq * C + T + tq)),
        bytes_accessed=int(3 * N * T * C * 4 + weight_bytes
                           + 2 * T * D * 4 + 2 * C * 4),
    )

    def run(weight_mode):
        def wspec(shape):
            zeros = (0,) * len(shape)
            if weight_mode is None:
                return pl.BlockSpec(shape, lambda b, t: zeros)
            return pl.BlockSpec(shape, lambda b, t: zeros,
                                pipeline_mode=weight_mode)

        in_specs = [
            pl.BlockSpec((1, T, C), lambda b, t: (b, 0, 0)),    # x, all rows (K/V)
            pl.BlockSpec((1, tq, C), lambda b, t: (b, t, 0)),   # x, query-row tile
            wspec((1, C)),        # ln_time gain
            wspec((C, C)),        # Wq (rotate_half perm + 1/sqrt(D) folded)
            wspec((C, C)),        # Wk (rotate_half perm folded)
            wspec((C, C)),        # Wv
            wspec((T, D)),        # sin table
            wspec((T, D)),        # cos table
            wspec((C, C)),        # Wproj
            wspec((1, C)),        # ln_chan gain
            wspec((C, 4 * C)),    # W1
            wspec((4 * C, C)),    # W2
        ]
        return pl.pallas_call(
            kernel,
            grid=(N, n_qt),
            in_specs=in_specs,
            out_specs=pl.BlockSpec((1, tq, C), lambda b, t: (b, t, 0)),
            out_shape=jax.ShapeDtypeStruct((N, T, C), jnp.float32),
            compiler_params=pltpu.CompilerParams(
                dimension_semantics=("parallel", "parallel"),
                vmem_limit_bytes=vmem_limit),
            cost_estimate=cost,
        )(x, x, prep["g_time"], prep["wq"], prep["wk"], prep["wv"],
          sin_tab, cos_tab, prep["wp"], prep["g_chan"], prep["w1"], prep["w2"])

    # Single-buffer the batch/tile-invariant weight operands (halves their
    # VMEM residency -- matters on v7x's 64 MiB VMEM).  Fall back to default
    # double buffering if this jax build rejects pipeline_mode.
    weight_mode = pl.Buffered(1) if hasattr(pl, "Buffered") else None
    try:
        out = run(weight_mode)
    except Exception:
        if weight_mode is None:
            raise
        out = run(None)

    # measure_entropy=False and mix_memory=None -> both entropies are -inf.
    ents = (jnp.array(-jnp.inf, jnp.float32), jnp.array(-jnp.inf, jnp.float32))
    return out, ents


# ---------------------------------------------------------------------------
# Pure-JAX f32 reference (mirrors the PyTorch forward) for a sanity check.
# ---------------------------------------------------------------------------
def _rope_ref(x, base=10000.0):
    *_, T, D = x.shape
    t = jnp.arange(T, dtype=jnp.float32)[:, None]
    e = jnp.repeat(-2.0 * jnp.arange(D // 2, dtype=jnp.float32) / D, 2)[None, :]
    sin, cos = jnp.sin(base ** e * t), jnp.cos(base ** e * t)
    odd, even = x[..., 0::2], x[..., 1::2]
    x_ = jnp.stack([-even, odd], axis=-1).reshape(x.shape)
    return x * cos + x_ * sin


def block_ref(x, params, *, heads, head_dim):
    N, T, C = x.shape

    def ln(z, g):
        mu = z.mean(-1, keepdims=True)
        var = ((z - mu) ** 2).mean(-1, keepdims=True)
        return (z - mu) / jnp.sqrt(var + LN_EPS) * g

    xn = ln(x, params["ln_time_w"])

    def split(y):
        return y.reshape(N, T, heads, head_dim).transpose(0, 2, 1, 3)

    q = _rope_ref(split(xn @ params["Wq"].T))
    k = _rope_ref(split(xn @ params["Wk"].T))
    v = split(xn @ params["Wv"].T)
    s = jnp.einsum("nhtd,nhsd->nhts", q, k) / math.sqrt(head_dim)
    p = jax.nn.softmax(s, axis=-1)
    o = jnp.einsum("nhts,nhsd->nhtd", p, v).transpose(0, 2, 1, 3).reshape(N, T, C)
    x1 = x + o @ params["Wproj"].T
    xc = ln(x1, params["ln_chan_w"])
    h = xc @ params["W1"].T
    h = 0.5 * h * (1.0 + jax.lax.erf(h / math.sqrt(2.0)))
    return x1 + h @ params["W2"].T


if __name__ == "__main__":
    heads, head_dim = 4, 8
    N, T = 2, 16
    C = heads * head_dim

    key = jax.random.PRNGKey(0)
    kx, kq, kk, kv, kp, k1, k2, kg1, kg2 = jax.random.split(key, 9)
    params = {
        "Wq": 0.05 * jax.random.normal(kq, (C, C), jnp.float32),
        "Wk": 0.05 * jax.random.normal(kk, (C, C), jnp.float32),
        "Wv": 0.05 * jax.random.normal(kv, (C, C), jnp.float32),
        "Wproj": 0.05 * jax.random.normal(kp, (C, C), jnp.float32),
        "W1": 0.05 * jax.random.normal(k1, (4 * C, C), jnp.float32),
        "W2": 0.05 * jax.random.normal(k2, (C, 4 * C), jnp.float32),
        "ln_time_w": 1.0 + 0.05 * jax.random.normal(kg1, (C,), jnp.float32),
        "ln_chan_w": 1.0 + 0.05 * jax.random.normal(kg2, (C,), jnp.float32),
    }
    x = jax.random.normal(kx, (N, T, C), jnp.float32)

    prep = prepare_block_params(params, heads=heads, head_dim=head_dim)
    ref = block_ref(x, params, heads=heads, head_dim=head_dim)

    # Exercise both the single-tile path (tq == T) and the query-row-tiled
    # path (tq = 8 -> grid (N, 2)).
    for q_tile in (None, 8):
        out, (m_ent, t_ent) = block_forward(
            x, prep, heads=heads, head_dim=head_dim, q_tile=q_tile)
        out = jax.block_until_ready(out)
        assert out.shape == (N, T, C)
        err = float(jnp.max(jnp.abs(out - ref)))
        # bf16 matmul operands with f32 accumulation vs. f32 reference.
        assert err < 2e-2, f"q_tile={q_tile}: max abs error vs reference {err}"
    print("KERNEL_OK")
</pallas_src>

<mosaic_0001>
module attributes {stable_mosaic.version = 11 : i64} {
  func.func @_block_kernel(%arg0: i32, %arg1: i32, %arg2: memref<1x16x32xf32, #tpu.memory_space<vmem>>, %arg3: memref<1x16x32xf32, #tpu.memory_space<vmem>>, %arg4: memref<1x32xf32, #tpu.memory_space<vmem>>, %arg5: memref<32x32xbf16, #tpu.memory_space<vmem>>, %arg6: memref<32x32xbf16, #tpu.memory_space<vmem>>, %arg7: memref<32x32xbf16, #tpu.memory_space<vmem>>, %arg8: memref<16x8xf32, #tpu.memory_space<vmem>>, %arg9: memref<16x8xf32, #tpu.memory_space<vmem>>, %arg10: memref<32x32xbf16, #tpu.memory_space<vmem>>, %arg11: memref<1x32xf32, #tpu.memory_space<vmem>>, %arg12: memref<32x128xbf16, #tpu.memory_space<vmem>>, %arg13: memref<128x32xbf16, #tpu.memory_space<vmem>>, %arg14: memref<1x16x32xf32, #tpu.memory_space<vmem>>) attributes {dimension_semantics = [#tpu.dimension_semantics<parallel>, #tpu.dimension_semantics<parallel>], iteration_bounds = array<i64: 2, 1>, scalar_prefetch = 0 : i64, scratch_operands = 0 : i64, tpu.core_type = #tpu.core_type<tc>, window_params = [{transform_indices = @transform_0, window_bounds = array<i64: 1, 16, 32>}, {transform_indices = @transform_1, window_bounds = array<i64: 1, 16, 32>}, {pipeline_mode = #tpu.pipeline_mode<synchronous>, transform_indices = @transform_2, window_bounds = array<i64: 1, 32>}, {pipeline_mode = #tpu.pipeline_mode<synchronous>, transform_indices = @transform_3, window_bounds = array<i64: 32, 32>}, {pipeline_mode = #tpu.pipeline_mode<synchronous>, transform_indices = @transform_4, window_bounds = array<i64: 32, 32>}, {pipeline_mode = #tpu.pipeline_mode<synchronous>, transform_indices = @transform_5, window_bounds = array<i64: 32, 32>}, {pipeline_mode = #tpu.pipeline_mode<synchronous>, transform_indices = @transform_6, window_bounds = array<i64: 16, 8>}, {pipeline_mode = #tpu.pipeline_mode<synchronous>, transform_indices = @transform_7, window_bounds = array<i64: 16, 8>}, {pipeline_mode = #tpu.pipeline_mode<synchronous>, transform_indices = @transform_8, window_bounds = array<i64: 32, 32>}, {pipeline_mode = #tpu.pipeline_mode<synchronous>, transform_indices = @transform_9, window_bounds = array<i64: 1, 32>}, {pipeline_mode = #tpu.pipeline_mode<synchronous>, transform_indices = @transform_10, window_bounds = array<i64: 32, 128>}, {pipeline_mode = #tpu.pipeline_mode<synchronous>, transform_indices = @transform_11, window_bounds = array<i64: 128, 32>}, {transform_indices = @transform_12, window_bounds = array<i64: 1, 16, 32>}]} {
    %c16_i32 = arith.constant 16 : i32
    %0 = arith.muli %arg1, %c16_i32 : i32
    %1 = tpu.assume_multiple %0, 16 : i32
    %c0 = arith.constant 0 : index
    %c0_0 = arith.constant 0 : index
    %2 = vector.load %arg4[%c0, %c0_0] : memref<1x32xf32, #tpu.memory_space<vmem>>, vector<1x32xf32>
    %c0_1 = arith.constant 0 : index
    %c0_2 = arith.constant 0 : index
    %c0_3 = arith.constant 0 : index
    %3 = vector.load %arg2[%c0_1, %c0_2, %c0_3] : memref<1x16x32xf32, #tpu.memory_space<vmem>>, vector<1x16x32xf32>
    %4 = vector.shape_cast %3 : vector<1x16x32xf32> to vector<16x32xf32>
    %c0_4 = arith.constant 0 : index
    %c0_5 = arith.constant 0 : index
    %c0_6 = arith.constant 0 : index
    %5 = vector.load %arg3[%c0_4, %c0_5, %c0_6] : memref<1x16x32xf32, #tpu.memory_space<vmem>>, vector<1x16x32xf32>
    %6 = vector.shape_cast %5 : vector<1x16x32xf32> to vector<16x32xf32>
    %cst = arith.constant dense<0.000000e+00> : vector<16xf32>
    %7 = vector.multi_reduction <add>, %4, %cst [1] : vector<16x32xf32> to vector<16xf32>
    %8 = vector.shape_cast %7 : vector<16xf32> to vector<16x1xf32>
    %cst_7 = arith.constant 3.200000e+01 : f32
    %9 = vector.broadcast %cst_7 : f32 to vector<16x1xf32>
    %10 = arith.divf %8, %9 : vector<16x1xf32>
    %11 = vector.broadcast %10 : vector<16x1xf32> to vector<16x32xf32>
    %12 = arith.subf %4, %11 : vector<16x32xf32>
    %13 = arith.mulf %12, %12 : vector<16x32xf32>
    %cst_8 = arith.constant dense<0.000000e+00> : vector<16xf32>
    %14 = vector.multi_reduction <add>, %13, %cst_8 [1] : vector<16x32xf32> to vector<16xf32>
    %15 = vector.shape_cast %14 : vector<16xf32> to vector<16x1xf32>
    %cst_9 = arith.constant 3.200000e+01 : f32
    %16 = vector.broadcast %cst_9 : f32 to vector<16x1xf32>
    %17 = arith.divf %15, %16 : vector<16x1xf32>
    %18 = vector.broadcast %10 : vector<16x1xf32> to vector<16x32xf32>
    %19 = arith.subf %4, %18 : vector<16x32xf32>
    %cst_10 = arith.constant 9.99999974E-6 : f32
    %20 = vector.broadcast %cst_10 : f32 to vector<16x1xf32>
    %21 = arith.addf %17, %20 : vector<16x1xf32>
    %22 = math.rsqrt %21 : vector<16x1xf32>
    %23 = vector.broadcast %22 : vector<16x1xf32> to vector<16x32xf32>
    %24 = arith.mulf %19, %23 : vector<16x32xf32>
    %25 = vector.broadcast %2 : vector<1x32xf32> to vector<16x32xf32>
    %26 = arith.mulf %24, %25 : vector<16x32xf32>
    %27 = arith.truncf %26 : vector<16x32xf32> to vector<16x32xbf16>
    %cst_11 = arith.constant dense<0.000000e+00> : vector<16xf32>
    %28 = vector.multi_reduction <add>, %6, %cst_11 [1] : vector<16x32xf32> to vector<16xf32>
    %29 = vector.shape_cast %28 : vector<16xf32> to vector<16x1xf32>
    %cst_12 = arith.constant 3.200000e+01 : f32
    %30 = vector.broadcast %cst_12 : f32 to vector<16x1xf32>
    %31 = arith.divf %29, %30 : vector<16x1xf32>
    %32 = vector.broadcast %31 : vector<16x1xf32> to vector<16x32xf32>
    %33 = arith.subf %6, %32 : vector<16x32xf32>
    %34 = arith.mulf %33, %33 : vector<16x32xf32>
    %cst_13 = arith.constant dense<0.000000e+00> : vector<16xf32>
    %35 = vector.multi_reduction <add>, %34, %cst_13 [1] : vector<16x32xf32> to vector<16xf32>
    %36 = vector.shape_cast %35 : vector<16xf32> to vector<16x1xf32>
    %cst_14 = arith.constant 3.200000e+01 : f32
    %37 = vector.broadcast %cst_14 : f32 to vector<16x1xf32>
    %38 = arith.divf %36, %37 : vector<16x1xf32>
    %39 = vector.broadcast %31 : vector<16x1xf32> to vector<16x32xf32>
    %40 = arith.subf %6, %39 : vector<16x32xf32>
    %cst_15 = arith.constant 9.99999974E-6 : f32
    %41 = vector.broadcast %cst_15 : f32 to vector<16x1xf32>
    %42 = arith.addf %38, %41 : vector<16x1xf32>
    %43 = math.rsqrt %42 : vector<16x1xf32>
    %44 = vector.broadcast %43 : vector<16x1xf32> to vector<16x32xf32>
    %45 = arith.mulf %40, %44 : vector<16x32xf32>
    %46 = vector.broadcast %2 : vector<1x32xf32> to vector<16x32xf32>
    %47 = arith.mulf %45, %46 : vector<16x32xf32>
    %48 = arith.truncf %47 : vector<16x32xf32> to vector<16x32xbf16>
    %c0_16 = arith.constant 0 : index
    %c0_17 = arith.constant 0 : index
    %49 = vector.load %arg5[%c0_16, %c0_17] : memref<32x32xbf16, #tpu.memory_space<vmem>>, vector<32x32xbf16>
    %cst_18 = arith.constant dense<0.000000e+00> : vector<16x32xf32>
    %50 = tpu.matmul %48, %49, %cst_18 {dimension_numbers = #tpu.dot_dimension_numbers<[1], [0], [0], [1], [0, 0, 1, 1], [], []>} : vector<16x32xbf16>, vector<32x32xbf16>, vector<16x32xf32> -> vector<16x32xf32>
    %c0_19 = arith.constant 0 : index
    %c0_20 = arith.constant 0 : index
    %51 = vector.load %arg6[%c0_19, %c0_20] : memref<32x32xbf16, #tpu.memory_space<vmem>>, vector<32x32xbf16>
    %cst_21 = arith.constant dense<0.000000e+00> : vector<16x32xf32>
    %52 = tpu.matmul %27, %51, %cst_21 {dimension_numbers = #tpu.dot_dimension_numbers<[1], [0], [0], [1], [0, 0, 1, 1], [], []>} : vector<16x32xbf16>, vector<32x32xbf16>, vector<16x32xf32> -> vector<16x32xf32>
    %c0_22 = arith.constant 0 : index
    %c0_23 = arith.constant 0 : index
    %53 = vector.load %arg7[%c0_22, %c0_23] : memref<32x32xbf16, #tpu.memory_space<vmem>>, vector<32x32xbf16>
    %cst_24 = arith.constant dense<0.000000e+00> : vector<16x32xf32>
    %54 = tpu.matmul %27, %53, %cst_24 {dimension_numbers = #tpu.dot_dimension_numbers<[1], [0], [0], [1], [0, 0, 1, 1], [], []>} : vector<16x32xbf16>, vector<32x32xbf16>, vector<16x32xf32> -> vector<16x32xf32>
    %c0_25 = arith.constant 0 : index
    %c0_26 = arith.constant 0 : index
    %55 = vector.load %arg8[%c0_25, %c0_26] : memref<16x8xf32, #tpu.memory_space<vmem>>, vector<16x8xf32>
    %c0_27 = arith.constant 0 : index
    %c0_28 = arith.constant 0 : index
    %56 = vector.load %arg9[%c0_27, %c0_28] : memref<16x8xf32, #tpu.memory_space<vmem>>, vector<16x8xf32>
    %57 = arith.index_cast %1 : i32 to index
    %c0_29 = arith.constant 0 : index
    %58 = vector.load %arg8[%57, %c0_29] : memref<16x8xf32, #tpu.memory_space<vmem>>, vector<16x8xf32>
    %59 = arith.index_cast %1 : i32 to index
    %c0_30 = arith.constant 0 : index
    %60 = vector.load %arg9[%59, %c0_30] : memref<16x8xf32, #tpu.memory_space<vmem>>, vector<16x8xf32>
    %61 = vector.extract_strided_slice %50 {offsets = [0, 0], sizes = [16, 8], strides = [1, 1]} : vector<16x32xf32> to vector<16x8xf32>
    %62 = vector.extract_strided_slice %61 {offsets = [0, 4], sizes = [16, 4], strides = [1, 1]} : vector<16x8xf32> to vector<16x4xf32>
    %cst_31 = arith.constant 0.000000e+00 : f32
    %63 = vector.broadcast %cst_31 : f32 to vector<16x4xf32>
    %64 = arith.subf %63, %62 : vector<16x4xf32>
    %65 = vector.extract_strided_slice %61 {offsets = [0, 0], sizes = [16, 4], strides = [1, 1]} : vector<16x8xf32> to vector<16x4xf32>
    %66 = tpu.concatenate %64, %65 in 1 : vector<16x4xf32>, vector<16x4xf32> -> vector<16x8xf32>
    %67 = arith.mulf %61, %60 : vector<16x8xf32>
    %68 = arith.mulf %66, %58 : vector<16x8xf32>
    %69 = arith.addf %67, %68 : vector<16x8xf32>
    %70 = arith.truncf %69 : vector<16x8xf32> to vector<16x8xbf16>
    %71 = vector.extract_strided_slice %52 {offsets = [0, 0], sizes = [16, 8], strides = [1, 1]} : vector<16x32xf32> to vector<16x8xf32>
    %72 = vector.extract_strided_slice %71 {offsets = [0, 4], sizes = [16, 4], strides = [1, 1]} : vector<16x8xf32> to vector<16x4xf32>
    %cst_32 = arith.constant 0.000000e+00 : f32
    %73 = vector.broadcast %cst_32 : f32 to vector<16x4xf32>
    %74 = arith.subf %73, %72 : vector<16x4xf32>
    %75 = vector.extract_strided_slice %71 {offsets = [0, 0], sizes = [16, 4], strides = [1, 1]} : vector<16x8xf32> to vector<16x4xf32>
    %76 = tpu.concatenate %74, %75 in 1 : vector<16x4xf32>, vector<16x4xf32> -> vector<16x8xf32>
    %77 = arith.mulf %71, %56 : vector<16x8xf32>
    %78 = arith.mulf %76, %55 : vector<16x8xf32>
    %79 = arith.addf %77, %78 : vector<16x8xf32>
    %80 = arith.truncf %79 : vector<16x8xf32> to vector<16x8xbf16>
    %81 = vector.extract_strided_slice %54 {offsets = [0, 0], sizes = [16, 8], strides = [1, 1]} : vector<16x32xf32> to vector<16x8xf32>
    %82 = arith.truncf %81 : vector<16x8xf32> to vector<16x8xbf16>
    "tpu.trace_start"() <{level = 10 : i32, message = "qd,kd->qk"}> : () -> ()
    %cst_33 = arith.constant dense<0.000000e+00> : vector<16x16xf32>
    %83 = tpu.matmul %70, %80, %cst_33 {dimension_numbers = #tpu.dot_dimension_numbers<[1], [1], [0], [0], [0, 0, 1, 0], [], []>} : vector<16x8xbf16>, vector<16x8xbf16>, vector<16x16xf32> -> vector<16x16xf32>
    "tpu.trace_stop"() : () -> ()
    %cst_34 = arith.constant dense<0xFF800000> : vector<16xf32>
    %84 = vector.multi_reduction <maximumf>, %83, %cst_34 [1] : vector<16x16xf32> to vector<16xf32>
    %85 = vector.shape_cast %84 : vector<16xf32> to vector<16x1xf32>
    %86 = vector.broadcast %85 : vector<16x1xf32> to vector<16x16xf32>
    %87 = arith.subf %83, %86 : vector<16x16xf32>
    %88 = math.exp %87 : vector<16x16xf32>
    %cst_35 = arith.constant dense<0.000000e+00> : vector<16xf32>
    %89 = vector.multi_reduction <add>, %88, %cst_35 [1] : vector<16x16xf32> to vector<16xf32>
    %90 = vector.shape_cast %89 : vector<16xf32> to vector<16x1xf32>
    %91 = tpu.reciprocal %90 {approx = true} : vector<16x1xf32> -> vector<16x1xf32>
    %92 = vector.broadcast %91 : vector<16x1xf32> to vector<16x16xf32>
    %93 = arith.mulf %88, %92 : vector<16x16xf32>
    %94 = arith.truncf %93 : vector<16x16xf32> to vector<16x16xbf16>
    %cst_36 = arith.constant dense<0.000000e+00> : vector<16x8xf32>
    %95 = tpu.matmul %94, %82, %cst_36 {dimension_numbers = #tpu.dot_dimension_numbers<[1], [0], [0], [1], [0, 0, 1, 1], [], []>} : vector<16x16xbf16>, vector<16x8xbf16>, vector<16x8xf32> -> vector<16x8xf32>
    %96 = vector.extract_strided_slice %50 {offsets = [0, 8], sizes = [16, 8], strides = [1, 1]} : vector<16x32xf32> to vector<16x8xf32>
    %97 = vector.extract_strided_slice %96 {offsets = [0, 4], sizes = [16, 4], strides = [1, 1]} : vector<16x8xf32> to vector<16x4xf32>
    %cst_37 = arith.constant 0.000000e+00 : f32
    %98 = vector.broadcast %cst_37 : f32 to vector<16x4xf32>
    %99 = arith.subf %98, %97 : vector<16x4xf32>
    %100 = vector.extract_strided_slice %96 {offsets = [0, 0], sizes = [16, 4], strides = [1, 1]} : vector<16x8xf32> to vector<16x4xf32>
    %101 = tpu.concatenate %99, %100 in 1 : vector<16x4xf32>, vector<16x4xf32> -> vector<16x8xf32>
    %102 = arith.mulf %96, %60 : vector<16x8xf32>
    %103 = arith.mulf %101, %58 : vector<16x8xf32>
    %104 = arith.addf %102, %103 : vector<16x8xf32>
    %105 = arith.truncf %104 : vector<16x8xf32> to vector<16x8xbf16>
    %106 = vector.extract_strided_slice %52 {offsets = [0, 8], sizes = [16, 8], strides = [1, 1]} : vector<16x32xf32> to vector<16x8xf32>
    %107 = vector.extract_strided_slice %106 {offsets = [0, 4], sizes = [16, 4], strides = [1, 1]} : vector<16x8xf32> to vector<16x4xf32>
    %cst_38 = arith.constant 0.000000e+00 : f32
    %108 = vector.broadcast %cst_38 : f32 to vector<16x4xf32>
    %109 = arith.subf %108, %107 : vector<16x4xf32>
    %110 = vector.extract_strided_slice %106 {offsets = [0, 0], sizes = [16, 4], strides = [1, 1]} : vector<16x8xf32> to vector<16x4xf32>
    %111 = tpu.concatenate %109, %110 in 1 : vector<16x4xf32>, vector<16x4xf32> -> vector<16x8xf32>
    %112 = arith.mulf %106, %56 : vector<16x8xf32>
    %113 = arith.mulf %111, %55 : vector<16x8xf32>
    %114 = arith.addf %112, %113 : vector<16x8xf32>
    %115 = arith.truncf %114 : vector<16x8xf32> to vector<16x8xbf16>
    %116 = vector.extract_strided_slice %54 {offsets = [0, 8], sizes = [16, 8], strides = [1, 1]} : vector<16x32xf32> to vector<16x8xf32>
    %117 = arith.truncf %116 : vector<16x8xf32> to vector<16x8xbf16>
    "tpu.trace_start"() <{level = 10 : i32, message = "qd,kd->qk"}> : () -> ()
    %cst_39 = arith.constant dense<0.000000e+00> : vector<16x16xf32>
    %118 = tpu.matmul %105, %115, %cst_39 {dimension_numbers = #tpu.dot_dimension_numbers<[1], [1], [0], [0], [0, 0, 1, 0], [], []>} : vector<16x8xbf16>, vector<16x8xbf16>, vector<16x16xf32> -> vector<16x16xf32>
    "tpu.trace_stop"() : () -> ()
    %cst_40 = arith.constant dense<0xFF800000> : vector<16xf32>
    %119 = vector.multi_reduction <maximumf>, %118, %cst_40 [1] : vector<16x16xf32> to vector<16xf32>
    %120 = vector.shape_cast %119 : vector<16xf32> to vector<16x1xf32>
    %121 = vector.broadcast %120 : vector<16x1xf32> to vector<16x16xf32>
    %122 = arith.subf %118, %121 : vector<16x16xf32>
    %123 = math.exp %122 : vector<16x16xf32>
    %cst_41 = arith.constant dense<0.000000e+00> : vector<16xf32>
    %124 = vector.multi_reduction <add>, %123, %cst_41 [1] : vector<16x16xf32> to vector<16xf32>
    %125 = vector.shape_cast %124 : vector<16xf32> to vector<16x1xf32>
    %126 = tpu.reciprocal %125 {approx = true} : vector<16x1xf32> -> vector<16x1xf32>
    %127 = vector.broadcast %126 : vector<16x1xf32> to vector<16x16xf32>
    %128 = arith.mulf %123, %127 : vector<16x16xf32>
    %129 = arith.truncf %128 : vector<16x16xf32> to vector<16x16xbf16>
    %cst_42 = arith.constant dense<0.000000e+00> : vector<16x8xf32>
    %130 = tpu.matmul %129, %117, %cst_42 {dimension_numbers = #tpu.dot_dimension_numbers<[1], [0], [0], [1], [0, 0, 1, 1], [], []>} : vector<16x16xbf16>, vector<16x8xbf16>, vector<16x8xf32> -> vector<16x8xf32>
    %131 = vector.extract_strided_slice %50 {offsets = [0, 16], sizes = [16, 8], strides = [1, 1]} : vector<16x32xf32> to vector<16x8xf32>
    %132 = vector.extract_strided_slice %131 {offsets = [0, 4], sizes = [16, 4], strides = [1, 1]} : vector<16x8xf32> to vector<16x4xf32>
    %cst_43 = arith.constant 0.000000e+00 : f32
    %133 = vector.broadcast %cst_43 : f32 to vector<16x4xf32>
    %134 = arith.subf %133, %132 : vector<16x4xf32>
    %135 = vector.extract_strided_slice %131 {offsets = [0, 0], sizes = [16, 4], strides = [1, 1]} : vector<16x8xf32> to vector<16x4xf32>
    %136 = tpu.concatenate %134, %135 in 1 : vector<16x4xf32>, vector<16x4xf32> -> vector<16x8xf32>
    %137 = arith.mulf %131, %60 : vector<16x8xf32>
    %138 = arith.mulf %136, %58 : vector<16x8xf32>
    %139 = arith.addf %137, %138 : vector<16x8xf32>
    %140 = arith.truncf %139 : vector<16x8xf32> to vector<16x8xbf16>
    %141 = vector.extract_strided_slice %52 {offsets = [0, 16], sizes = [16, 8], strides = [1, 1]} : vector<16x32xf32> to vector<16x8xf32>
    %142 = vector.extract_strided_slice %141 {offsets = [0, 4], sizes = [16, 4], strides = [1, 1]} : vector<16x8xf32> to vector<16x4xf32>
    %cst_44 = arith.constant 0.000000e+00 : f32
    %143 = vector.broadcast %cst_44 : f32 to vector<16x4xf32>
    %144 = arith.subf %143, %142 : vector<16x4xf32>
    %145 = vector.extract_strided_slice %141 {offsets = [0, 0], sizes = [16, 4], strides = [1, 1]} : vector<16x8xf32> to vector<16x4xf32>
    %146 = tpu.concatenate %144, %145 in 1 : vector<16x4xf32>, vector<16x4xf32> -> vector<16x8xf32>
    %147 = arith.mulf %141, %56 : vector<16x8xf32>
    %148 = arith.mulf %146, %55 : vector<16x8xf32>
    %149 = arith.addf %147, %148 : vector<16x8xf32>
    %150 = arith.truncf %149 : vector<16x8xf32> to vector<16x8xbf16>
    %151 = vector.extract_strided_slice %54 {offsets = [0, 16], sizes = [16, 8], strides = [1, 1]} : vector<16x32xf32> to vector<16x8xf32>
    %152 = arith.truncf %151 : vector<16x8xf32> to vector<16x8xbf16>
    "tpu.trace_start"() <{level = 10 : i32, message = "qd,kd->qk"}> : () -> ()
    %cst_45 = arith.constant dense<0.000000e+00> : vector<16x16xf32>
    %153 = tpu.matmul %140, %150, %cst_45 {dimension_numbers = #tpu.dot_dimension_numbers<[1], [1], [0], [0], [0, 0, 1, 0], [], []>} : vector<16x8xbf16>, vector<16x8xbf16>, vector<16x16xf32> -> vector<16x16xf32>
    "tpu.trace_stop"() : () -> ()
    %cst_46 = arith.constant dense<0xFF800000> : vector<16xf32>
    %154 = vector.multi_reduction <maximumf>, %153, %cst_46 [1] : vector<16x16xf32> to vector<16xf32>
    %155 = vector.shape_cast %154 : vector<16xf32> to vector<16x1xf32>
    %156 = vector.broadcast %155 : vector<16x1xf32> to vector<16x16xf32>
    %157 = arith.subf %153, %156 : vector<16x16xf32>
    %158 = math.exp %157 : vector<16x16xf32>
    %cst_47 = arith.constant dense<0.000000e+00> : vector<16xf32>
    %159 = vector.multi_reduction <add>, %158, %cst_47 [1] : vector<16x16xf32> to vector<16xf32>
    %160 = vector.shape_cast %159 : vector<16xf32> to vector<16x1xf32>
    %161 = tpu.reciprocal %160 {approx = true} : vector<16x1xf32> -> vector<16x1xf32>
    %162 = vector.broadcast %161 : vector<16x1xf32> to vector<16x16xf32>
    %163 = arith.mulf %158, %162 : vector<16x16xf32>
    %164 = arith.truncf %163 : vector<16x16xf32> to vector<16x16xbf16>
    %cst_48 = arith.constant dense<0.000000e+00> : vector<16x8xf32>
    %165 = tpu.matmul %164, %152, %cst_48 {dimension_numbers = #tpu.dot_dimension_numbers<[1], [0], [0], [1], [0, 0, 1, 1], [], []>} : vector<16x16xbf16>, vector<16x8xbf16>, vector<16x8xf32> -> vector<16x8xf32>
    %166 = vector.extract_strided_slice %50 {offsets = [0, 24], sizes = [16, 8], strides = [1, 1]} : vector<16x32xf32> to vector<16x8xf32>
    %167 = vector.extract_strided_slice %166 {offsets = [0, 4], sizes = [16, 4], strides = [1, 1]} : vector<16x8xf32> to vector<16x4xf32>
    %cst_49 = arith.constant 0.000000e+00 : f32
    %168 = vector.broadcast %cst_49 : f32 to vector<16x4xf32>
    %169 = arith.subf %168, %167 : vector<16x4xf32>
    %170 = vector.extract_strided_slice %166 {offsets = [0, 0], sizes = [16, 4], strides = [1, 1]} : vector<16x8xf32> to vector<16x4xf32>
    %171 = tpu.concatenate %169, %170 in 1 : vector<16x4xf32>, vector<16x4xf32> -> vector<16x8xf32>
    %172 = arith.mulf %166, %60 : vector<16x8xf32>
    %173 = arith.mulf %171, %58 : vector<16x8xf32>
    %174 = arith.addf %172, %173 : vector<16x8xf32>
    %175 = arith.truncf %174 : vector<16x8xf32> to vector<16x8xbf16>
    %176 = vector.extract_strided_slice %52 {offsets = [0, 24], sizes = [16, 8], strides = [1, 1]} : vector<16x32xf32> to vector<16x8xf32>
    %177 = vector.extract_strided_slice %176 {offsets = [0, 4], sizes = [16, 4], strides = [1, 1]} : vector<16x8xf32> to vector<16x4xf32>
    %cst_50 = arith.constant 0.000000e+00 : f32
    %178 = vector.broadcast %cst_50 : f32 to vector<16x4xf32>
    %179 = arith.subf %178, %177 : vector<16x4xf32>
    %180 = vector.extract_strided_slice %176 {offsets = [0, 0], sizes = [16, 4], strides = [1, 1]} : vector<16x8xf32> to vector<16x4xf32>
    %181 = tpu.concatenate %179, %180 in 1 : vector<16x4xf32>, vector<16x4xf32> -> vector<16x8xf32>
    %182 = arith.mulf %176, %56 : vector<16x8xf32>
    %183 = arith.mulf %181, %55 : vector<16x8xf32>
    %184 = arith.addf %182, %183 : vector<16x8xf32>
    %185 = arith.truncf %184 : vector<16x8xf32> to vector<16x8xbf16>
    %186 = vector.extract_strided_slice %54 {offsets = [0, 24], sizes = [16, 8], strides = [1, 1]} : vector<16x32xf32> to vector<16x8xf32>
    %187 = arith.truncf %186 : vector<16x8xf32> to vector<16x8xbf16>
    "tpu.trace_start"() <{level = 10 : i32, message = "qd,kd->qk"}> : () -> ()
    %cst_51 = arith.constant dense<0.000000e+00> : vector<16x16xf32>
    %188 = tpu.matmul %175, %185, %cst_51 {dimension_numbers = #tpu.dot_dimension_numbers<[1], [1], [0], [0], [0, 0, 1, 0], [], []>} : vector<16x8xbf16>, vector<16x8xbf16>, vector<16x16xf32> -> vector<16x16xf32>
    "tpu.trace_stop"() : () -> ()
    %cst_52 = arith.constant dense<0xFF800000> : vector<16xf32>
    %189 = vector.multi_reduction <maximumf>, %188, %cst_52 [1] : vector<16x16xf32> to vector<16xf32>
    %190 = vector.shape_cast %189 : vector<16xf32> to vector<16x1xf32>
    %191 = vector.broadcast %190 : vector<16x1xf32> to vector<16x16xf32>
    %192 = arith.subf %188, %191 : vector<16x16xf32>
    %193 = math.exp %192 : vector<16x16xf32>
    %cst_53 = arith.constant dense<0.000000e+00> : vector<16xf32>
    %194 = vector.multi_reduction <add>, %193, %cst_53 [1] : vector<16x16xf32> to vector<16xf32>
    %195 = vector.shape_cast %194 : vector<16xf32> to vector<16x1xf32>
    %196 = tpu.reciprocal %195 {approx = true} : vector<16x1xf32> -> vector<16x1xf32>
    %197 = vector.broadcast %196 : vector<16x1xf32> to vector<16x16xf32>
    %198 = arith.mulf %193, %197 : vector<16x16xf32>
    %199 = arith.truncf %198 : vector<16x16xf32> to vector<16x16xbf16>
    %cst_54 = arith.constant dense<0.000000e+00> : vector<16x8xf32>
    %200 = tpu.matmul %199, %187, %cst_54 {dimension_numbers = #tpu.dot_dimension_numbers<[1], [0], [0], [1], [0, 0, 1, 1], [], []>} : vector<16x16xbf16>, vector<16x8xbf16>, vector<16x8xf32> -> vector<16x8xf32>
    %201 = tpu.concatenate %95, %130, %165, %200 in 1 : vector<16x8xf32>, vector<16x8xf32>, vector<16x8xf32>, vector<16x8xf32> -> vector<16x32xf32>
    %202 = arith.truncf %201 : vector<16x32xf32> to vector<16x32xbf16>
    %c0_55 = arith.constant 0 : index
    %c0_56 = arith.constant 0 : index
    %203 = vector.load %arg10[%c0_55, %c0_56] : memref<32x32xbf16, #tpu.memory_space<vmem>>, vector<32x32xbf16>
    %cst_57 = arith.constant dense<0.000000e+00> : vector<16x32xf32>
    %204 = tpu.matmul %202, %203, %cst_57 {dimension_numbers = #tpu.dot_dimension_numbers<[1], [0], [0], [1], [0, 0, 1, 1], [], []>} : vector<16x32xbf16>, vector<32x32xbf16>, vector<16x32xf32> -> vector<16x32xf32>
    %205 = arith.addf %6, %204 : vector<16x32xf32>
    %c0_58 = arith.constant 0 : index
    %c0_59 = arith.constant 0 : index
    %206 = vector.load %arg11[%c0_58, %c0_59] : memref<1x32xf32, #tpu.memory_space<vmem>>, vector<1x32xf32>
    %cst_60 = arith.constant dense<0.000000e+00> : vector<16xf32>
    %207 = vector.multi_reduction <add>, %205, %cst_60 [1] : vector<16x32xf32> to vector<16xf32>
    %208 = vector.shape_cast %207 : vector<16xf32> to vector<16x1xf32>
    %cst_61 = arith.constant 3.200000e+01 : f32
    %209 = vector.broadcast %cst_61 : f32 to vector<16x1xf32>
    %210 = arith.divf %208, %209 : vector<16x1xf32>
    %211 = vector.broadcast %210 : vector<16x1xf32> to vector<16x32xf32>
    %212 = arith.subf %205, %211 : vector<16x32xf32>
    %213 = arith.mulf %212, %212 : vector<16x32xf32>
    %cst_62 = arith.constant dense<0.000000e+00> : vector<16xf32>
    %214 = vector.multi_reduction <add>, %213, %cst_62 [1] : vector<16x32xf32> to vector<16xf32>
    %215 = vector.shape_cast %214 : vector<16xf32> to vector<16x1xf32>
    %cst_63 = arith.constant 3.200000e+01 : f32
    %216 = vector.broadcast %cst_63 : f32 to vector<16x1xf32>
    %217 = arith.divf %215, %216 : vector<16x1xf32>
    %218 = vector.broadcast %210 : vector<16x1xf32> to vector<16x32xf32>
    %219 = arith.subf %205, %218 : vector<16x32xf32>
    %cst_64 = arith.constant 9.99999974E-6 : f32
    %220 = vector.broadcast %cst_64 : f32 to vector<16x1xf32>
    %221 = arith.addf %217, %220 : vector<16x1xf32>
    %222 = math.rsqrt %221 : vector<16x1xf32>
    %223 = vector.broadcast %222 : vector<16x1xf32> to vector<16x32xf32>
    %224 = arith.mulf %219, %223 : vector<16x32xf32>
    %225 = vector.broadcast %206 : vector<1x32xf32> to vector<16x32xf32>
    %226 = arith.mulf %224, %225 : vector<16x32xf32>
    %227 = arith.truncf %226 : vector<16x32xf32> to vector<16x32xbf16>
    %c0_65 = arith.constant 0 : index
    %c0_66 = arith.constant 0 : index
    %228 = vector.load %arg12[%c0_65, %c0_66] : memref<32x128xbf16, #tpu.memory_space<vmem>>, vector<32x128xbf16>
    %cst_67 = arith.constant dense<0.000000e+00> : vector<16x128xf32>
    %229 = tpu.matmul %227, %228, %cst_67 {dimension_numbers = #tpu.dot_dimension_numbers<[1], [0], [0], [1], [0, 0, 1, 1], [], []>} : vector<16x32xbf16>, vector<32x128xbf16>, vector<16x128xf32> -> vector<16x128xf32>
    %cst_68 = arith.constant 5.000000e-01 : f32
    %230 = vector.broadcast %cst_68 : f32 to vector<16x128xf32>
    %231 = arith.mulf %230, %229 : vector<16x128xf32>
    %cst_69 = arith.constant 0.707106769 : f32
    %232 = vector.broadcast %cst_69 : f32 to vector<16x128xf32>
    %233 = arith.mulf %229, %232 : vector<16x128xf32>
    %234 = math.erf %233 : vector<16x128xf32>
    %cst_70 = arith.constant 1.000000e+00 : f32
    %235 = vector.broadcast %cst_70 : f32 to vector<16x128xf32>
    %236 = arith.addf %235, %234 : vector<16x128xf32>
    %237 = arith.mulf %231, %236 : vector<16x128xf32>
    %238 = arith.truncf %237 : vector<16x128xf32> to vector<16x128xbf16>
    %c0_71 = arith.constant 0 : index
    %c0_72 = arith.constant 0 : index
    %239 = vector.load %arg13[%c0_71, %c0_72] : memref<128x32xbf16, #tpu.memory_space<vmem>>, vector<128x32xbf16>
    %cst_73 = arith.constant dense<0.000000e+00> : vector<16x32xf32>
    %240 = tpu.matmul %238, %239, %cst_73 {dimension_numbers = #tpu.dot_dimension_numbers<[1], [0], [0], [1], [0, 0, 1, 1], [], []>} : vector<16x128xbf16>, vector<128x32xbf16>, vector<16x32xf32> -> vector<16x32xf32>
    %241 = arith.addf %205, %240 : vector<16x32xf32>
    %c0_74 = arith.constant 0 : index
    %c0_75 = arith.constant 0 : index
    %c0_76 = arith.constant 0 : index
    %242 = vector.load %arg14[%c0_74, %c0_75, %c0_76] : memref<1x16x32xf32, #tpu.memory_space<vmem>>, vector<1x16x32xf32>
    %243 = vector.shape_cast %242 : vector<1x16x32xf32> to vector<16x32xf32>
    %244 = vector.shape_cast %241 : vector<16x32xf32> to vector<1x16x32xf32>
    tpu.vector_store %arg14[%c0_74, %c0_75, %c0_76], %244 {strides = array<i32>} : memref<1x16x32xf32, #tpu.memory_space<vmem>>, vector<1x16x32xf32>,
    return
  }
  func.func @transform_0(%arg0: i32, %arg1: i32) -> (i32, i32, i32) {
    %c0_i32 = arith.constant 0 : i32
    %c0_i32_0 = arith.constant 0 : i32
    %c0_i32_1 = arith.constant 0 : i32
    return %arg0, %c0_i32, %c0_i32_0 : i32, i32, i32
  }
  func.func @transform_1(%arg0: i32, %arg1: i32) -> (i32, i32, i32) {
    %c0_i32 = arith.constant 0 : i32
    %c0_i32_0 = arith.constant 0 : i32
    return %arg0, %arg1, %c0_i32 : i32, i32, i32
  }
  func.func @transform_2(%arg0: i32, %arg1: i32) -> (i32, i32) {
    %c0_i32 = arith.constant 0 : i32
    %c0_i32_0 = arith.constant 0 : i32
    %c0_i32_1 = arith.constant 0 : i32
    return %c0_i32, %c0_i32_0 : i32, i32
  }
  func.func @transform_3(%arg0: i32, %arg1: i32) -> (i32, i32) {
    %c0_i32 = arith.constant 0 : i32
    %c0_i32_0 = arith.constant 0 : i32
    %c0_i32_1 = arith.constant 0 : i32
    return %c0_i32, %c0_i32_0 : i32, i32
  }
  func.func @transform_4(%arg0: i32, %arg1: i32) -> (i32, i32) {
    %c0_i32 = arith.constant 0 : i32
    %c0_i32_0 = arith.constant 0 : i32
    %c0_i32_1 = arith.constant 0 : i32
    return %c0_i32, %c0_i32_0 : i32, i32
  }
  func.func @transform_5(%arg0: i32, %arg1: i32) -> (i32, i32) {
    %c0_i32 = arith.constant 0 : i32
    %c0_i32_0 = arith.constant 0 : i32
    %c0_i32_1 = arith.constant 0 : i32
    return %c0_i32, %c0_i32_0 : i32, i32
  }
  func.func @transform_6(%arg0: i32, %arg1: i32) -> (i32, i32) {
    %c0_i32 = arith.constant 0 : i32
    %c0_i32_0 = arith.constant 0 : i32
    %c0_i32_1 = arith.constant 0 : i32
    return %c0_i32, %c0_i32_0 : i32, i32
  }
  func.func @transform_7(%arg0: i32, %arg1: i32) -> (i32, i32) {
    %c0_i32 = arith.constant 0 : i32
    %c0_i32_0 = arith.constant 0 : i32
    %c0_i32_1 = arith.constant 0 : i32
    return %c0_i32, %c0_i32_0 : i32, i32
  }
  func.func @transform_8(%arg0: i32, %arg1: i32) -> (i32, i32) {
    %c0_i32 = arith.constant 0 : i32
    %c0_i32_0 = arith.constant 0 : i32
    %c0_i32_1 = arith.constant 0 : i32
    return %c0_i32, %c0_i32_0 : i32, i32
  }
  func.func @transform_9(%arg0: i32, %arg1: i32) -> (i32, i32) {
    %c0_i32 = arith.constant 0 : i32
    %c0_i32_0 = arith.constant 0 : i32
    %c0_i32_1 = arith.constant 0 : i32
    return %c0_i32, %c0_i32_0 : i32, i32
  }
  func.func @transform_10(%arg0: i32, %arg1: i32) -> (i32, i32) {
    %c0_i32 = arith.constant 0 : i32
    %c0_i32_0 = arith.constant 0 : i32
    %c0_i32_1 = arith.constant 0 : i32
    return %c0_i32, %c0_i32_0 : i32, i32
  }
  func.func @transform_11(%arg0: i32, %arg1: i32) -> (i32, i32) {
    %c0_i32 = arith.constant 0 : i32
    %c0_i32_0 = arith.constant 0 : i32
    %c0_i32_1 = arith.constant 0 : i32
    return %c0_i32, %c0_i32_0 : i32, i32
  }
  func.func @transform_12(%arg0: i32, %arg1: i32) -> (i32, i32, i32) {
    %c0_i32 = arith.constant 0 : i32
    %c0_i32_0 = arith.constant 0 : i32
    return %arg0, %arg1, %c0_i32 : i32, i32, i32
  }
}

module attributes {stable_mosaic.version = 11 : i64} {
  func.func @_block_kernel(%arg0: i32, %arg1: i32, %arg2: memref<1x16x32xf32, #tpu.memory_space<vmem>>, %arg3: memref<1x16x32xf32, #tpu.memory_space<vmem>>, %arg4: memref<1x32xf32, #tpu.memory_space<vmem>>, %arg5: memref<32x32xbf16, #tpu.memory_space<vmem>>, %arg6: memref<32x32xbf16, #tpu.memory_space<vmem>>, %arg7: memref<32x32xbf16, #tpu.memory_space<vmem>>, %arg8: memref<16x8xf32, #tpu.memory_space<vmem>>, %arg9: memref<16x8xf32, #tpu.memory_space<vmem>>, %arg10: memref<32x32xbf16, #tpu.memory_space<vmem>>, %arg11: memref<1x32xf32, #tpu.memory_space<vmem>>, %arg12: memref<32x128xbf16, #tpu.memory_space<vmem>>, %arg13: memref<128x32xbf16, #tpu.memory_space<vmem>>, %arg14: memref<1x16x32xf32, #tpu.memory_space<vmem>>) attributes {dimension_semantics = [#tpu.dimension_semantics<parallel>, #tpu.dimension_semantics<parallel>], iteration_bounds = array<i64: 2, 1>, scalar_prefetch = 0 : i64, scratch_operands = 0 : i64, tpu.core_type = #tpu.core_type<tc>, window_params = [{transform_indices = @transform_0, window_bounds = array<i64: 1, 16, 32>}, {transform_indices = @transform_1, window_bounds = array<i64: 1, 16, 32>}, {pipeline_mode = #tpu.pipeline_mode<synchronous>, transform_indices = @transform_2, window_bounds = array<i64: 1, 32>}, {pipeline_mode = #tpu.pipeline_mode<synchronous>, transform_indices = @transform_3, window_bounds = array<i64: 32, 32>}, {pipeline_mode = #tpu.pipeline_mode<synchronous>, transform_indices = @transform_4, window_bounds = array<i64: 32, 32>}, {pipeline_mode = #tpu.pipeline_mode<synchronous>, transform_indices = @transform_5, window_bounds = array<i64: 32, 32>}, {pipeline_mode = #tpu.pipeline_mode<synchronous>, transform_indices = @transform_6, window_bounds = array<i64: 16, 8>}, {pipeline_mode = #tpu.pipeline_mode<synchronous>, transform_indices = @transform_7, window_bounds = array<i64: 16, 8>}, {pipeline_mode = #tpu.pipeline_mode<synchronous>, transform_indices = @transform_8, window_bounds = array<i64: 32, 32>}, {pipeline_mode = #tpu.pipeline_mode<synchronous>, transform_indices = @transform_9, window_bounds = array<i64: 1, 32>}, {pipeline_mode = #tpu.pipeline_mode<synchronous>, transform_indices = @transform_10, window_bounds = array<i64: 32, 128>}, {pipeline_mode = #tpu.pipeline_mode<synchronous>, transform_indices = @transform_11, window_bounds = array<i64: 128, 32>}, {transform_indices = @transform_12, window_bounds = array<i64: 1, 16, 32>}]} {
    %c16_i32 = arith.constant 16 : i32
    %0 = arith.muli %arg1, %c16_i32 : i32
    %1 = tpu.assume_multiple %0, 16 : i32
    %c0 = arith.constant 0 : index
    %c0_0 = arith.constant 0 : index
    %2 = vector.load %arg4[%c0, %c0_0] : memref<1x32xf32, #tpu.memory_space<vmem>>, vector<1x32xf32>
    %c0_1 = arith.constant 0 : index
    %c0_2 = arith.constant 0 : index
    %c0_3 = arith.constant 0 : index
    %3 = vector.load %arg2[%c0_1, %c0_2, %c0_3] : memref<1x16x32xf32, #tpu.memory_space<vmem>>, vector<1x16x32xf32>
    %4 = vector.shape_cast %3 : vector<1x16x32xf32> to vector<16x32xf32>
    %c0_4 = arith.constant 0 : index
    %c0_5 = arith.constant 0 : index
    %c0_6 = arith.constant 0 : index
    %5 = vector.load %arg3[%c0_4, %c0_5, %c0_6] : memref<1x16x32xf32, #tpu.memory_space<vmem>>, vector<1x16x32xf32>
    %6 = vector.shape_cast %5 : vector<1x16x32xf32> to vector<16x32xf32>
    %cst = arith.constant dense<0.000000e+00> : vector<16xf32>
    %7 = vector.multi_reduction <add>, %4, %cst [1] : vector<16x32xf32> to vector<16xf32>
    %8 = vector.shape_cast %7 : vector<16xf32> to vector<16x1xf32>
    %cst_7 = arith.constant 3.200000e+01 : f32
    %9 = vector.broadcast %cst_7 : f32 to vector<16x1xf32>
    %10 = arith.divf %8, %9 : vector<16x1xf32>
    %11 = vector.broadcast %10 : vector<16x1xf32> to vector<16x32xf32>
    %12 = arith.subf %4, %11 : vector<16x32xf32>
    %13 = arith.mulf %12, %12 : vector<16x32xf32>
    %cst_8 = arith.constant dense<0.000000e+00> : vector<16xf32>
    %14 = vector.multi_reduction <add>, %13, %cst_8 [1] : vector<16x32xf32> to vector<16xf32>
    %15 = vector.shape_cast %14 : vector<16xf32> to vector<16x1xf32>
    %cst_9 = arith.constant 3.200000e+01 : f32
    %16 = vector.broadcast %cst_9 : f32 to vector<16x1xf32>
    %17 = arith.divf %15, %16 : vector<16x1xf32>
    %18 = vector.broadcast %10 : vector<16x1xf32> to vector<16x32xf32>
    %19 = arith.subf %4, %18 : vector<16x32xf32>
    %cst_10 = arith.constant 9.99999974E-6 : f32
    %20 = vector.broadcast %cst_10 : f32 to vector<16x1xf32>
    %21 = arith.addf %17, %20 : vector<16x1xf32>
    %22 = math.rsqrt %21 : vector<16x1xf32>
    %23 = vector.broadcast %22 : vector<16x1xf32> to vector<16x32xf32>
    %24 = arith.mulf %19, %23 : vector<16x32xf32>
    %25 = vector.broadcast %2 : vector<1x32xf32> to vector<16x32xf32>
    %26 = arith.mulf %24, %25 : vector<16x32xf32>
    %27 = arith.truncf %26 : vector<16x32xf32> to vector<16x32xbf16>
    %cst_11 = arith.constant dense<0.000000e+00> : vector<16xf32>
    %28 = vector.multi_reduction <add>, %6, %cst_11 [1] : vector<16x32xf32> to vector<16xf32>
    %29 = vector.shape_cast %28 : vector<16xf32> to vector<16x1xf32>
    %cst_12 = arith.constant 3.200000e+01 : f32
    %30 = vector.broadcast %cst_12 : f32 to vector<16x1xf32>
    %31 = arith.divf %29, %30 : vector<16x1xf32>
    %32 = vector.broadcast %31 : vector<16x1xf32> to vector<16x32xf32>
    %33 = arith.subf %6, %32 : vector<16x32xf32>
    %34 = arith.mulf %33, %33 : vector<16x32xf32>
    %cst_13 = arith.constant dense<0.000000e+00> : vector<16xf32>
    %35 = vector.multi_reduction <add>, %34, %cst_13 [1] : vector<16x32xf32> to vector<16xf32>
    %36 = vector.shape_cast %35 : vector<16xf32> to vector<16x1xf32>
    %cst_14 = arith.constant 3.200000e+01 : f32
    %37 = vector.broadcast %cst_14 : f32 to vector<16x1xf32>
    %38 = arith.divf %36, %37 : vector<16x1xf32>
    %39 = vector.broadcast %31 : vector<16x1xf32> to vector<16x32xf32>
    %40 = arith.subf %6, %39 : vector<16x32xf32>
    %cst_15 = arith.constant 9.99999974E-6 : f32
    %41 = vector.broadcast %cst_15 : f32 to vector<16x1xf32>
    %42 = arith.addf %38, %41 : vector<16x1xf32>
    %43 = math.rsqrt %42 : vector<16x1xf32>
    %44 = vector.broadcast %43 : vector<16x1xf32> to vector<16x32xf32>
    %45 = arith.mulf %40, %44 : vector<16x32xf32>
    %46 = vector.broadcast %2 : vector<1x32xf32> to vector<16x32xf32>
    %47 = arith.mulf %45, %46 : vector<16x32xf32>
    %48 = arith.truncf %47 : vector<16x32xf32> to vector<16x32xbf16>
    %c0_16 = arith.constant 0 : index
    %c0_17 = arith.constant 0 : index
    %49 = vector.load %arg5[%c0_16, %c0_17] : memref<32x32xbf16, #tpu.memory_space<vmem>>, vector<32x32xbf16>
    %cst_18 = arith.constant dense<0.000000e+00> : vector<16x32xf32>
    %50 = tpu.matmul %48, %49, %cst_18 {dimension_numbers = #tpu.dot_dimension_numbers<[1], [0], [0], [1], [0, 0, 1, 1], [], []>} : vector<16x32xbf16>, vector<32x32xbf16>, vector<16x32xf32> -> vector<16x32xf32>
    %c0_19 = arith.constant 0 : index
    %c0_20 = arith.constant 0 : index
    %51 = vector.load %arg6[%c0_19, %c0_20] : memref<32x32xbf16, #tpu.memory_space<vmem>>, vector<32x32xbf16>
    %cst_21 = arith.constant dense<0.000000e+00> : vector<16x32xf32>
    %52 = tpu.matmul %27, %51, %cst_21 {dimension_numbers = #tpu.dot_dimension_numbers<[1], [0], [0], [1], [0, 0, 1, 1], [], []>} : vector<16x32xbf16>, vector<32x32xbf16>, vector<16x32xf32> -> vector<16x32xf32>
    %c0_22 = arith.constant 0 : index
    %c0_23 = arith.constant 0 : index
    %53 = vector.load %arg7[%c0_22, %c0_23] : memref<32x32xbf16, #tpu.memory_space<vmem>>, vector<32x32xbf16>
    %cst_24 = arith.constant dense<0.000000e+00> : vector<16x32xf32>
    %54 = tpu.matmul %27, %53, %cst_24 {dimension_numbers = #tpu.dot_dimension_numbers<[1], [0], [0], [1], [0, 0, 1, 1], [], []>} : vector<16x32xbf16>, vector<32x32xbf16>, vector<16x32xf32> -> vector<16x32xf32>
    %c0_25 = arith.constant 0 : index
    %c0_26 = arith.constant 0 : index
    %55 = vector.load %arg8[%c0_25, %c0_26] : memref<16x8xf32, #tpu.memory_space<vmem>>, vector<16x8xf32>
    %c0_27 = arith.constant 0 : index
    %c0_28 = arith.constant 0 : index
    %56 = vector.load %arg9[%c0_27, %c0_28] : memref<16x8xf32, #tpu.memory_space<vmem>>, vector<16x8xf32>
    %57 = arith.index_cast %1 : i32 to index
    %c0_29 = arith.constant 0 : index
    %58 = vector.load %arg8[%57, %c0_29] : memref<16x8xf32, #tpu.memory_space<vmem>>, vector<16x8xf32>
    %59 = arith.index_cast %1 : i32 to index
    %c0_30 = arith.constant 0 : index
    %60 = vector.load %arg9[%59, %c0_30] : memref<16x8xf32, #tpu.memory_space<vmem>>, vector<16x8xf32>
    %61 = vector.extract_strided_slice %50 {offsets = [0, 0], sizes = [16, 8], strides = [1, 1]} : vector<16x32xf32> to vector<16x8xf32>
    %62 = vector.extract_strided_slice %61 {offsets = [0, 4], sizes = [16, 4], strides = [1, 1]} : vector<16x8xf32> to vector<16x4xf32>
    %cst_31 = arith.constant 0.000000e+00 : f32
    %63 = vector.broadcast %cst_31 : f32 to vector<16x4xf32>
    %64 = arith.subf %63, %62 : vector<16x4xf32>
    %65 = vector.extract_strided_slice %61 {offsets = [0, 0], sizes = [16, 4], strides = [1, 1]} : vector<16x8xf32> to vector<16x4xf32>
    %66 = tpu.concatenate %64, %65 in 1 : vector<16x4xf32>, vector<16x4xf32> -> vector<16x8xf32>
    %67 = arith.mulf %61, %60 : vector<16x8xf32>
    %68 = arith.mulf %66, %58 : vector<16x8xf32>
    %69 = arith.addf %67, %68 : vector<16x8xf32>
    %70 = arith.truncf %69 : vector<16x8xf32> to vector<16x8xbf16>
    %71 = vector.extract_strided_slice %52 {offsets = [0, 0], sizes = [16, 8], strides = [1, 1]} : vector<16x32xf32> to vector<16x8xf32>
    %72 = vector.extract_strided_slice %71 {offsets = [0, 4], sizes = [16, 4], strides = [1, 1]} : vector<16x8xf32> to vector<16x4xf32>
    %cst_32 = arith.constant 0.000000e+00 : f32
    %73 = vector.broadcast %cst_32 : f32 to vector<16x4xf32>
    %74 = arith.subf %73, %72 : vector<16x4xf32>
    %75 = vector.extract_strided_slice %71 {offsets = [0, 0], sizes = [16, 4], strides = [1, 1]} : vector<16x8xf32> to vector<16x4xf32>
    %76 = tpu.concatenate %74, %75 in 1 : vector<16x4xf32>, vector<16x4xf32> -> vector<16x8xf32>
    %77 = arith.mulf %71, %56 : vector<16x8xf32>
    %78 = arith.mulf %76, %55 : vector<16x8xf32>
    %79 = arith.addf %77, %78 : vector<16x8xf32>
    %80 = arith.truncf %79 : vector<16x8xf32> to vector<16x8xbf16>
    %81 = vector.extract_strided_slice %54 {offsets = [0, 0], sizes = [16, 8], strides = [1, 1]} : vector<16x32xf32> to vector<16x8xf32>
    %82 = arith.truncf %81 : vector<16x8xf32> to vector<16x8xbf16>
    "tpu.trace_start"() <{level = 10 : i32, message = "qd,kd->qk"}> : () -> ()
    %cst_33 = arith.constant dense<0.000000e+00> : vector<16x16xf32>
    %83 = tpu.matmul %70, %80, %cst_33 {dimension_numbers = #tpu.dot_dimension_numbers<[1], [1], [0], [0], [0, 0, 1, 0], [], []>} : vector<16x8xbf16>, vector<16x8xbf16>, vector<16x16xf32> -> vector<16x16xf32>
    "tpu.trace_stop"() : () -> ()
    %cst_34 = arith.constant dense<0xFF800000> : vector<16xf32>
    %84 = vector.multi_reduction <maximumf>, %83, %cst_34 [1] : vector<16x16xf32> to vector<16xf32>
    %85 = vector.shape_cast %84 : vector<16xf32> to vector<16x1xf32>
    %86 = vector.broadcast %85 : vector<16x1xf32> to vector<16x16xf32>
    %87 = arith.subf %83, %86 : vector<16x16xf32>
    %88 = math.exp %87 : vector<16x16xf32>
    %cst_35 = arith.constant dense<0.000000e+00> : vector<16xf32>
    %89 = vector.multi_reduction <add>, %88, %cst_35 [1] : vector<16x16xf32> to vector<16xf32>
    %90 = vector.shape_cast %89 : vector<16xf32> to vector<16x1xf32>
    %91 = tpu.reciprocal %90 {approx = true} : vector<16x1xf32> -> vector<16x1xf32>
    %92 = vector.broadcast %91 : vector<16x1xf32> to vector<16x16xf32>
    %93 = arith.mulf %88, %92 : vector<16x16xf32>
    %94 = arith.truncf %93 : vector<16x16xf32> to vector<16x16xbf16>
    %cst_36 = arith.constant dense<0.000000e+00> : vector<16x8xf32>
    %95 = tpu.matmul %94, %82, %cst_36 {dimension_numbers = #tpu.dot_dimension_numbers<[1], [0], [0], [1], [0, 0, 1, 1], [], []>} : vector<16x16xbf16>, vector<16x8xbf16>, vector<16x8xf32> -> vector<16x8xf32>
    %96 = vector.extract_strided_slice %50 {offsets = [0, 8], sizes = [16, 8], strides = [1, 1]} : vector<16x32xf32> to vector<16x8xf32>
    %97 = vector.extract_strided_slice %96 {offsets = [0, 4], sizes = [16, 4], strides = [1, 1]} : vector<16x8xf32> to vector<16x4xf32>
    %cst_37 = arith.constant 0.000000e+00 : f32
    %98 = vector.broadcast %cst_37 : f32 to vector<16x4xf32>
    %99 = arith.subf %98, %97 : vector<16x4xf32>
    %100 = vector.extract_strided_slice %96 {offsets = [0, 0], sizes = [16, 4], strides = [1, 1]} : vector<16x8xf32> to vector<16x4xf32>
    %101 = tpu.concatenate %99, %100 in 1 : vector<16x4xf32>, vector<16x4xf32> -> vector<16x8xf32>
    %102 = arith.mulf %96, %60 : vector<16x8xf32>
    %103 = arith.mulf %101, %58 : vector<16x8xf32>
    %104 = arith.addf %102, %103 : vector<16x8xf32>
    %105 = arith.truncf %104 : vector<16x8xf32> to vector<16x8xbf16>
    %106 = vector.extract_strided_slice %52 {offsets = [0, 8], sizes = [16, 8], strides = [1, 1]} : vector<16x32xf32> to vector<16x8xf32>
    %107 = vector.extract_strided_slice %106 {offsets = [0, 4], sizes = [16, 4], strides = [1, 1]} : vector<16x8xf32> to vector<16x4xf32>
    %cst_38 = arith.constant 0.000000e+00 : f32
    %108 = vector.broadcast %cst_38 : f32 to vector<16x4xf32>
    %109 = arith.subf %108, %107 : vector<16x4xf32>
    %110 = vector.extract_strided_slice %106 {offsets = [0, 0], sizes = [16, 4], strides = [1, 1]} : vector<16x8xf32> to vector<16x4xf32>
    %111 = tpu.concatenate %109, %110 in 1 : vector<16x4xf32>, vector<16x4xf32> -> vector<16x8xf32>
    %112 = arith.mulf %106, %56 : vector<16x8xf32>
    %113 = arith.mulf %111, %55 : vector<16x8xf32>
    %114 = arith.addf %112, %113 : vector<16x8xf32>
    %115 = arith.truncf %114 : vector<16x8xf32> to vector<16x8xbf16>
    %116 = vector.extract_strided_slice %54 {offsets = [0, 8], sizes = [16, 8], strides = [1, 1]} : vector<16x32xf32> to vector<16x8xf32>
    %117 = arith.truncf %116 : vector<16x8xf32> to vector<16x8xbf16>
    "tpu.trace_start"() <{level = 10 : i32, message = "qd,kd->qk"}> : () -> ()
    %cst_39 = arith.constant dense<0.000000e+00> : vector<16x16xf32>
    %118 = tpu.matmul %105, %115, %cst_39 {dimension_numbers = #tpu.dot_dimension_numbers<[1], [1], [0], [0], [0, 0, 1, 0], [], []>} : vector<16x8xbf16>, vector<16x8xbf16>, vector<16x16xf32> -> vector<16x16xf32>
    "tpu.trace_stop"() : () -> ()
    %cst_40 = arith.constant dense<0xFF800000> : vector<16xf32>
    %119 = vector.multi_reduction <maximumf>, %118, %cst_40 [1] : vector<16x16xf32> to vector<16xf32>
    %120 = vector.shape_cast %119 : vector<16xf32> to vector<16x1xf32>
    %121 = vector.broadcast %120 : vector<16x1xf32> to vector<16x16xf32>
    %122 = arith.subf %118, %121 : vector<16x16xf32>
    %123 = math.exp %122 : vector<16x16xf32>
    %cst_41 = arith.constant dense<0.000000e+00> : vector<16xf32>
    %124 = vector.multi_reduction <add>, %123, %cst_41 [1] : vector<16x16xf32> to vector<16xf32>
    %125 = vector.shape_cast %124 : vector<16xf32> to vector<16x1xf32>
    %126 = tpu.reciprocal %125 {approx = true} : vector<16x1xf32> -> vector<16x1xf32>
    %127 = vector.broadcast %126 : vector<16x1xf32> to vector<16x16xf32>
    %128 = arith.mulf %123, %127 : vector<16x16xf32>
    %129 = arith.truncf %128 : vector<16x16xf32> to vector<16x16xbf16>
    %cst_42 = arith.constant dense<0.000000e+00> : vector<16x8xf32>
    %130 = tpu.matmul %129, %117, %cst_42 {dimension_numbers = #tpu.dot_dimension_numbers<[1], [0], [0], [1], [0, 0, 1, 1], [], []>} : vector<16x16xbf16>, vector<16x8xbf16>, vector<16x8xf32> -> vector<16x8xf32>
    %131 = vector.extract_strided_slice %50 {offsets = [0, 16], sizes = [16, 8], strides = [1, 1]} : vector<16x32xf32> to vector<16x8xf32>
    %132 = vector.extract_strided_slice %131 {offsets = [0, 4], sizes = [16, 4], strides = [1, 1]} : vector<16x8xf32> to vector<16x4xf32>
    %cst_43 = arith.constant 0.000000e+00 : f32
    %133 = vector.broadcast %cst_43 : f32 to vector<16x4xf32>
    %134 = arith.subf %133, %132 : vector<16x4xf32>
    %135 = vector.extract_strided_slice %131 {offsets = [0, 0], sizes = [16, 4], strides = [1, 1]} : vector<16x8xf32> to vector<16x4xf32>
    %136 = tpu.concatenate %134, %135 in 1 : vector<16x4xf32>, vector<16x4xf32> -> vector<16x8xf32>
    %137 = arith.mulf %131, %60 : vector<16x8xf32>
    %138 = arith.mulf %136, %58 : vector<16x8xf32>
    %139 = arith.addf %137, %138 : vector<16x8xf32>
    %140 = arith.truncf %139 : vector<16x8xf32> to vector<16x8xbf16>
    %141 = vector.extract_strided_slice %52 {offsets = [0, 16], sizes = [16, 8], strides = [1, 1]} : vector<16x32xf32> to vector<16x8xf32>
    %142 = vector.extract_strided_slice %141 {offsets = [0, 4], sizes = [16, 4], strides = [1, 1]} : vector<16x8xf32> to vector<16x4xf32>
    %cst_44 = arith.constant 0.000000e+00 : f32
    %143 = vector.broadcast %cst_44 : f32 to vector<16x4xf32>
    %144 = arith.subf %143, %142 : vector<16x4xf32>
    %145 = vector.extract_strided_slice %141 {offsets = [0, 0], sizes = [16, 4], strides = [1, 1]} : vector<16x8xf32> to vector<16x4xf32>
    %146 = tpu.concatenate %144, %145 in 1 : vector<16x4xf32>, vector<16x4xf32> -> vector<16x8xf32>
    %147 = arith.mulf %141, %56 : vector<16x8xf32>
    %148 = arith.mulf %146, %55 : vector<16x8xf32>
    %149 = arith.addf %147, %148 : vector<16x8xf32>
    %150 = arith.truncf %149 : vector<16x8xf32> to vector<16x8xbf16>
    %151 = vector.extract_strided_slice %54 {offsets = [0, 16], sizes = [16, 8], strides = [1, 1]} : vector<16x32xf32> to vector<16x8xf32>
    %152 = arith.truncf %151 : vector<16x8xf32> to vector<16x8xbf16>
    "tpu.trace_start"() <{level = 10 : i32, message = "qd,kd->qk"}> : () -> ()
    %cst_45 = arith.constant dense<0.000000e+00> : vector<16x16xf32>
    %153 = tpu.matmul %140, %150, %cst_45 {dimension_numbers = #tpu.dot_dimension_numbers<[1], [1], [0], [0], [0, 0, 1, 0], [], []>} : vector<16x8xbf16>, vector<16x8xbf16>, vector<16x16xf32> -> vector<16x16xf32>
    "tpu.trace_stop"() : () -> ()
    %cst_46 = arith.constant dense<0xFF800000> : vector<16xf32>
    %154 = vector.multi_reduction <maximumf>, %153, %cst_46 [1] : vector<16x16xf32> to vector<16xf32>
    %155 = vector.shape_cast %154 : vector<16xf32> to vector<16x1xf32>
    %156 = vector.broadcast %155 : vector<16x1xf32> to vector<16x16xf32>
    %157 = arith.subf %153, %156 : vector<16x16xf32>
    %158 = math.exp %157 : vector<16x16xf32>
    %cst_47 = arith.constant dense<0.000000e+00> : vector<16xf32>
    %159 = vector.multi_reduction <add>, %158, %cst_47 [1] : vector<16x16xf32> to vector<16xf32>
    %160 = vector.shape_cast %159 : vector<16xf32> to vector<16x1xf32>
    %161 = tpu.reciprocal %160 {approx = true} : vector<16x1xf32> -> vector<16x1xf32>
    %162 = vector.broadcast %161 : vector<16x1xf32> to vector<16x16xf32>
    %163 = arith.mulf %158, %162 : vector<16x16xf32>
    %164 = arith.truncf %163 : vector<16x16xf32> to vector<16x16xbf16>
    %cst_48 = arith.constant dense<0.000000e+00> : vector<16x8xf32>
    %165 = tpu.matmul %164, %152, %cst_48 {dimension_numbers = #tpu.dot_dimension_numbers<[1], [0], [0], [1], [0, 0, 1, 1], [], []>} : vector<16x16xbf16>, vector<16x8xbf16>, vector<16x8xf32> -> vector<16x8xf32>
    %166 = vector.extract_strided_slice %50 {offsets = [0, 24], sizes = [16, 8], strides = [1, 1]} : vector<16x32xf32> to vector<16x8xf32>
    %167 = vector.extract_strided_slice %166 {offsets = [0, 4], sizes = [16, 4], strides = [1, 1]} : vector<16x8xf32> to vector<16x4xf32>
    %cst_49 = arith.constant 0.000000e+00 : f32
    %168 = vector.broadcast %cst_49 : f32 to vector<16x4xf32>
    %169 = arith.subf %168, %167 : vector<16x4xf32>
    %170 = vector.extract_strided_slice %166 {offsets = [0, 0], sizes = [16, 4], strides = [1, 1]} : vector<16x8xf32> to vector<16x4xf32>
    %171 = tpu.concatenate %169, %170 in 1 : vector<16x4xf32>, vector<16x4xf32> -> vector<16x8xf32>
    %172 = arith.mulf %166, %60 : vector<16x8xf32>
    %173 = arith.mulf %171, %58 : vector<16x8xf32>
    %174 = arith.addf %172, %173 : vector<16x8xf32>
    %175 = arith.truncf %174 : vector<16x8xf32> to vector<16x8xbf16>
    %176 = vector.extract_strided_slice %52 {offsets = [0, 24], sizes = [16, 8], strides = [1, 1]} : vector<16x32xf32> to vector<16x8xf32>
    %177 = vector.extract_strided_slice %176 {offsets = [0, 4], sizes = [16, 4], strides = [1, 1]} : vector<16x8xf32> to vector<16x4xf32>
    %cst_50 = arith.constant 0.000000e+00 : f32
    %178 = vector.broadcast %cst_50 : f32 to vector<16x4xf32>
    %179 = arith.subf %178, %177 : vector<16x4xf32>
    %180 = vector.extract_strided_slice %176 {offsets = [0, 0], sizes = [16, 4], strides = [1, 1]} : vector<16x8xf32> to vector<16x4xf32>
    %181 = tpu.concatenate %179, %180 in 1 : vector<16x4xf32>, vector<16x4xf32> -> vector<16x8xf32>
    %182 = arith.mulf %176, %56 : vector<16x8xf32>
    %183 = arith.mulf %181, %55 : vector<16x8xf32>
    %184 = arith.addf %182, %183 : vector<16x8xf32>
    %185 = arith.truncf %184 : vector<16x8xf32> to vector<16x8xbf16>
    %186 = vector.extract_strided_slice %54 {offsets = [0, 24], sizes = [16, 8], strides = [1, 1]} : vector<16x32xf32> to vector<16x8xf32>
    %187 = arith.truncf %186 : vector<16x8xf32> to vector<16x8xbf16>
    "tpu.trace_start"() <{level = 10 : i32, message = "qd,kd->qk"}> : () -> ()
    %cst_51 = arith.constant dense<0.000000e+00> : vector<16x16xf32>
    %188 = tpu.matmul %175, %185, %cst_51 {dimension_numbers = #tpu.dot_dimension_numbers<[1], [1], [0], [0], [0, 0, 1, 0], [], []>} : vector<16x8xbf16>, vector<16x8xbf16>, vector<16x16xf32> -> vector<16x16xf32>
    "tpu.trace_stop"() : () -> ()
    %cst_52 = arith.constant dense<0xFF800000> : vector<16xf32>
    %189 = vector.multi_reduction <maximumf>, %188, %cst_52 [1] : vector<16x16xf32> to vector<16xf32>
    %190 = vector.shape_cast %189 : vector<16xf32> to vector<16x1xf32>
    %191 = vector.broadcast %190 : vector<16x1xf32> to vector<16x16xf32>
    %192 = arith.subf %188, %191 : vector<16x16xf32>
    %193 = math.exp %192 : vector<16x16xf32>
    %cst_53 = arith.constant dense<0.000000e+00> : vector<16xf32>
    %194 = vector.multi_reduction <add>, %193, %cst_53 [1] : vector<16x16xf32> to vector<16xf32>
    %195 = vector.shape_cast %194 : vector<16xf32> to vector<16x1xf32>
    %196 = tpu.reciprocal %195 {approx = true} : vector<16x1xf32> -> vector<16x1xf32>
    %197 = vector.broadcast %196 : vector<16x1xf32> to vector<16x16xf32>
    %198 = arith.mulf %193, %197 : vector<16x16xf32>
    %199 = arith.truncf %198 : vector<16x16xf32> to vector<16x16xbf16>
    %cst_54 = arith.constant dense<0.000000e+00> : vector<16x8xf32>
    %200 = tpu.matmul %199, %187, %cst_54 {dimension_numbers = #tpu.dot_dimension_numbers<[1], [0], [0], [1], [0, 0, 1, 1], [], []>} : vector<16x16xbf16>, vector<16x8xbf16>, vector<16x8xf32> -> vector<16x8xf32>
    %201 = tpu.concatenate %95, %130, %165, %200 in 1 : vector<16x8xf32>, vector<16x8xf32>, vector<16x8xf32>, vector<16x8xf32> -> vector<16x32xf32>
    %202 = arith.truncf %201 : vector<16x32xf32> to vector<16x32xbf16>
    %c0_55 = arith.constant 0 : index
    %c0_56 = arith.constant 0 : index
    %203 = vector.load %arg10[%c0_55, %c0_56] : memref<32x32xbf16, #tpu.memory_space<vmem>>, vector<32x32xbf16>
    %cst_57 = arith.constant dense<0.000000e+00> : vector<16x32xf32>
    %204 = tpu.matmul %202, %203, %cst_57 {dimension_numbers = #tpu.dot_dimension_numbers<[1], [0], [0], [1], [0, 0, 1, 1], [], []>} : vector<16x32xbf16>, vector<32x32xbf16>, vector<16x32xf32> -> vector<16x32xf32>
    %205 = arith.addf %6, %204 : vector<16x32xf32>
    %c0_58 = arith.constant 0 : index
    %c0_59 = arith.constant 0 : index
    %206 = vector.load %arg11[%c0_58, %c0_59] : memref<1x32xf32, #tpu.memory_space<vmem>>, vector<1x32xf32>
    %cst_60 = arith.constant dense<0.000000e+00> : vector<16xf32>
    %207 = vector.multi_reduction <add>, %205, %cst_60 [1] : vector<16x32xf32> to vector<16xf32>
    %208 = vector.shape_cast %207 : vector<16xf32> to vector<16x1xf32>
    %cst_61 = arith.constant 3.200000e+01 : f32
    %209 = vector.broadcast %cst_61 : f32 to vector<16x1xf32>
    %210 = arith.divf %208, %209 : vector<16x1xf32>
    %211 = vector.broadcast %210 : vector<16x1xf32> to vector<16x32xf32>
    %212 = arith.subf %205, %211 : vector<16x32xf32>
    %213 = arith.mulf %212, %212 : vector<16x32xf32>
    %cst_62 = arith.constant dense<0.000000e+00> : vector<16xf32>
    %214 = vector.multi_reduction <add>, %213, %cst_62 [1] : vector<16x32xf32> to vector<16xf32>
    %215 = vector.shape_cast %214 : vector<16xf32> to vector<16x1xf32>
    %cst_63 = arith.constant 3.200000e+01 : f32
    %216 = vector.broadcast %cst_63 : f32 to vector<16x1xf32>
    %217 = arith.divf %215, %216 : vector<16x1xf32>
    %218 = vector.broadcast %210 : vector<16x1xf32> to vector<16x32xf32>
    %219 = arith.subf %205, %218 : vector<16x32xf32>
    %cst_64 = arith.constant 9.99999974E-6 : f32
    %220 = vector.broadcast %cst_64 : f32 to vector<16x1xf32>
    %221 = arith.addf %217, %220 : vector<16x1xf32>
    %222 = math.rsqrt %221 : vector<16x1xf32>
    %223 = vector.broadcast %222 : vector<16x1xf32> to vector<16x32xf32>
    %224 = arith.mulf %219, %223 : vector<16x32xf32>
    %225 = vector.broadcast %206 : vector<1x32xf32> to vector<16x32xf32>
    %226 = arith.mulf %224, %225 : vector<16x32xf32>
    %227 = arith.truncf %226 : vector<16x32xf32> to vector<16x32xbf16>
    %c0_65 = arith.constant 0 : index
    %c0_66 = arith.constant 0 : index
    %228 = vector.load %arg12[%c0_65, %c0_66] : memref<32x128xbf16, #tpu.memory_space<vmem>>, vector<32x128xbf16>
    %cst_67 = arith.constant dense<0.000000e+00> : vector<16x128xf32>
    %229 = tpu.matmul %227, %228, %cst_67 {dimension_numbers = #tpu.dot_dimension_numbers<[1], [0], [0], [1], [0, 0, 1, 1], [], []>} : vector<16x32xbf16>, vector<32x128xbf16>, vector<16x128xf32> -> vector<16x128xf32>
    %cst_68 = arith.constant 5.000000e-01 : f32
    %230 = vector.broadcast %cst_68 : f32 to vector<16x128xf32>
    %231 = arith.mulf %230, %229 : vector<16x128xf32>
    %cst_69 = arith.constant 0.707106769 : f32
    %232 = vector.broadcast %cst_69 : f32 to vector<16x128xf32>
    %233 = arith.mulf %229, %232 : vector<16x128xf32>
    %234 = math.erf %233 : vector<16x128xf32>
    %cst_70 = arith.constant 1.000000e+00 : f32
    %235 = vector.broadcast %cst_70 : f32 to vector<16x128xf32>
    %236 = arith.addf %235, %234 : vector<16x128xf32>
    %237 = arith.mulf %231, %236 : vector<16x128xf32>
    %238 = arith.truncf %237 : vector<16x128xf32> to vector<16x128xbf16>
    %c0_71 = arith.constant 0 : index
    %c0_72 = arith.constant 0 : index
    %239 = vector.load %arg13[%c0_71, %c0_72] : memref<128x32xbf16, #tpu.memory_space<vmem>>, vector<128x32xbf16>
    %cst_73 = arith.constant dense<0.000000e+00> : vector<16x32xf32>
    %240 = tpu.matmul %238, %239, %cst_73 {dimension_numbers = #tpu.dot_dimension_numbers<[1], [0], [0], [1], [0, 0, 1, 1], [], []>} : vector<16x128xbf16>, vector<128x32xbf16>, vector<16x32xf32> -> vector<16x32xf32>
    %241 = arith.addf %205, %240 : vector<16x32xf32>
    %c0_74 = arith.constant 0 : index
    %c0_75 = arith.constant 0 : index
    %c0_76 = arith.constant 0 : index
    %242 = vector.load %arg14[%c0_74, %c0_75, %c0_76] : memref<1x16x32xf32, #tpu.memory_space<vmem>>, vector<1x16x32xf32>
    %243 = vector.shape_cast %242 : vector<1x16x32xf32> to vector<16x32xf32>
    %244 = vector.shape_cast %241 : vector<16x32xf32> to vector<1x16x32xf32>
    tpu.vector_store %arg14[%c0_74, %c0_75, %c0_76], %244 {strides = array<i32>} : memref<1x16x32xf32, #tpu.memory_space<vmem>>, vector<1x16x32xf32>,
    return
  }
  func.func @transform_0(%arg0: i32, %arg1: i32) -> (i32, i32, i32) {
    %c0_i32 = arith.constant 0 : i32
    %c0_i32_0 = arith.constant 0 : i32
    %c0_i32_1 = arith.constant 0 : i32
    return %arg0, %c0_i32, %c0_i32_0 : i32, i32, i32
  }
  func.func @transform_1(%arg0: i32, %arg1: i32) -> (i32, i32, i32) {
    %c0_i32 = arith.constant 0 : i32
    %c0_i32_0 = arith.constant 0 : i32
    return %arg0, %arg1, %c0_i32 : i32, i32, i32
  }
  func.func @transform_2(%arg0: i32, %arg1: i32) -> (i32, i32) {
    %c0_i32 = arith.constant 0 : i32
    %c0_i32_0 = arith.constant 0 : i32
    %c0_i32_1 = arith.constant 0 : i32
    return %c0_i32, %c0_i32_0 : i32, i32
  }
  func.func @transform_3(%arg0: i32, %arg1: i32) -> (i32, i32) {
    %c0_i32 = arith.constant 0 : i32
    %c0_i32_0 = arith.constant 0 : i32
    %c0_i32_1 = arith.constant 0 : i32
    return %c0_i32, %c0_i32_0 : i32, i32
  }
  func.func @transform_4(%arg0: i32, %arg1: i32) -> (i32, i32) {
    %c0_i32 = arith.constant 0 : i32
    %c0_i32_0 = arith.constant 0 : i32
    %c0_i32_1 = arith.constant 0 : i32
    return %c0_i32, %c0_i32_0 : i32, i32
  }
  func.func @transform_5(%arg0: i32, %arg1: i32) -> (i32, i32) {
    %c0_i32 = arith.constant 0 : i32
    %c0_i32_0 = arith.constant 0 : i32
    %c0_i32_1 = arith.constant 0 : i32
    return %c0_i32, %c0_i32_0 : i32, i32
  }
  func.func @transform_6(%arg0: i32, %arg1: i32) -> (i32, i32) {
    %c0_i32 = arith.constant 0 : i32
    %c0_i32_0 = arith.constant 0 : i32
    %c0_i32_1 = arith.constant 0 : i32
    return %c0_i32, %c0_i32_0 : i32, i32
  }
  func.func @transform_7(%arg0: i32, %arg1: i32) -> (i32, i32) {
    %c0_i32 = arith.constant 0 : i32
    %c0_i32_0 = arith.constant 0 : i32
    %c0_i32_1 = arith.constant 0 : i32
    return %c0_i32, %c0_i32_0 : i32, i32
  }
  func.func @transform_8(%arg0: i32, %arg1: i32) -> (i32, i32) {
    %c0_i32 = arith.constant 0 : i32
    %c0_i32_0 = arith.constant 0 : i32
    %c0_i32_1 = arith.constant 0 : i32
    return %c0_i32, %c0_i32_0 : i32, i32
  }
  func.func @transform_9(%arg0: i32, %arg1: i32) -> (i32, i32) {
    %c0_i32 = arith.constant 0 : i32
    %c0_i32_0 = arith.constant 0 : i32
    %c0_i32_1 = arith.constant 0 : i32
    return %c0_i32, %c0_i32_0 : i32, i32
  }
  func.func @transform_10(%arg0: i32, %arg1: i32) -> (i32, i32) {
    %c0_i32 = arith.constant 0 : i32
    %c0_i32_0 = arith.constant 0 : i32
    %c0_i32_1 = arith.constant 0 : i32
    return %c0_i32, %c0_i32_0 : i32, i32
  }
  func.func @transform_11(%arg0: i32, %arg1: i32) -> (i32, i32) {
    %c0_i32 = arith.constant 0 : i32
    %c0_i32_0 = arith.constant 0 : i32
    %c0_i32_1 = arith.constant 0 : i32
    return %c0_i32, %c0_i32_0 : i32, i32
  }
  func.func @transform_12(%arg0: i32, %arg1: i32) -> (i32, i32, i32) {
    %c0_i32 = arith.constant 0 : i32
    %c0_i32_0 = arith.constant 0 : i32
    return %arg0, %arg1, %c0_i32 : i32, i32, i32
  }
}

</mosaic_0001>

<bundles_post_ra>
// kernel: tpu_custom_call.1
= control target key start
LH: loop header
LB: loop body
LE: loop exit
PB: predicated region body
PF: predicated region fallthrough
CT: control target
= control target key end

     0   :  { %s2913_s0 = inlined_call_operand.vmem [shape: f32[2,16,32], index: 0, kind: input, shape index: {}]   ;;  %s2914_s1 = inlined_call_operand.vmem [shape: f32[2,16,32], index: 1, kind: input, shape index: {}]   ;;  %s2915_s2 = inlined_call_operand.vmem [shape: f32[1,32], index: 2, kind: input, shape index: {}]   ;;  %s2916_s3 = inlined_call_operand.vmem [shape: bf16[32,32], index: 3, kind: input, shape index: {}]   ;;  %s2917_s4 = inlined_call_operand.vmem [shape: bf16[32,32], index: 4, kind: input, shape index: {}]   ;;  %s2918_s5 = inlined_call_operand.vmem [shape: bf16[32,32], index: 5, kind: input, shape index: {}]   ;;  %s2919_s6 = inlined_call_operand.vmem [shape: f32[16,8], index: 6, kind: input, shape index: {}]   ;;  %s2920_s7 = inlined_call_operand.vmem [shape: f32[16,8], index: 7, kind: input, shape index: {}]   ;;  %s2921_s8 = inlined_call_operand.vmem [shape: bf16[32,32], index: 8, kind: input, shape index: {}]   ;;  %s2922_s9 = inlined_call_operand.vmem [shape: f32[1,32], index: 9, kind: input, shape index: {}]   ;;  %s2923_s10 = inlined_call_operand.vmem [shape: bf16[32,128], index: 10, kind: input, shape index: {}]   ;;  %s2924_s11 = inlined_call_operand.vmem [shape: bf16[128,32], index: 11, kind: input, shape index: {}]   ;;  %s2925_s12 = inlined_call_operand.hbm [shape: f32[2,16,32], index: 12, kind: output, shape index: {}]  }
   0x1   :  { %2929 = sst [smem:[#allocation5_spill]] %s2913_s0 }
   0x2   :  { %2930 = sst [smem:[#allocation6_spill]] %s2914_s1 }
   0x3   :  { %2931 = sst [smem:[#allocation7_spill]] %s2915_s2 }
   0x4   :  { %17 = vsyncpa [#allocation3], 0 }
   0x5   :  { %19 = vsyncpa [#allocation3 + $0x1], 0  ;;  %s2411_s21 = smov 0   ;;  %s2413_s22 = smov 0  }
   0x6   :  { %s2415_s23 = smov 0   ;;  %s2417_s24 = smov 0  }
   0x7   :  { %s2419_s25 = smov 0   ;;  %s2421_s26 = smov 0  }
   0x8 LB: > { %s1900_s27 = sadd.s32 4294967295, %s2329_s26   ;;  %s1901_s28 = sadd.s32 4294967294, %s2329_s26   ;;  %s2329_s26 = sphi %s2421_s26, %s25_s26   ;;  %s2325_s25 = sphi %s2419_s25, %s2943_s25   ;;  %s2321_s24 = sphi %s2417_s24, %s2942_s24   ;;  %s2317_s23 = sphi %s2415_s23, %s2941_s23   ;;  %s2313_s22 = sphi %s2413_s22, %s2940_s22   ;;  %s2309_s21 = sphi %s2411_s21, %s2939_s21  }
   0x9   : > { %s37_s29 = sadd.s32 1, %s2325_s25  ;;  %s310_s30 = sadd.s32 1, %s2317_s23 }
   0xa   : > { %p39_p0 = scmp.ge.s32.totalorder %s37_s29, 2  ;;  %p320_p1 = scmp.ne.s32.totalorder %s2317_s23, %s2313_s22 }
   0xb   : > { %p321_p2 = scmp.eq.s32.totalorder %s1900_s27, 1  ;;  %p326_p3 = scmp.ne.s32.totalorder %s2313_s22, %s2309_s21 }
   0xc   : > { %s2945_s29 = smov (%p39_p0, %s37_s29), 0  ;;  %p327_p5 = scmp.eq.s32.totalorder %s1901_s28, 1 }
   0xd   : > { %p2451_p4 = por %p321_p2, %p320_p1  ;;  %s305_s14 = ssub.s32 %s2325_s25, %s2945_s29 }
   0xe   : > { %p1904_p6 = scmp.ge.s32.totalorder %s2329_s26, 1  ;;  %p308_p7 = scmp.eq.s32.totalorder %s305_s14, 0 }
   0xf   : > { %p2458_p8 = por %p327_p5, %p326_p3  ;;  %p396_p9 = scmp.lt.s32.totalorder %s2329_s26, 3 }
  0x10   : > { %s2464_s16 = scalar_select %p308_p7, %s2317_s23, %s310_s30  }
  0x11   : > { %p397_p10 = pnand %p1904_p6, %p396_p9 }
  0x12   : > { %p447_p11 = scmp.lt.s32.totalorder (!%p397_p10), %s2321_s24, 1  ;;  %vm470_vm0 = vcmask (!%p397_p10), 261120   ;;  %s2934_s1 = sld [smem:[#allocation6_spill]] (!%p397_p10)  ;;  %v2183_v28 = vld [vmem:[%s2916_s3] sm:$0xff] (!%p397_p10)   ;;  %v2331_v29 = vmov (!%p397_p10), 0.0   ;;  %v2184_v30 = vld [vmem:[%s2916_s3 + $0x8] sm:$0xff] (!%p397_p10)  }
  0x13   : > { %400 = sbr.rel (%p397_p10) target bundleno = 2868 (0xb34), region = 68  ;;  %s2935_s0 = sld [smem:[#allocation5_spill]] (!%p397_p10)  ;;  %1991 = vmatprep.subr.bf16.mxu0 (!%p397_p10), %v2331_v29  ;;  %2015 = vmatprep.subr.bf16.mxu1 (!%p397_p10), %v2331_v29  ;;  %vm2332_vm1 = vmmov (!%p397_p10), 0   ;;  %v2185_v52 = vld [vmem:[%s2917_s4] sm:$0xff] (!%p397_p10)   ;;  %v2186_v56 = vld [vmem:[%s2917_s4 + $0x8] sm:$0xff] (!%p397_p10)   ;;  %vm741_vm2 = vcmask (!%p397_p10), 31744  }
  0x14   : > { %1992 = vmatpush3.bf16.msra.mxu0 (!%p397_p10), %v2183_v28  ;;  %1995 = vmatprep.mubr.msk.bf16.mxu0 (!%p397_p10), %vm2332_vm1, %v2331_v29  ;;  %s2936_s2 = sld [smem:[#allocation7_spill]] (!%p397_p10)  ;;  %v2187_v59 = vld [vmem:[%s2918_s5] sm:$0xff] (!%p397_p10)   ;;  %v2188_v61 = vld [vmem:[%s2918_s5 + $0x8] sm:$0xff] (!%p397_p10)   ;;  %s2335_s19 = smov (!%p397_p10), 108   ;;  %vm779_vm3 = vcmask (!%p397_p10), 64512   ;;  %vm827_vm4 = vcmask (!%p397_p10), 130048  }
  0x15   : > { %1993 = vmatprep.subr.bf16.mxu0 (!%p397_p10), %v2331_v29  ;;  %2017 = vmatprep.mubr.msk.bf16.mxu1 (!%p397_p10), %vm2332_vm1, %v2331_v29  ;;  %s2336_s20 = smov (!%p397_p10), 100   ;;  %s2339_s28 = smov (!%p397_p10), 24   ;;  %vm1507_vm5 = vcmask (!%p397_p10), 195584  }
  0x16   : > { %s2342_s14 = smov (!%p397_p10), 112  }
  0x18   : > { %1994 = vmatpush3.bf16.msra.mxu0 (!%p397_p10), %v2184_v30 }
  0x19   : > { %1999 = vmatprep.subr.bf16.mxu0 (!%p397_p10), %v2331_v29 }
  0x1a   : > { %s448_s17 = scalar_select %p447_p11, %s2321_s24, 1  ;;  %v1910_v46 = vld [vmem:[%s2936_s2] ss:$0 sm:$0xff] }
  0x1c   : > { %s1948_s18 = sshll.u32 %s448_s17, 4  ;;  %s2926_s17 = smov 124  }
  0x1d   : > { %s2471_s27 = scalar_lea.vmem %s2934_s1, %s1948_s18  ;;  %s451_s30 = scalar_lea.vmem %s2935_s0, %s1948_s18 }
  0x1e   : > { %v468_v0 = vld [vmem:[%s2471_s27] sm:$0xff]  ;;  %v469_v1 = vld [vmem:[%s2471_s27 + $0x8] sm:$0xff]  ;;  %s2334_s18 = smov 116   ;;  %s2344_s0 = smov [#allocation2]  }
  0x1f   : > { %v466_v2 = vld [vmem:[%s451_s30] sm:$0xff]  ;;  %v507_v3 = vsel %vm470_vm0, %v468_v0, 0.0  ;;  %v467_v5 = vld [vmem:[%s451_s30 + $0x8] sm:$0xff]  ;;  %v510_v6 = vsel %vm470_vm0, %v469_v1, 0.0  ;;  %s2928_s30 = smov 8   ;;  %s2255_s1 = sshll.u32 %s2344_s0, 4  ;;  %s2256_s1 = int_to_ptr.vmem [resolvable:$false] %s2255_s1 }
  0x20   : > { %v471_v4 = vsel %vm470_vm0, %v466_v2, 0.0  ;;  %508 = vadd.xlane.f32.xlu0 %v507_v3  ;;  %v474_v7 = vsel %vm470_vm0, %v467_v5, 0.0  ;;  %s2257_s2 = scalar_lea.vmem %s2256_s1, 512 }
  0x21   : > { %472 = vadd.xlane.f32.xlu1 %v471_v4 }
  0x24   : > { %511 = vadd.xlane.f32.xlu0 %v510_v6 }
  0x25   : > { %475 = vadd.xlane.f32.xlu1 %v474_v7 }
  0xad   : > { %v509_v8 = vpop.xlane.xlu0 %508 }
  0xae   : > { %v473_v9 = vpop.xlane.xlu1 %472  ;;  %v513_v10 = vmul.f32 0.03125, %v509_v8 }
  0xaf   : > { %v478_v11 = vmul.f32 0.03125, %v473_v9 }
  0xb0   : > { %v515_v12 = vsub.f32 %v468_v0, %v513_v10 }
  0xb1   : > { %v480_v13 = vsub.f32 %v466_v2, %v478_v11  ;;  %v512_v14 = vpop.xlane.xlu0 %511 }
  0xb2   : > { %v476_v15 = vpop.xlane.xlu1 %475  ;;  %v514_v16 = vmul.f32 0.03125, %v512_v14  ;;  %v517_v17 = vmul.f32 %v515_v12, %v515_v12 }
  0xb3   : > { %v479_v18 = vmul.f32 0.03125, %v476_v15  ;;  %v482_v19 = vmul.f32 %v480_v13, %v480_v13  ;;  %v2596_v15 = vld [vmem:[%s2920_s7] sm:$0xff] }
  0xb4   : > { %v516_v20 = vsub.f32 %v469_v1, %v514_v16  ;;  %v519_v21 = vsel %vm470_vm0, %v517_v17, 0.0  ;;  %v2610_v16 = vld [vmem:[%s2920_s7 + $0x8] sm:$0xff] }
  0xb5   : > { %v481_v22 = vsub.f32 %v467_v5, %v479_v18  ;;  %520 = vadd.xlane.f32.xlu0 %v519_v21  ;;  %v484_v24 = vsel %vm470_vm0, %v482_v19, 0.0  ;;  %v2625_v19 = vld [vmem:[%s2919_s6] sm:$0xff] }
  0xb6   : > { %v518_v23 = vmul.f32 %v516_v20, %v516_v20 }
  0xb7   : > { %v483_v25 = vmul.f32 %v481_v22, %v481_v22 }
  0xb8   : > { %v522_v26 = vsel %vm470_vm0, %v518_v23, 0.0 }
  0xb9   : > { %523 = vadd.xlane.f32.xlu1 %v522_v26  ;;  %485 = vadd.xlane.f32.xlu0 %v484_v24  ;;  %v487_v27 = vsel %vm470_vm0, %v483_v25, 0.0 }
  0xbd   : > { %488 = vadd.xlane.f32.xlu1 %v487_v27 }
 0x142   : > { %v521_v31 = vpop.xlane.xlu0 %520 }
 0x143   : > { %v525_v32 = vmul.f32 0.03125, %v521_v31 }
 0x145   : > { %v527_v33 = vadd.f32 1e-05, %v525_v32 }
 0x146   : > { %v486_v34 = vpop.xlane.xlu0 %485  ;;  %v524_v35 = vpop.xlane.xlu1 %523 }
 0x147   : > { %v526_v36 = vmul.f32 0.03125, %v524_v35  ;;  %2201 = vrsqrt.f32 %v527_v33  ;;  %v490_v37 = vmul.f32 0.03125, %v486_v34 }
 0x149   : > { %v528_v38 = vadd.f32 1e-05, %v526_v36  ;;  %v492_v41 = vadd.f32 1e-05, %v490_v37 }
 0x14a   : > { %v489_v39 = vpop.xlane.xlu1 %488 }
 0x14b   : > { %v491_v40 = vmul.f32 0.03125, %v489_v39  ;;  %2203 = vrsqrt.f32 %v528_v38 }
 0x14d   : > { %v493_v42 = vadd.f32 1e-05, %v491_v40 }
 0x14f   : > { %2205 = vrsqrt.f32 %v493_v42 }
 0x150   : > { %2207 = vrsqrt.f32 %v492_v41 }
 0x151   : > { %v2202_v43 = vpop.eup %2201 }
 0x152   : > { %v531_v44 = vmul.f32 %v2202_v43, %v515_v12 }
 0x154   : > { %v533_v49 = vmul.f32 %v1910_v46, %v531_v44 }
 0x155   : > { %v2204_v45 = vpop.eup %2203 }
 0x156   : > { %v532_v47 = vmul.f32 %v2204_v45, %v516_v20 }
 0x158   : > { %v534_v50 = vmul.f32 %v1910_v46, %v532_v47 }
 0x159   : > { %v2206_v48 = vpop.eup %2205 }
 0x15a   : > { %v2208_v51 = vpop.eup %2207  ;;  %v497_v53 = vmul.f32 %v2206_v48, %v481_v22  ;;  %v535_v54 = vpack.c.bf16 %v534_v50, %v533_v49  ;;  %v2631_v22 = vld [vmem:[%s2919_s6 + $0x8] sm:$0xff] }
 0x15b   : > { %v496_v55 = vmul.f32 %v2208_v51, %v480_v13 }
 0x15c   : > { %1996 = vmatmul.mubr.msk.bf16.vlgmr.msra.gmra.mrb[0].mxu0 %vm470_vm0, %v535_v54  ;;  %v505_v57 = vmul.f32 %v1910_v46, %v497_v53 }
 0x15d   : > { %2000 = vmatpush3.bf16.msra.mxu0 %v2185_v52  ;;  %2003 = vmatprep.mubr.msk.bf16.mxu0 %vm2332_vm1, %v2331_v29  ;;  %v504_v58 = vmul.f32 %v1910_v46, %v496_v55 }
 0x15e   : > { %2001 = vmatprep.subr.bf16.mxu0 %v2331_v29 }
 0x15f   : > { %v506_v60 = vpack.c.bf16 %v505_v57, %v504_v58 }
 0x161   : > { %2002 = vmatpush3.bf16.msra.mxu0 %v2186_v56 }
 0x162   : > { %2007 = vmatprep.subr.bf16.mxu0 %v2331_v29 }
 0x164   : > { %2004 = vmatmul.mubr.msk.bf16.vlgmr.msra.gmra.mrb[4].mxu0 %vm470_vm0, %v506_v60 }
 0x165   : > { %2008 = vmatpush3.bf16.msra.mxu0 %v2187_v59  ;;  %2011 = vmatprep.mubr.msk.bf16.mxu0 %vm2332_vm1, %v2331_v29 }
 0x166   : > { %2009 = vmatprep.subr.bf16.mxu0 %v2331_v29 }
 0x169   : > { %2010 = vmatpush3.bf16.msra.mxu0 %v2188_v61 }
 0x16a   : > { %2021 = vmatprep.subr.bf16.mxu0 %v2331_v29 }
 0x16c   : > { %2012 = vmatmul.mubr.msk.bf16.vlgmr.msra.gmra.mrb[8].mxu0 %vm470_vm0, %v506_v60 }
 0x16d   : > { %2023 = vmatprep.mubr.msk.bf16.mxu0 %vm2332_vm1, %v2331_v29 }
 0x22f   : > { %v2528_v62 = vpop.f32.mrb[0].mxu0 }
 0x230   : > { %901 = vrot.lane.b32.xlu0 %v2528_v62, %s2926_s17  ;;  %v1997_v63 = vpop.f32.mrb[1].mxu0  ;;  %v2537_v2 = vsub.f32 0.0, %v2528_v62 }
 0x231   : > { %v2532_v0 = vpop.f32.mrb[2].mxu0 }
 0x232   : > { %903 = vrot.lane.b32.xlu1 %v2532_v0, %s2926_s17  ;;  %v1998_v1 = vpop.f32.mrb[3].mxu0  ;;  %v2542_v3 = vsub.f32 0.0, %v2532_v0 }
 0x234   : > { %895 = vrot.lane.b32.xlu0 %v2537_v2, %s2334_s18 }
 0x236   : > { %897 = vrot.lane.b32.xlu1 %v2542_v3, %s2334_s18 }
 0x237   : > { %v2546_v4 = vpop.f32.mrb[4].mxu0 }
 0x238   : > { %1093 = vrot.lane.b32.xlu0 %v2537_v2, %s2335_s19  ;;  %v2005_v5 = vpop.f32.mrb[5].mxu0  ;;  %v2559_v8 = vsub.f32 0.0, %v2546_v4 }
 0x239   : > { %v2550_v6 = vpop.f32.mrb[6].mxu0 }
 0x23a   : > { %1095 = vrot.lane.b32.xlu1 %v2542_v3, %s2335_s19  ;;  %v2006_v7 = vpop.f32.mrb[7].mxu0  ;;  %v2576_v14 = vsub.f32 0.0, %v2550_v6 }
 0x23c   : > { %1134 = vrot.lane.b32.xlu0 %v2546_v4, %s2334_s18 }
 0x23e   : > { %938 = vrot.lane.b32.xlu1 %v2546_v4, %s2926_s17 }
 0x23f   : > { %v706_v9 = vpop.f32.mrb[8].mxu0 }
 0x240   : > { %932 = vrot.lane.b32.xlu0 %v2559_v8, %s2334_s18  ;;  %v2013_v10 = vpop.f32.mrb[9].mxu0 }
 0x241   : > { %v709_v11 = vpop.f32.mrb[10].mxu0 }
 0x242   : > { %v2563_v12 = vpack.c.bf16 %v709_v11, %v706_v9  ;;  %940 = vrot.lane.b32.xlu1 %v2550_v6, %s2926_s17  ;;  %v2014_v13 = vpop.f32.mrb[11].mxu0  ;;  %s2937_s17 = smov 124  }
 0x244   : > { %1099 = vrot.lane.b32.xlu0 %v2528_v62, %s2334_s18  ;;  %2022 = vmatpush3.bf16.msra.mxu0 %v2563_v12 }
 0x245   : > { %2033 = vmatprep.subr.bf16.mxu0 %v2331_v29 }
 0x246   : > { %1136 = vrot.lane.b32.xlu1 %v2550_v6, %s2334_s18 }
 0x248   : > { %1128 = vrot.lane.b32.xlu0 %v2559_v8, %s2335_s19 }
 0x24a   : > { %934 = vrot.lane.b32.xlu1 %v2576_v14, %s2334_s18 }
 0x24c   : > { %1321 = vrot.lane.b32.xlu0 %v2559_v8, %s2336_s20 }
 0x24e   : > { %1101 = vrot.lane.b32.xlu1 %v2532_v0, %s2334_s18  ;;  %s2338_s18 = smov 16  }
 0x250   : > { %1327 = vrot.lane.b32.xlu0 %v2546_v4, %s2335_s19 }
 0x252   : > { %1130 = vrot.lane.b32.xlu1 %v2576_v14, %s2335_s19 }
 0x254   : > { %1286 = vrot.lane.b32.xlu0 %v2537_v2, %s2336_s20 }
 0x256   : > { %1329 = vrot.lane.b32.xlu1 %v2550_v6, %s2335_s19 }
 0x258   : > { %1292 = vrot.lane.b32.xlu0 %v2528_v62, %s2335_s19 }
 0x25a   : > { %1323 = vrot.lane.b32.xlu1 %v2576_v14, %s2336_s20 }
 0x25c   : > { %948 = vrot.lane.b32.xlu0 %v2596_v15, %s2928_s30 }
 0x25e   : > { %1288 = vrot.lane.b32.xlu1 %v2542_v3, %s2336_s20  ;;  %s2341_s20 = smov 120  }
 0x260   : > { %911 = vrot.lane.b32.xlu0 %v2596_v15, %s2928_s30 }
 0x262   : > { %1294 = vrot.lane.b32.xlu1 %v2532_v0, %s2335_s19  ;;  %s2340_s19 = smov 4  }
 0x264   : > { %1142 = vrot.lane.b32.xlu0 %v2596_v15, %s2338_s18 }
 0x266   : > { %950 = vrot.lane.b32.xlu1 %v2610_v16, %s2928_s30 }
 0x268   : > { %1107 = vrot.lane.b32.xlu0 %v2596_v15, %s2338_s18 }
 0x26a   : > { %913 = vrot.lane.b32.xlu1 %v2610_v16, %s2928_s30 }
 0x26e   : > { %1144 = vrot.lane.b32.xlu1 %v2610_v16, %s2338_s18 }
 0x272   : > { %1109 = vrot.lane.b32.xlu1 %v2610_v16, %s2338_s18 }
 0x2a2   : > { %v902_v17 = vpop.permute.xlu0 %901 }
 0x2a4   : > { %v904_v18 = vpop.permute.xlu1 %903 }
 0x2a6   : > { %v896_v20 = vpop.permute.xlu0 %895 }
 0x2a7   : > { %v907_v21 = vsel %vm741_vm2, %v896_v20, %v902_v17 }
 0x2a8   : > { %v919_v23 = vmul.f32 %v907_v21, %v2625_v19  ;;  %v898_v24 = vpop.permute.xlu1 %897 }
 0x2a9   : > { %v908_v25 = vsel %vm741_vm2, %v898_v24, %v904_v18 }
 0x2aa   : > { %v920_v26 = vmul.f32 %v908_v25, %v2631_v22  ;;  %v1094_v27 = vpop.permute.xlu0 %1093  ;;  %923 = vrot.lane.b32.xlu0 %v919_v23, %s2928_s30 }
 0x2ac   : > { %925 = vrot.lane.b32.xlu1 %v920_v26, %s2928_s30  ;;  %v1096_v28 = vpop.permute.xlu1 %1095 }
 0x2ae   : > { %v1135_v30 = vpop.permute.xlu0 %1134 }
 0x2b0   : > { %v939_v31 = vpop.permute.xlu1 %938 }
 0x2b2   : > { %v933_v32 = vpop.permute.xlu0 %932 }
 0x2b3   : > { %v944_v33 = vsel %vm741_vm2, %v933_v32, %v939_v31 }
 0x2b4   : > { %v956_v34 = vmul.f32 %v944_v33, %v2625_v19  ;;  %v941_v35 = vpop.permute.xlu1 %940 }
 0x2b6   : > { %v1100_v36 = vpop.permute.xlu0 %1099  ;;  %960 = vrot.lane.b32.xlu0 %v956_v34, %s2928_s30 }
 0x2b7   : > { %v1105_v42 = vsel %vm741_vm2, %v1094_v27, %v1100_v36 }
 0x2b8   : > { %v1137_v37 = vpop.permute.xlu1 %1136  ;;  %v1115_v46 = vmul.f32 %v1105_v42, %v2625_v19 }
 0x2ba   : > { %v1129_v38 = vpop.permute.xlu0 %1128  ;;  %1335 = vrot.lane.b32.xlu0 %v2596_v15, %s2339_s28 }
 0x2bb   : > { %v1140_v39 = vsel %vm741_vm2, %v1129_v38, %v1135_v30 }
 0x2bc   : > { %v1150_v40 = vmul.f32 %v1140_v39, %v2625_v19  ;;  %v935_v41 = vpop.permute.xlu1 %934 }
 0x2bd   : > { %v945_v43 = vsel %vm741_vm2, %v935_v41, %v941_v35 }
 0x2be   : > { %v957_v44 = vmul.f32 %v945_v43, %v2631_v22  ;;  %v1322_v45 = vpop.permute.xlu0 %1321  ;;  %1154 = vrot.lane.b32.xlu0 %v1150_v40, %s2338_s18 }
 0x2c0   : > { %962 = vrot.lane.b32.xlu1 %v957_v44, %s2928_s30  ;;  %v1102_v47 = vpop.permute.xlu1 %1101 }
 0x2c1   : > { %v1106_v55 = vsel %vm741_vm2, %v1096_v28, %v1102_v47 }
 0x2c2   : > { %v1328_v48 = vpop.permute.xlu0 %1327  ;;  %1119 = vrot.lane.b32.xlu0 %v1115_v46, %s2338_s18  ;;  %v1116_v57 = vmul.f32 %v1106_v55, %v2631_v22 }
 0x2c3   : > { %v1333_v49 = vsel %vm741_vm2, %v1322_v45, %v1328_v48 }
 0x2c4   : > { %v1343_v50 = vmul.f32 %v1333_v49, %v2625_v19  ;;  %1337 = vrot.lane.b32.xlu1 %v2610_v16, %s2339_s28  ;;  %v1131_v51 = vpop.permute.xlu1 %1130 }
 0x2c5   : > { %v1141_v52 = vsel %vm741_vm2, %v1131_v51, %v1137_v37 }
 0x2c6   : > { %v1151_v53 = vmul.f32 %v1141_v52, %v2631_v22  ;;  %v1287_v54 = vpop.permute.xlu0 %1286  ;;  %1347 = vrot.lane.b32.xlu0 %v1343_v50, %s2339_s28 }
 0x2c8   : > { %1156 = vrot.lane.b32.xlu1 %v1151_v53, %s2338_s18  ;;  %v1330_v56 = vpop.permute.xlu1 %1329 }
 0x2ca   : > { %v1293_v58 = vpop.permute.xlu0 %1292  ;;  %1300 = vrot.lane.b32.xlu0 %v2596_v15, %s2339_s28 }
 0x2cb   : > { %v1298_v59 = vsel %vm741_vm2, %v1287_v54, %v1293_v58 }
 0x2cc   : > { %v1308_v60 = vmul.f32 %v1298_v59, %v2625_v19  ;;  %1121 = vrot.lane.b32.xlu1 %v1116_v57, %s2338_s18  ;;  %v1324_v61 = vpop.permute.xlu1 %1323 }
 0x2cd   : > { %v1334_v63 = vsel %vm741_vm2, %v1324_v61, %v1330_v56 }
 0x2ce   : > { %v1344_v1 = vmul.f32 %v1334_v63, %v2631_v22  ;;  %1312 = vrot.lane.b32.xlu0 %v1308_v60, %s2339_s28 }
 0x2d0   : > { %1349 = vrot.lane.b32.xlu1 %v1344_v1, %s2339_s28  ;;  %v1289_v5 = vpop.permute.xlu1 %1288 }
 0x2d2   : > { %755 = vrot.lane.b32.xlu0 %v2559_v8, %s2937_s17  ;;  %v949_v8 = vpop.permute.xlu0 %948 }
 0x2d3   : > { %v954_v32 = vmul.f32 %v949_v8, %v2546_v4 }
 0x2d4   : > { %1302 = vrot.lane.b32.xlu1 %v2610_v16, %s2339_s28  ;;  %v1295_v7 = vpop.permute.xlu1 %1294 }
 0x2d5   : > { %v1299_v9 = vsel %vm741_vm2, %v1289_v5, %v1295_v7 }
 0x2d6   : > { %v1309_v10 = vmul.f32 %v1299_v9, %v2631_v22  ;;  %763 = vrot.lane.b32.xlu0 %v2546_v4, %s2340_s19  ;;  %v912_v13 = vpop.permute.xlu0 %911 }
 0x2d8   : > { %1314 = vrot.lane.b32.xlu1 %v1309_v10, %s2339_s28  ;;  %v951_v11 = vpop.permute.xlu1 %950 }
 0x2d9   : > { %v955_v33 = vmul.f32 %v951_v11, %v2550_v6 }
 0x2da   : > { %727 = vrot.lane.b32.xlu0 %v2537_v2, %s2937_s17  ;;  %v1143_v18 = vpop.permute.xlu0 %1142 }
 0x2db   : > { %v1148_v41 = vmul.f32 %v1143_v18, %v2546_v4 }
 0x2dc   : > { %757 = vrot.lane.b32.xlu1 %v2576_v14, %s2937_s17  ;;  %v914_v17 = vpop.permute.xlu1 %913  ;;  %v917_v14 = vmul.f32 %v912_v13, %v2528_v62 }
 0x2dd   : > { %v918_v24 = vmul.f32 %v914_v17, %v2532_v0 }
 0x2de   : > { %735 = vrot.lane.b32.xlu0 %v2528_v62, %s2340_s19  ;;  %v1108_v21 = vpop.permute.xlu0 %1107 }
 0x2df   : > { %v1113_v47 = vmul.f32 %v1108_v21, %v2528_v62 }
 0x2e0   : > { %765 = vrot.lane.b32.xlu1 %v2550_v6, %s2340_s19  ;;  %v1145_v20 = vpop.permute.xlu1 %1144 }
 0x2e1   : > { %v1149_v42 = vmul.f32 %v1145_v20, %v2550_v6 }
 0x2e4   : > { %729 = vrot.lane.b32.xlu1 %v2542_v3, %s2937_s17  ;;  %v1110_v2 = vpop.permute.xlu1 %1109  ;;  %s2343_s17 = smov 104  }
 0x2e5   : > { %v1114_v48 = vmul.f32 %v1110_v2, %v2532_v0 }
 0x2e8   : > { %737 = vrot.lane.b32.xlu1 %v2532_v0, %s2340_s19 }
 0x31c   : > { %v924_v23 = vpop.permute.xlu0 %923 }
 0x31d   : > { %v929_v26 = vadd.f32 %v924_v23, %v917_v14 }
 0x31e   : > { %v926_v25 = vpop.permute.xlu1 %925 }
 0x31f   : > { %v930_v27 = vadd.f32 %v926_v25, %v918_v24  ;;  %v771_v24 = vmul.f32 %v2596_v15, %v2546_v4  ;;  %v772_v25 = vmul.f32 %v2610_v16, %v2550_v6 }
 0x321   : > { %v931_v28 = vpack.c.bf16 %v930_v27, %v929_v26 }
 0x323   : > { %970 = vrot.lane.b32.xlu1 %v931_v28, %s2341_s20 }
 0x328   : > { %v961_v3 = vpop.permute.xlu0 %960 }
 0x329   : > { %v966_v35 = vadd.f32 %v961_v3, %v954_v32 }
 0x32c   : > { %v1336_v30 = vpop.permute.xlu0 %1335 }
 0x32d   : > { %v1341_v54 = vmul.f32 %v1336_v30, %v2546_v4  ;;  %v744_v4 = vmul.f32 %v2596_v15, %v2528_v62 }
 0x330   : > { %v1155_v31 = vpop.permute.xlu0 %1154 }
 0x331   : > { %v1160_v44 = vadd.f32 %v1155_v31, %v1148_v41 }
 0x332   : > { %v963_v34 = vpop.permute.xlu1 %962 }
 0x333   : > { %v967_v36 = vadd.f32 %v963_v34, %v955_v33 }
 0x334   : > { %v1120_v37 = vpop.permute.xlu0 %1119 }
 0x335   : > { %v968_v38 = vpack.c.bf16 %v967_v36, %v966_v35  ;;  %v1125_v51 = vadd.f32 %v1120_v37, %v1113_v47 }
 0x336   : > { %v1338_v39 = vpop.permute.xlu1 %1337 }
 0x337   : > { %973 = vrot.lane.b32.xlu0 %v968_v38, %s2341_s20  ;;  %v1342_v55 = vmul.f32 %v1338_v39, %v2550_v6  ;;  %v745_v6 = vmul.f32 %v2610_v16, %v2532_v0 }
 0x338   : > { %v1348_v40 = vpop.permute.xlu0 %1347 }
 0x339   : > { %v1353_v58 = vadd.f32 %v1348_v40, %v1341_v54 }
 0x33a   : > { %v1157_v43 = vpop.permute.xlu1 %1156 }
 0x33b   : > { %v1161_v45 = vadd.f32 %v1157_v43, %v1149_v42 }
 0x33c   : > { %v1301_v46 = vpop.permute.xlu0 %1300 }
 0x33d   : > { %v1162_v49 = vpack.c.bf16 %v1161_v45, %v1160_v44  ;;  %v1306_v5 = vmul.f32 %v1301_v46, %v2528_v62 }
 0x33e   : > { %v1122_v50 = vpop.permute.xlu1 %1121 }
 0x33f   : > { %v1126_v52 = vadd.f32 %v1122_v50, %v1114_v48  ;;  %1167 = vrot.lane.b32.xlu0 %v1162_v49, %s2342_s14 }
 0x340   : > { %v1313_v53 = vpop.permute.xlu0 %1312 }
 0x341   : > { %v1127_v56 = vpack.c.bf16 %v1126_v52, %v1125_v51  ;;  %v1318_v10 = vadd.f32 %v1313_v53, %v1306_v5 }
 0x342   : > { %v1350_v57 = vpop.permute.xlu1 %1349 }
 0x343   : > { %v1354_v59 = vadd.f32 %v1350_v57, %v1342_v55  ;;  %1164 = vrot.lane.b32.xlu1 %v1127_v56, %s2342_s14 }
 0x344   : > { %v756_v60 = vpop.permute.xlu0 %755 }
 0x345   : > { %v1355_v61 = vpack.c.bf16 %v1354_v59, %v1353_v58 }
 0x346   : > { %v1303_v63 = vpop.permute.xlu1 %1302 }
 0x347   : > { %1360 = vrot.lane.b32.xlu0 %v1355_v61, %s2343_s17  ;;  %v1307_v7 = vmul.f32 %v1303_v63, %v2532_v0 }
 0x348   : > { %v764_v1 = vpop.permute.xlu0 %763 }
 0x349   : > { %v769_v18 = vsel %vm741_vm2, %v756_v60, %v764_v1 }
 0x34a   : > { %v1315_v9 = vpop.permute.xlu1 %1314  ;;  %v773_v20 = vmul.f32 %v769_v18, %v2625_v19 }
 0x34b   : > { %v1319_v8 = vadd.f32 %v1315_v9, %v1307_v7 }
 0x34c   : > { %v728_v13 = vpop.permute.xlu0 %727  ;;  %v775_v27 = vadd.f32 %v773_v20, %v771_v24 }
 0x34d   : > { %v1320_v11 = vpack.c.bf16 %v1319_v8, %v1318_v10 }
 0x34e   : > { %v758_v17 = vpop.permute.xlu1 %757 }
 0x34f   : > { %1357 = vrot.lane.b32.xlu1 %v1320_v11, %s2343_s17 }
 0x350   : > { %v736_v23 = vpop.permute.xlu0 %735 }
 0x351   : > { %v742_v3 = vsel %vm741_vm2, %v728_v13, %v736_v23 }
 0x352   : > { %v766_v21 = vpop.permute.xlu1 %765  ;;  %v746_v31 = vmul.f32 %v742_v3, %v2625_v19 }
 0x353   : > { %v770_v2 = vsel %vm741_vm2, %v758_v17, %v766_v21 }
 0x354   : > { %v774_v14 = vmul.f32 %v770_v2, %v2631_v22  ;;  %v748_v36 = vadd.f32 %v746_v31, %v744_v4 }
 0x356   : > { %v730_v26 = vpop.permute.xlu1 %729  ;;  %v776_v28 = vadd.f32 %v774_v14, %v772_v25 }
 0x358   : > { %v777_v30 = vpack.c.bf16 %v776_v28, %v775_v27 }
 0x35a   : > { %v738_v32 = vpop.permute.xlu1 %737  ;;  %v784_v33 = vsel %vm779_vm3, %v777_v30, 0 }
 0x35b   : > { %v743_v34 = vsel %vm741_vm2, %v730_v26, %v738_v32  ;;  %2016 = vmatpush3.bf16.xpose.msra.mxu1 %v784_v33 }
 0x35c   : > { %v747_v35 = vmul.f32 %v743_v34, %v2631_v22  ;;  %2027 = vmatprep.subr.bf16.mxu1 %v2331_v29 }
 0x35e   : > { %v749_v37 = vadd.f32 %v747_v35, %v745_v6 }
 0x360   : > { %v750_v38 = vpack.c.bf16 %v749_v37, %v748_v36 }
 0x362   : > { %2018 = vmatmul.mubr.msk.bf16.vlgmr.msra.gmra.mrb[0].mxu1 %vm779_vm3, %v750_v38 }
 0x363   : > { %2029 = vmatprep.mubr.msk.bf16.mxu1 %vm2332_vm1, %v2331_v29 }
 0x395   : > { %v971_v62 = vpop.permute.xlu1 %970 }
 0x3a9   : > { %v974_v19 = vpop.permute.xlu0 %973 }
 0x3aa   : > { %v979_v39 = vsel %vm779_vm3, %v974_v19, 0 }
 0x3ab   : > { %2028 = vmatpush3.bf16.xpose.msra.mxu1 %v979_v39 }
 0x3ac   : > { %2039 = vmatprep.subr.bf16.mxu1 %v2331_v29 }
 0x3b1   : > { %v1168_v0 = vpop.permute.xlu0 %1167 }
 0x3b2   : > { %v1173_v15 = vsel %vm779_vm3, %v1168_v0, 0  ;;  %2030 = vmatmul.mubr.msk.bf16.vlgmr.msra.gmra.mrb[4].mxu1 %vm779_vm3, %v971_v62 }
 0x3b3   : > { %2040 = vmatpush3.bf16.xpose.msra.mxu1 %v1173_v15  ;;  %2041 = vmatprep.mubr.msk.bf16.mxu1 %vm2332_vm1, %v2331_v29 }
 0x3b4   : > { %2051 = vmatprep.subr.bf16.mxu1 %v2331_v29 }
 0x3b5   : > { %v1165_v16 = vpop.permute.xlu1 %1164 }
 0x3b9   : > { %v1361_v22 = vpop.permute.xlu0 %1360 }
 0x3ba   : > { %v1366_v40 = vsel %vm779_vm3, %v1361_v22, 0  ;;  %2042 = vmatmul.mubr.msk.bf16.vlgmr.msra.gmra.mrb[8].mxu1 %vm779_vm3, %v1165_v16 }
 0x3bb   : > { %2052 = vmatpush3.bf16.xpose.msra.mxu1 %v1366_v40  ;;  %2053 = vmatprep.mubr.msk.bf16.mxu1 %vm2332_vm1, %v2331_v29 }
 0x3bc   : > { %2063 = vmatprep.subr.bf16.mxu1 %v2331_v29 }
 0x3c1   : > { %v1358_v41 = vpop.permute.xlu1 %1357 }
 0x3c2   : > { %2054 = vmatmul.mubr.msk.bf16.vlgmr.msra.gmra.mrb[12].mxu1 %vm779_vm3, %v1358_v41 }
 0x3c3   : > { %2067 = vmatprep.mubr.msk.bf16.mxu1 %vm2332_vm1, %v2331_v29 }
 0x435   : > { %v820_v42 = vpop.f32.mrb[0].mxu1 }
 0x436   : > { %v2019_v43 = vpop.f32.mrb[1].mxu1  ;;  %v828_v44 = vsel %vm827_vm4, %v820_v42, -inf }
 0x437   : > { %829 = vmax.xlane.f32.xlu0 %v828_v44  ;;  %v823_v45 = vpop.f32.mrb[2].mxu1 }
 0x438   : > { %v2020_v46 = vpop.f32.mrb[3].mxu1  ;;  %v831_v47 = vsel %vm827_vm4, %v823_v45, -inf }
 0x439   : > { %832 = vmax.xlane.f32.xlu1 %v831_v47 }
 0x485   : > { %v1015_v48 = vpop.f32.mrb[4].mxu1 }
 0x486   : > { %v2031_v49 = vpop.f32.mrb[5].mxu1  ;;  %v1022_v50 = vsel %vm827_vm4, %v1015_v48, -inf }
 0x487   : > { %1023 = vmax.xlane.f32.xlu0 %v1022_v50  ;;  %v1018_v51 = vpop.f32.mrb[6].mxu1 }
 0x488   : > { %v2032_v52 = vpop.f32.mrb[7].mxu1  ;;  %v1025_v53 = vsel %vm827_vm4, %v1018_v51, -inf }
 0x48b   : > { %1026 = vmax.xlane.f32.xlu0 %v1025_v53 }
 0x48d   : > { %v1209_v54 = vpop.f32.mrb[8].mxu1 }
 0x48e   : > { %v2043_v55 = vpop.f32.mrb[9].mxu1  ;;  %v1216_v56 = vsel %vm827_vm4, %v1209_v54, -inf }
 0x48f   : > { %1217 = vmax.xlane.f32.xlu0 %v1216_v56  ;;  %v1212_v57 = vpop.f32.mrb[10].mxu1 }
 0x490   : > { %v2044_v58 = vpop.f32.mrb[11].mxu1  ;;  %v1219_v59 = vsel %vm827_vm4, %v1212_v57, -inf }
 0x491   : > { %1220 = vmax.xlane.f32.xlu1 %v1219_v59 }
 0x495   : > { %v1402_v60 = vpop.f32.mrb[12].mxu1 }
 0x496   : > { %v2055_v61 = vpop.f32.mrb[13].mxu1  ;;  %v1409_v63 = vsel %vm827_vm4, %v1402_v60, -inf }
 0x497   : > { %1410 = vmax.xlane.f32.xlu0 %v1409_v63  ;;  %v1405_v1 = vpop.f32.mrb[14].mxu1 }
 0x498   : > { %v2056_v5 = vpop.f32.mrb[15].mxu1  ;;  %v1412_v7 = vsel %vm827_vm4, %v1405_v1, -inf }
 0x499   : > { %1413 = vmax.xlane.f32.xlu1 %v1412_v7 }
 0x4c4   : > { %v830_v9 = vpop.xlane.xlu0 %829 }
 0x4c5   : > { %v834_v10 = vsub.f32 %v820_v42, %v830_v9 }
 0x4c6   : > { %v833_v8 = vpop.xlane.xlu1 %832 }
 0x4c7   : > { %v836_v11 = vmul.f32 1.442695, %v834_v10  ;;  %v835_v13 = vsub.f32 %v823_v45, %v833_v8 }
 0x4c9   : > { %2209 = vpow2.f32 %v836_v11  ;;  %v838_v17 = vmul.f32 1.442695, %v835_v13 }
 0x4cb   : > { %2211 = vpow2.f32 %v838_v17 }
 0x4d3   : > { %v2210_v18 = vpop.eup %2209 }
 0x4d4   : > { %v840_v20 = vsel %vm827_vm4, %v2210_v18, 0.0 }
 0x4d5   : > { %v2212_v21 = vpop.eup %2211  ;;  %841 = vadd.xlane.f32.xlu0 %v840_v20 }
 0x4d6   : > { %v843_v2 = vsel %vm827_vm4, %v2212_v21, 0.0 }
 0x4d7   : > { %844 = vadd.xlane.f32.xlu1 %v843_v2 }
 0x514   : > { %v1024_v23 = vpop.xlane.xlu0 %1023 }
 0x515   : > { %v1028_v14 = vsub.f32 %v1015_v48, %v1024_v23 }
 0x517   : > { %v1030_v24 = vmul.f32 1.442695, %v1028_v14 }
 0x518   : > { %v1027_v25 = vpop.xlane.xlu0 %1026 }
 0x519   : > { %2213 = vpow2.f32 %v1030_v24  ;;  %v1029_v26 = vsub.f32 %v1018_v51, %v1027_v25 }
 0x51b   : > { %v1032_v27 = vmul.f32 1.442695, %v1029_v26 }
 0x51c   : > { %v1218_v28 = vpop.xlane.xlu0 %1217 }
 0x51d   : > { %2215 = vpow2.f32 %v1032_v27  ;;  %v1222_v3 = vsub.f32 %v1209_v54, %v1218_v28  ;;  %v2189_v27 = vld [vmem:[%s2921_s8] sm:$0xff]  }
 0x51e   : > { %v1221_v30 = vpop.xlane.xlu1 %1220  ;;  %2064 = vmatpush3.bf16.msra.mxu1 %v2189_v27 }
 0x51f   : > { %v1224_v31 = vmul.f32 1.442695, %v1222_v3  ;;  %v1223_v32 = vsub.f32 %v1212_v57, %v1221_v30  ;;  %2065 = vmatprep.subr.bf16.mxu1 %v2331_v29 }
 0x521   : > { %2217 = vpow2.f32 %v1224_v31  ;;  %v1226_v33 = vmul.f32 1.442695, %v1223_v32 }
 0x523   : > { %v2214_v34 = vpop.eup %2213  ;;  %2219 = vpow2.f32 %v1226_v33 }
 0x524   : > { %v1411_v4 = vpop.xlane.xlu0 %1410  ;;  %v1034_v6 = vsel %vm827_vm4, %v2214_v34, 0.0 }
 0x525   : > { %v1415_v35 = vsub.f32 %v1402_v60, %v1411_v4  ;;  %1035 = vadd.xlane.f32.xlu0 %v1034_v6  ;;  %v2190_v4 = vld [vmem:[%s2921_s8 + $0x8] sm:$0xff]  }
 0x526   : > { %v1414_v22 = vpop.xlane.xlu1 %1413  ;;  %2066 = vmatpush3.bf16.msra.mxu1 %v2190_v4  ;;  %v2198_v4 = vld [vmem:[%s2924_s11 + $0x28] sm:$0xff]  }
 0x527   : > { %v2216_v36 = vpop.eup %2215  ;;  %v1417_v37 = vmul.f32 1.442695, %v1415_v35  ;;  %v1416_v40 = vsub.f32 %v1405_v1, %v1414_v22  ;;  %2079 = vmatprep.subr.bf16.mxu1 %v2331_v29 }
 0x528   : > { %v1037_v38 = vsel %vm827_vm4, %v2216_v36, 0.0 }
 0x529   : > { %2221 = vpow2.f32 %v1417_v37  ;;  %1038 = vadd.xlane.f32.xlu1 %v1037_v38  ;;  %v1419_v41 = vmul.f32 1.442695, %v1416_v40 }
 0x52b   : > { %v2218_v19 = vpop.eup %2217  ;;  %2223 = vpow2.f32 %v1419_v41 }
 0x52c   : > { %v1228_v39 = vsel %vm827_vm4, %v2218_v19, 0.0 }
 0x52d   : > { %v2220_v62 = vpop.eup %2219  ;;  %1229 = vadd.xlane.f32.xlu0 %v1228_v39 }
 0x52e   : > { %v1231_v0 = vsel %vm827_vm4, %v2220_v62, 0.0 }
 0x52f   : > { %1232 = vadd.xlane.f32.xlu1 %v1231_v0 }
 0x533   : > { %v2222_v15 = vpop.eup %2221 }
 0x534   : > { %v1421_v16 = vsel %vm827_vm4, %v2222_v15, 0.0 }
 0x535   : > { %1422 = vadd.xlane.f32.xlu0 %v1421_v16  ;;  %v2224_v42 = vpop.eup %2223 }
 0x536   : > { %v1424_v44 = vsel %vm827_vm4, %v2224_v42, 0.0 }
 0x540   : > { %1239 = vrot.lane.b32.xlu1 %v2563_v12, %s2342_s14  ;;  %s444_s14 = sand.u32 1, %s2313_s22  }
 0x54b   : > { %1046 = vrot.lane.b32.xlu0 %v2563_v12, %s2341_s20 }
 0x562   : > { %v842_v43 = vpop.xlane.xlu0 %841 }
 0x563   : > { %2225 = vrcp.f32 %v842_v43 }
 0x564   : > { %1425 = vadd.xlane.f32.xlu1 %v1424_v44  ;;  %v845_v45 = vpop.xlane.xlu1 %844 }
 0x565   : > { %2227 = vrcp.f32 %v845_v45 }
 0x56d   : > { %v2226_v46 = vpop.eup %2225 }
 0x56e   : > { %v848_v48 = vmul.f32 %v2226_v46, %v2210_v18 }
 0x56f   : > { %v2228_v47 = vpop.eup %2227 }
 0x570   : > { %v849_v49 = vmul.f32 %v2228_v47, %v2212_v21 }
 0x572   : > { %v850_v50 = vpack.c.bf16 %v849_v49, %v848_v48 }
 0x574   : > { %2024 = vmatmul.mubr.msk.bf16.vlgmr.msra.gmra.mrb[12].mxu0 %vm827_vm4, %v850_v50  ;;  %v2249_v50 = vld [vmem:[%s2471_s27] sm:$0xff] }
 0x575   : > { %1432 = vrot.lane.b32.xlu1 %v2563_v12, %s2343_s17  ;;  %2035 = vmatprep.mubr.msk.bf16.mxu0 %vm2332_vm1, %v2331_v29  ;;  %s1905_s17 = sshll.u32 %s444_s14, 4 }
 0x5b2   : > { %v1036_v51 = vpop.xlane.xlu0 %1035 }
 0x5b6   : > { %v1039_v52 = vpop.xlane.xlu1 %1038 }
 0x5b7   : > { %2229 = vrcp.f32 %v1039_v52 }
 0x5b8   : > { %2231 = vrcp.f32 %v1036_v51 }
 0x5ba   : > { %v1230_v54 = vpop.xlane.xlu0 %1229 }
 0x5bc   : > { %v1233_v53 = vpop.xlane.xlu1 %1232 }
 0x5bd   : > { %2233 = vrcp.f32 %v1233_v53 }
 0x5be   : > { %2235 = vrcp.f32 %v1230_v54  ;;  %v2250_v54 = vld [vmem:[%s2471_s27 + $0x8] sm:$0xff]  ;;  %s446_s27 = scalar_lea.vmem [#allocation2], %s1905_s17 }
 0x5c0   : > { %v1240_v63 = vpop.permute.xlu1 %1239 }
 0x5c1   : > { %v2230_v55 = vpop.eup %2229 }
 0x5c2   : > { %v1423_v56 = vpop.xlane.xlu0 %1422  ;;  %v2232_v57 = vpop.eup %2231  ;;  %v1043_v58 = vmul.f32 %v2230_v55, %v2216_v36 }
 0x5c3   : > { %v1042_v59 = vmul.f32 %v2232_v57, %v2214_v34  ;;  %2237 = vrcp.f32 %v1423_v56 }
 0x5c5   : > { %v1044_v61 = vpack.c.bf16 %v1043_v58, %v1042_v59 }
 0x5c6   : > { %v1047_v60 = vpop.permute.xlu0 %1046 }
 0x5c7   : > { %2034 = vmatpush3.bf16.msra.mxu0 %v1047_v60  ;;  %v2234_v12 = vpop.eup %2233 }
 0x5c8   : > { %2045 = vmatprep.subr.bf16.mxu0 %v2331_v29  ;;  %v2236_v1 = vpop.eup %2235  ;;  %v1237_v5 = vmul.f32 %v2234_v12, %v2220_v62 }
 0x5c9   : > { %v1236_v7 = vmul.f32 %v2236_v1, %v2218_v19 }
 0x5ca   : > { %2036 = vmatmul.mubr.msk.bf16.vlgmr.msra.gmra.mrb[16].mxu0 %vm827_vm4, %v1044_v61 }
 0x5cb   : > { %2046 = vmatpush3.bf16.msra.mxu0 %v1240_v63  ;;  %2047 = vmatprep.mubr.msk.bf16.mxu0 %vm2332_vm1, %v2331_v29  ;;  %v1238_v9 = vpack.c.bf16 %v1237_v5, %v1236_v7 }
 0x5cc   : > { %2057 = vmatprep.subr.bf16.mxu0 %v2331_v29 }
 0x5cd   : > { %v2238_v11 = vpop.eup %2237 }
 0x5ce   : > { %v1429_v17 = vmul.f32 %v2238_v11, %v2222_v15  ;;  %v2192_v11 = vld [vmem:[%s2923_s10 + $0x8] sm:$0xff]  }
 0x5d2   : > { %2048 = vmatmul.mubr.msk.bf16.vlgmr.msra.gmra.mrb[20].mxu0 %vm827_vm4, %v1238_v9 }
 0x5d3   : > { %2059 = vmatprep.mubr.msk.bf16.mxu0 %vm2332_vm1, %v2331_v29 }
 0x5f1   : > { %v1426_v10 = vpop.xlane.xlu1 %1425 }
 0x5f2   : > { %2239 = vrcp.f32 %v1426_v10 }
 0x5f5   : > { %v1433_v8 = vpop.permute.xlu1 %1432 }
 0x5f6   : > { %2058 = vmatpush3.bf16.msra.mxu0 %v1433_v8  ;;  %v2191_v8 = vld [vmem:[%s2923_s10] sm:$0xff]  }
 0x5f7   : > { %2071 = vmatprep.subr.bf16.mxu0 %v2331_v29 }
 0x5fc   : > { %v2240_v13 = vpop.eup %2239 }
 0x5fd   : > { %v1430_v18 = vmul.f32 %v2240_v13, %v2224_v42  ;;  %v2193_v13 = vld [vmem:[%s2924_s11] sm:$0xff]  }
 0x5ff   : > { %v1431_v20 = vpack.c.bf16 %v1430_v18, %v1429_v17  ;;  %v2194_v17 = vld [vmem:[%s2924_s11 + $0x8] sm:$0xff]   ;;  %v2195_v18 = vld [vmem:[%s2924_s11 + $0x10] sm:$0xff]  }
 0x601   : > { %2060 = vmatmul.mubr.msk.bf16.vlgmr.msra.gmra.mrb[24].mxu0 %vm827_vm4, %v1431_v20 }
 0x602   : > { %2075 = vmatprep.mubr.msk.bf16.mxu0 %vm2332_vm1, %v2331_v29  ;;  %2072 = vmatpush3.bf16.msra.mxu0 %v2191_v8 }
 0x603   : > { %2073 = vmatprep.subr.bf16.mxu0 %v2331_v29 }
 0x606   : > { %2074 = vmatpush3.bf16.msra.mxu0 %v2192_v11 }
 0x647   : > { %v888_v21 = vpop.f32.mrb[12].mxu0 }
 0x648   : > { %v2025_v2 = vpop.f32.mrb[13].mxu0 }
 0x649   : > { %v891_v23 = vpop.f32.mrb[14].mxu0 }
 0x64a   : > { %v2026_v14 = vpop.f32.mrb[15].mxu0 }
 0x69d   : > { %v1086_v24 = vpop.f32.mrb[16].mxu0 }
 0x69e   : > { %v2037_v25 = vpop.f32.mrb[17].mxu0 }
 0x69f   : > { %v1089_v26 = vpop.f32.mrb[18].mxu0 }
 0x6a0   : > { %v2168_v28 = vpack.i.bf16 %v1089_v26, %v1086_v24  ;;  %v2038_v3 = vpop.f32.mrb[19].mxu0 }
 0x6a2   : > { %2169 = vrot.lane.b32.xlu1 %v2168_v28, %s2928_s30  ;;  %v1931_v28 = vld [vmem:[%s2922_s9] ss:$0 sm:$0xff]  ;;  %s1950_s30 = sshll.u32 %s2321_s24, 8  ;;  %s2866_s24 = scalar_lea.sflag [#allocation3], %s444_s14 }
 0x6a3   : > { %s2863_s20 = scalar_lea.hbm %s2925_s12, %s1950_s30 }
 0x6a5   : > { %v1279_v30 = vpop.f32.mrb[20].mxu0 }
 0x6a6   : > { %v2049_v31 = vpop.f32.mrb[21].mxu0 }
 0x6a7   : > { %v1282_v32 = vpop.f32.mrb[22].mxu0 }
 0x6a8   : > { %v2173_v33 = vpack.i.bf16 %v1282_v32, %v1279_v30  ;;  %v2050_v34 = vpop.f32.mrb[23].mxu0 }
 0x6a9   : > { %v2197_v34 = vld [vmem:[%s2924_s11 + $0x20] sm:$0xff]  }
 0x6aa   : > { %2174 = vrot.lane.b32.xlu0 %v2173_v33, %s2338_s18  ;;  %v2196_v33 = vld [vmem:[%s2924_s11 + $0x18] sm:$0xff]   ;;  %s1805_s18 = sshll.u32 %s446_s27, 4  ;;  %s2856_s18 = int_to_ptr.vmem [resolvable:$true] %s1805_s18 }
 0x6ab   : > { %s2251_s17 = scalar_lea.vmem %s2856_s18, 256  ;;  %p2258_p1 = scmp.lt.s32.totalorder %s2856_s18, %s2256_s1 }
 0x6ac   : > { %p2252_p12 = scmp.ne.s32.totalorder %s2856_s18, %s2251_s17  ;;  %p2259_p2 = scmp.lt.s32.totalorder %s2257_s2, %s2251_s17 }
 0x6ae   : > { %p2253_p13 = pnand %p2252_p12, %p2451_p4  ;;  %p2260_p3 = por %p2259_p2, %p2258_p1 }
 0x6b0   : > { %p2254_p0 = pneg %p2253_p13 }
 0x6b2   : > { %p2261_p5 = pnand %p2260_p3, %p2254_p0 }
 0x6d4   : > { %v1472_v6 = vpop.f32.mrb[24].mxu0 }
 0x6d5   : > { %v2061_v35 = vpop.f32.mrb[25].mxu0 }
 0x6d6   : > { %v1475_v36 = vpop.f32.mrb[26].mxu0  ;;  %v2200_v35 = vld [vmem:[%s2924_s11 + $0x38] sm:$0xff]  }
 0x6d7   : > { %v2178_v37 = vpack.i.bf16 %v1475_v36, %v1472_v6  ;;  %v2062_v38 = vpop.f32.mrb[27].mxu0  ;;  %v2199_v6 = vld [vmem:[%s2924_s11 + $0x30] sm:$0xff]  }
 0x6d9   : > { %2179 = vrot.lane.b32.xlu1 %v2178_v37, %s2339_s28 }
 0x714   : > { %v2170_v19 = vpop.permute.xlu1 %2169 }
 0x715   : > { %v2172_v62 = vunpack.i.h.bf16 %v2170_v19  ;;  %v2171_v0 = vunpack.i.l.bf16 %v2170_v19 }
 0x717   : > { %v1504_v40 = vsel %vm779_vm3, %v891_v23, %v2172_v62  ;;  %v1503_v41 = vsel %vm779_vm3, %v888_v21, %v2171_v0 }
 0x71c   : > { %v2175_v39 = vpop.permute.xlu0 %2174 }
 0x71d   : > { %v2177_v15 = vunpack.i.h.bf16 %v2175_v39  ;;  %v2176_v16 = vunpack.i.l.bf16 %v2175_v39 }
 0x71f   : > { %v1505_v44 = vsel %vm827_vm4, %v1503_v41, %v2176_v16  ;;  %v1506_v45 = vsel %vm827_vm4, %v1504_v40, %v2177_v15 }
 0x74b   : > { %v2180_v22 = vpop.permute.xlu1 %2179 }
 0x74c   : > { %v2182_v42 = vunpack.i.h.bf16 %v2180_v22  ;;  %v2181_v43 = vunpack.i.l.bf16 %v2180_v22 }
 0x74e   : > { %v1508_v46 = vsel %vm1507_vm5, %v1505_v44, %v2181_v43  ;;  %v1509_v47 = vsel %vm1507_vm5, %v1506_v45, %v2182_v42 }
 0x74f   : > { %v1510_v48 = vpack.c.bf16 %v1509_v47, %v1508_v46 }
 0x751   : > { %2068 = vmatmul.mubr.msk.bf16.vlgmr.msra.gmra.mrb[16].mxu1 %vm470_vm0, %v1510_v48 }
 0x752   : > { %2095 = vmatprep.mubr.msk.bf16.mxu1 %vm2332_vm1, %v2331_v29  ;;  %2080 = vmatpush3.bf16.msra.mxu1 %v2193_v13 }
 0x753   : > { %2081 = vmatprep.subr.bf16.mxu1 %v2331_v29 }
 0x756   : > { %2082 = vmatpush3.bf16.msra.mxu1 %v2194_v17 }
 0x757   : > { %2083 = vmatprep.subr.bf16.mxu1 %v2331_v29 }
 0x75a   : > { %2084 = vmatpush3.bf16.msra.mxu1 %v2195_v18 }
 0x75b   : > { %2085 = vmatprep.subr.bf16.mxu1 %v2331_v29 }
 0x75e   : > { %2086 = vmatpush3.bf16.msra.mxu1 %v2196_v33 }
 0x75f   : > { %2087 = vmatprep.subr.bf16.mxu1 %v2331_v29 }
 0x762   : > { %2088 = vmatpush3.bf16.msra.mxu1 %v2197_v34 }
 0x763   : > { %2089 = vmatprep.subr.bf16.mxu1 %v2331_v29 }
 0x766   : > { %2090 = vmatpush3.bf16.msra.mxu1 %v2198_v4 }
 0x767   : > { %2091 = vmatprep.subr.bf16.mxu1 %v2331_v29 }
 0x76a   : > { %2092 = vmatpush3.bf16.msra.mxu1 %v2199_v6 }
 0x76b   : > { %2093 = vmatprep.subr.bf16.mxu1 %v2331_v29 }
 0x76e   : > { %2094 = vmatpush3.bf16.msra.mxu1 %v2200_v35 }
 0x824   : > { %v1564_v49 = vpop.f32.mrb[16].mxu1 }
 0x825   : > { %v2798_v51 = vadd.f32 %v2249_v50, %v1564_v49  ;;  %v2069_v52 = vpop.f32.mrb[17].mxu1 }
 0x826   : > { %v1567_v53 = vpop.f32.mrb[18].mxu1 }
 0x827   : > { %v2801_v55 = vadd.f32 %v2250_v54, %v1567_v53  ;;  %v2070_v56 = vpop.f32.mrb[19].mxu1  ;;  %v1574_v57 = vsel %vm470_vm0, %v2798_v51, 0.0 }
 0x828   : > { %1575 = vadd.xlane.f32.xlu0 %v1574_v57 }
 0x829   : > { %v1577_v58 = vsel %vm470_vm0, %v2801_v55, 0.0 }
 0x82a   : > { %1578 = vadd.xlane.f32.xlu1 %v1577_v58 }
 0x8b5   : > { %v1576_v59 = vpop.xlane.xlu0 %1575 }
 0x8b6   : > { %v1580_v60 = vmul.f32 0.03125, %v1576_v59 }
 0x8b7   : > { %v1579_v61 = vpop.xlane.xlu1 %1578 }
 0x8b8   : > { %v1582_v12 = vsub.f32 %v2798_v51, %v1580_v60  ;;  %v1581_v63 = vmul.f32 0.03125, %v1579_v61 }
 0x8ba   : > { %v1583_v1 = vsub.f32 %v2801_v55, %v1581_v63  ;;  %v1584_v5 = vmul.f32 %v1582_v12, %v1582_v12 }
 0x8bc   : > { %v1586_v7 = vsel %vm470_vm0, %v1584_v5, 0.0  ;;  %v1585_v9 = vmul.f32 %v1583_v1, %v1583_v1 }
 0x8bd   : > { %1587 = vadd.xlane.f32.xlu0 %v1586_v7 }
 0x8be   : > { %v1589_v10 = vsel %vm470_vm0, %v1585_v9, 0.0 }
 0x8c1   : > { %1590 = vadd.xlane.f32.xlu0 %v1589_v10 }
 0x94a   : > { %v1588_v20 = vpop.xlane.xlu0 %1587 }
 0x94b   : > { %v1592_v21 = vmul.f32 0.03125, %v1588_v20 }
 0x94d   : > { %v1594_v2 = vadd.f32 1e-05, %v1592_v21 }
 0x94e   : > { %v1591_v23 = vpop.xlane.xlu0 %1590 }
 0x94f   : > { %2241 = vrsqrt.f32 %v1594_v2  ;;  %v1593_v14 = vmul.f32 0.03125, %v1591_v23 }
 0x951   : > { %v1595_v24 = vadd.f32 1e-05, %v1593_v14 }
 0x953   : > { %2243 = vrsqrt.f32 %v1595_v24 }
 0x959   : > { %v2242_v25 = vpop.eup %2241 }
 0x95a   : > { %v1598_v26 = vmul.f32 %v2242_v25, %v1582_v12 }
 0x95c   : > { %v1606_v31 = vmul.f32 %v1931_v28, %v1598_v26 }
 0x95d   : > { %v2244_v27 = vpop.eup %2243 }
 0x95e   : > { %v1599_v3 = vmul.f32 %v2244_v27, %v1583_v1 }
 0x960   : > { %v1607_v30 = vmul.f32 %v1931_v28, %v1599_v3 }
 0x962   : > { %v1608_v32 = vpack.c.bf16 %v1607_v30, %v1606_v31 }
 0x964   : > { %2076 = vmatmul.mubr.msk.bf16.vlgmr.msra.gmra.mrb[28].mxu0 %vm470_vm0, %v1608_v32 }
 0xa37   : > { %v1662_v36 = vpop.f32.mrb[28].mxu0 }
 0xa38   : > { %v1671_v37 = vmul.f32 0.70710677, %v1662_v36  ;;  %v2077_v38 = vpop.f32.mrb[29].mxu0  ;;  %v1669_v22 = vmul.f32 0.5, %v1662_v36 }
 0xa39   : > { %v1665_v19 = vpop.f32.mrb[30].mxu0 }
 0xa3a   : > { %2245 = verf.f32 %v1671_v37  ;;  %v1672_v39 = vmul.f32 0.70710677, %v1665_v19  ;;  %v2078_v62 = vpop.f32.mrb[31].mxu0  ;;  %v1670_v29 = vmul.f32 0.5, %v1665_v19 }
 0xa3c   : > { %2247 = verf.f32 %v1672_v39 }
 0xa44   : > { %v2246_v0 = vpop.eup %2245 }
 0xa45   : > { %v1675_v15 = vadd.f32 1.0, %v2246_v0 }
 0xa46   : > { %v2248_v16 = vpop.eup %2247 }
 0xa47   : > { %v1676_v40 = vadd.f32 1.0, %v2248_v16  ;;  %v1677_v41 = vmul.f32 %v1675_v15, %v1669_v22 }
 0xa49   : > { %v1678_v42 = vmul.f32 %v1676_v40, %v1670_v29 }
 0xa4b   : > { %v1679_v43 = vpack.c.bf16 %v1678_v42, %v1677_v41 }
 0xa4d   : > { %2096 = vmatmul.mubr.bf16.vlgmr.msra.gmra.mrb[20].mxu1 %v1679_v43 }
 0xb20   : > { %v1778_v44 = vpop.f32.mrb[20].mxu1 }
 0xb21   : > { %v1785_v45 = vadd.f32 %v1778_v44, %v2798_v51  ;;  %v2097_v46 = vpop.f32.mrb[21].mxu1 }
 0xb22   : > { %v1781_v47 = vpop.f32.mrb[22].mxu1 }
 0xb23   : > { %1787 = vst.msk [vmem:[%s446_s27] sm:$0xff] %vm470_vm0, %v1785_v45  ;;  %v1786_v48 = vadd.f32 %v1781_v47, %v2801_v55  ;;  %v2098_v49 = vpop.f32.mrb[23].mxu1 }
 0xb25   : > { %1788 = vst.msk [vmem:[%s446_s27 + $0x8] sm:$0xff] %vm470_vm0, %v1786_v48 }
 0xb26   : > { %2264 = shalt.err (!%p2261_p5)
}
 0xb27   : > { %s2265_s14 = scalar_lea.hbm %s2863_s20, 256  ;;  %s2269_s0 = scalar_lea.hbm %s2925_s12, 512 }
 0xb28   : > { %p2266_p6 = scmp.ne.s32.totalorder %s2863_s20, %s2265_s14  ;;  %p2270_p10 = scmp.lt.u32.totalorder %s2863_s20, %s2925_s12 }
 0xb29   : > { %p2271_p11 = scmp.lt.u32.totalorder %s2269_s0, %s2265_s14  ;;  %p2273_p13 = scmp.lt.u32.totalorder %s2265_s14, %s2863_s20 }
 0xb2a   : > { %p2267_p7 = pnand %p2266_p6, %p2451_p4 }
 0xb2b   : > { %p2272_p12 = por %p2271_p11, %p2270_p10 }
 0xb2c   : > { %p2268_p9 = pneg %p2267_p7 }
 0xb2d   : > { %p2274_p0 = por %p2273_p13, %p2272_p12 }
 0xb2f   : > { %p2275_p1 = pnand %p2274_p0, %p2268_p9 }
 0xb31   : > { %2278 = shalt.err (!%p2275_p1)
}
 0xb32   : > { %s2345_s2 = smov 128   ;;  %s2938_s19 = smov 8  }
 0xb33   : > { %2099 = dma.vmem_to_hbm [thread:$0]  (%p2451_p4), %s2856_s18, 256, %s2863_s20, %s2866_s24, %s2345_s2, %s2345_s2, %s2938_s19  }
 0xb34 PF: > { %p2105_p2 = scmp.ge.s32.totalorder %s2329_s26, 2  ;;  %s1820_s17 = sand.u32 1, %s2309_s21  }
 0xb35   : > { %s1821_s14 = scalar_lea.sflag [#allocation3], %s1820_s17 }
 0xb36   : > { %p2102_p3 = pnand %p2105_p2, %p2458_p8 }
 0xb38   : > { %2304 = dma.done.wait (!%p2102_p3), %s1821_s14, 256  }
 0xb39   : > { %2306 = vsyncadd (!%p2102_p3), %s1821_s14, 4294967040  ;;  %s25_s26 = sadd.s32 1, %s2329_s26   ;;  %s2939_s21 = smov %s2313_s22 }
 0xb3a   : > { %p22_p5 = scmp.ge.s32.totalorder %s25_s26, 4   ;;  %s2940_s22 = smov %s2317_s23 }
 0xb3b   : > { %s2941_s23 = smov %s2464_s16  ;;  %s2942_s24 = smov %s2325_s25 }
 0xb3c   : > { %s2943_s25 = smov %s2945_s29  ;;  %24 = sbr.rel (!%p22_p5) target bundleno = 8 (0x8), region = 108 }
 0xb43   :  { %1826 = vsyncpa [#allocation3], 1 }
 0xb44   :  { %1828 = vsyncpa [#allocation3 + $0x1], 1 }

// kernel: tpu_custom_call.1
= control target key start
LH: loop header
LB: loop body
LE: loop exit
PB: predicated region body
PF: predicated region fallthrough
CT: control target
= control target key end

     0   :  { %s2913_s0 = inlined_call_operand.vmem [shape: f32[2,16,32], index: 0, kind: input, shape index: {}]   ;;  %s2914_s1 = inlined_call_operand.vmem [shape: f32[2,16,32], index: 1, kind: input, shape index: {}]   ;;  %s2915_s2 = inlined_call_operand.vmem [shape: f32[1,32], index: 2, kind: input, shape index: {}]   ;;  %s2916_s3 = inlined_call_operand.vmem [shape: bf16[32,32], index: 3, kind: input, shape index: {}]   ;;  %s2917_s4 = inlined_call_operand.vmem [shape: bf16[32,32], index: 4, kind: input, shape index: {}]   ;;  %s2918_s5 = inlined_call_operand.vmem [shape: bf16[32,32], index: 5, kind: input, shape index: {}]   ;;  %s2919_s6 = inlined_call_operand.vmem [shape: f32[16,8], index: 6, kind: input, shape index: {}]   ;;  %s2920_s7 = inlined_call_operand.vmem [shape: f32[16,8], index: 7, kind: input, shape index: {}]   ;;  %s2921_s8 = inlined_call_operand.vmem [shape: bf16[32,32], index: 8, kind: input, shape index: {}]   ;;  %s2922_s9 = inlined_call_operand.vmem [shape: f32[1,32], index: 9, kind: input, shape index: {}]   ;;  %s2923_s10 = inlined_call_operand.vmem [shape: bf16[32,128], index: 10, kind: input, shape index: {}]   ;;  %s2924_s11 = inlined_call_operand.vmem [shape: bf16[128,32], index: 11, kind: input, shape index: {}]   ;;  %s2925_s12 = inlined_call_operand.hbm [shape: f32[2,16,32], index: 12, kind: output, shape index: {}]  }
   0x1   :  { %2929 = sst [smem:[#allocation5_spill]] %s2913_s0 }
   0x2   :  { %2930 = sst [smem:[#allocation6_spill]] %s2914_s1 }
   0x3   :  { %2931 = sst [smem:[#allocation7_spill]] %s2915_s2 }
   0x4   :  { %17 = vsyncpa [#allocation3], 0 }
   0x5   :  { %19 = vsyncpa [#allocation3 + $0x1], 0  ;;  %s2411_s21 = smov 0   ;;  %s2413_s22 = smov 0  }
   0x6   :  { %s2415_s23 = smov 0   ;;  %s2417_s24 = smov 0  }
   0x7   :  { %s2419_s25 = smov 0   ;;  %s2421_s26 = smov 0  }
   0x8 LB: > { %s1900_s27 = sadd.s32 4294967295, %s2329_s26   ;;  %s1901_s28 = sadd.s32 4294967294, %s2329_s26   ;;  %s2329_s26 = sphi %s2421_s26, %s25_s26   ;;  %s2325_s25 = sphi %s2419_s25, %s2943_s25   ;;  %s2321_s24 = sphi %s2417_s24, %s2942_s24   ;;  %s2317_s23 = sphi %s2415_s23, %s2941_s23   ;;  %s2313_s22 = sphi %s2413_s22, %s2940_s22   ;;  %s2309_s21 = sphi %s2411_s21, %s2939_s21  }
   0x9   : > { %s37_s29 = sadd.s32 1, %s2325_s25  ;;  %s310_s30 = sadd.s32 1, %s2317_s23 }
   0xa   : > { %p39_p0 = scmp.ge.s32.totalorder %s37_s29, 2  ;;  %p320_p1 = scmp.ne.s32.totalorder %s2317_s23, %s2313_s22 }
   0xb   : > { %p321_p2 = scmp.eq.s32.totalorder %s1900_s27, 1  ;;  %p326_p3 = scmp.ne.s32.totalorder %s2313_s22, %s2309_s21 }
   0xc   : > { %s2945_s29 = smov (%p39_p0, %s37_s29), 0  ;;  %p327_p5 = scmp.eq.s32.totalorder %s1901_s28, 1 }
   0xd   : > { %p2451_p4 = por %p321_p2, %p320_p1  ;;  %s305_s14 = ssub.s32 %s2325_s25, %s2945_s29 }
   0xe   : > { %p1904_p6 = scmp.ge.s32.totalorder %s2329_s26, 1  ;;  %p308_p7 = scmp.eq.s32.totalorder %s305_s14, 0 }
   0xf   : > { %p2458_p8 = por %p327_p5, %p326_p3  ;;  %p396_p9 = scmp.lt.s32.totalorder %s2329_s26, 3 }
  0x10   : > { %s2464_s16 = scalar_select %p308_p7, %s2317_s23, %s310_s30  }
  0x11   : > { %p397_p10 = pnand %p1904_p6, %p396_p9 }
  0x12   : > { %p447_p11 = scmp.lt.s32.totalorder (!%p397_p10), %s2321_s24, 1  ;;  %vm470_vm0 = vcmask (!%p397_p10), 261120   ;;  %s2934_s1 = sld [smem:[#allocation6_spill]] (!%p397_p10)  ;;  %v2183_v28 = vld [vmem:[%s2916_s3] sm:$0xff] (!%p397_p10)   ;;  %v2331_v29 = vmov (!%p397_p10), 0.0   ;;  %v2184_v30 = vld [vmem:[%s2916_s3 + $0x8] sm:$0xff] (!%p397_p10)  }
  0x13   : > { %400 = sbr.rel (%p397_p10) target bundleno = 2868 (0xb34), region = 68  ;;  %s2935_s0 = sld [smem:[#allocation5_spill]] (!%p397_p10)  ;;  %1991 = vmatprep.subr.bf16.mxu0 (!%p397_p10), %v2331_v29  ;;  %2015 = vmatprep.subr.bf16.mxu1 (!%p397_p10), %v2331_v29  ;;  %vm2332_vm1 = vmmov (!%p397_p10), 0   ;;  %v2185_v52 = vld [vmem:[%s2917_s4] sm:$0xff] (!%p397_p10)   ;;  %v2186_v56 = vld [vmem:[%s2917_s4 + $0x8] sm:$0xff] (!%p397_p10)   ;;  %vm741_vm2 = vcmask (!%p397_p10), 31744  }
  0x14   : > { %1992 = vmatpush3.bf16.msra.mxu0 (!%p397_p10), %v2183_v28  ;;  %1995 = vmatprep.mubr.msk.bf16.mxu0 (!%p397_p10), %vm2332_vm1, %v2331_v29  ;;  %s2936_s2 = sld [smem:[#allocation7_spill]] (!%p397_p10)  ;;  %v2187_v59 = vld [vmem:[%s2918_s5] sm:$0xff] (!%p397_p10)   ;;  %v2188_v61 = vld [vmem:[%s2918_s5 + $0x8] sm:$0xff] (!%p397_p10)   ;;  %s2335_s19 = smov (!%p397_p10), 108   ;;  %vm779_vm3 = vcmask (!%p397_p10), 64512   ;;  %vm827_vm4 = vcmask (!%p397_p10), 130048  }
  0x15   : > { %1993 = vmatprep.subr.bf16.mxu0 (!%p397_p10), %v2331_v29  ;;  %2017 = vmatprep.mubr.msk.bf16.mxu1 (!%p397_p10), %vm2332_vm1, %v2331_v29  ;;  %s2336_s20 = smov (!%p397_p10), 100   ;;  %s2339_s28 = smov (!%p397_p10), 24   ;;  %vm1507_vm5 = vcmask (!%p397_p10), 195584  }
  0x16   : > { %s2342_s14 = smov (!%p397_p10), 112  }
  0x18   : > { %1994 = vmatpush3.bf16.msra.mxu0 (!%p397_p10), %v2184_v30 }
  0x19   : > { %1999 = vmatprep.subr.bf16.mxu0 (!%p397_p10), %v2331_v29 }
  0x1a   : > { %s448_s17 = scalar_select %p447_p11, %s2321_s24, 1  ;;  %v1910_v46 = vld [vmem:[%s2936_s2] ss:$0 sm:$0xff] }
  0x1c   : > { %s1948_s18 = sshll.u32 %s448_s17, 4  ;;  %s2926_s17 = smov 124  }
  0x1d   : > { %s2471_s27 = scalar_lea.vmem %s2934_s1, %s1948_s18  ;;  %s451_s30 = scalar_lea.vmem %s2935_s0, %s1948_s18 }
  0x1e   : > { %v468_v0 = vld [vmem:[%s2471_s27] sm:$0xff]  ;;  %v469_v1 = vld [vmem:[%s2471_s27 + $0x8] sm:$0xff]  ;;  %s2334_s18 = smov 116   ;;  %s2344_s0 = smov [#allocation2]  }
  0x1f   : > { %v466_v2 = vld [vmem:[%s451_s30] sm:$0xff]  ;;  %v507_v3 = vsel %vm470_vm0, %v468_v0, 0.0  ;;  %v467_v5 = vld [vmem:[%s451_s30 + $0x8] sm:$0xff]  ;;  %v510_v6 = vsel %vm470_vm0, %v469_v1, 0.0  ;;  %s2928_s30 = smov 8   ;;  %s2255_s1 = sshll.u32 %s2344_s0, 4  ;;  %s2256_s1 = int_to_ptr.vmem [resolvable:$false] %s2255_s1 }
  0x20   : > { %v471_v4 = vsel %vm470_vm0, %v466_v2, 0.0  ;;  %508 = vadd.xlane.f32.xlu0 %v507_v3  ;;  %v474_v7 = vsel %vm470_vm0, %v467_v5, 0.0  ;;  %s2257_s2 = scalar_lea.vmem %s2256_s1, 512 }
  0x21   : > { %472 = vadd.xlane.f32.xlu1 %v471_v4 }
  0x24   : > { %511 = vadd.xlane.f32.xlu0 %v510_v6 }
  0x25   : > { %475 = vadd.xlane.f32.xlu1 %v474_v7 }
  0xad   : > { %v509_v8 = vpop.xlane.xlu0 %508 }
  0xae   : > { %v473_v9 = vpop.xlane.xlu1 %472  ;;  %v513_v10 = vmul.f32 0.03125, %v509_v8 }
  0xaf   : > { %v478_v11 = vmul.f32 0.03125, %v473_v9 }
  0xb0   : > { %v515_v12 = vsub.f32 %v468_v0, %v513_v10 }
  0xb1   : > { %v480_v13 = vsub.f32 %v466_v2, %v478_v11  ;;  %v512_v14 = vpop.xlane.xlu0 %511 }
  0xb2   : > { %v476_v15 = vpop.xlane.xlu1 %475  ;;  %v514_v16 = vmul.f32 0.03125, %v512_v14  ;;  %v517_v17 = vmul.f32 %v515_v12, %v515_v12 }
  0xb3   : > { %v479_v18 = vmul.f32 0.03125, %v476_v15  ;;  %v482_v19 = vmul.f32 %v480_v13, %v480_v13  ;;  %v2596_v15 = vld [vmem:[%s2920_s7] sm:$0xff] }
  0xb4   : > { %v516_v20 = vsub.f32 %v469_v1, %v514_v16  ;;  %v519_v21 = vsel %vm470_vm0, %v517_v17, 0.0  ;;  %v2610_v16 = vld [vmem:[%s2920_s7 + $0x8] sm:$0xff] }
  0xb5   : > { %v481_v22 = vsub.f32 %v467_v5, %v479_v18  ;;  %520 = vadd.xlane.f32.xlu0 %v519_v21  ;;  %v484_v24 = vsel %vm470_vm0, %v482_v19, 0.0  ;;  %v2625_v19 = vld [vmem:[%s2919_s6] sm:$0xff] }
  0xb6   : > { %v518_v23 = vmul.f32 %v516_v20, %v516_v20 }
  0xb7   : > { %v483_v25 = vmul.f32 %v481_v22, %v481_v22 }
  0xb8   : > { %v522_v26 = vsel %vm470_vm0, %v518_v23, 0.0 }
  0xb9   : > { %523 = vadd.xlane.f32.xlu1 %v522_v26  ;;  %485 = vadd.xlane.f32.xlu0 %v484_v24  ;;  %v487_v27 = vsel %vm470_vm0, %v483_v25, 0.0 }
  0xbd   : > { %488 = vadd.xlane.f32.xlu1 %v487_v27 }
 0x142   : > { %v521_v31 = vpop.xlane.xlu0 %520 }
 0x143   : > { %v525_v32 = vmul.f32 0.03125, %v521_v31 }
 0x145   : > { %v527_v33 = vadd.f32 1e-05, %v525_v32 }
 0x146   : > { %v486_v34 = vpop.xlane.xlu0 %485  ;;  %v524_v35 = vpop.xlane.xlu1 %523 }
 0x147   : > { %v526_v36 = vmul.f32 0.03125, %v524_v35  ;;  %2201 = vrsqrt.f32 %v527_v33  ;;  %v490_v37 = vmul.f32 0.03125, %v486_v34 }
 0x149   : > { %v528_v38 = vadd.f32 1e-05, %v526_v36  ;;  %v492_v41 = vadd.f32 1e-05, %v490_v37 }
 0x14a   : > { %v489_v39 = vpop.xlane.xlu1 %488 }
 0x14b   : > { %v491_v40 = vmul.f32 0.03125, %v489_v39  ;;  %2203 = vrsqrt.f32 %v528_v38 }
 0x14d   : > { %v493_v42 = vadd.f32 1e-05, %v491_v40 }
 0x14f   : > { %2205 = vrsqrt.f32 %v493_v42 }
 0x150   : > { %2207 = vrsqrt.f32 %v492_v41 }
 0x151   : > { %v2202_v43 = vpop.eup %2201 }
 0x152   : > { %v531_v44 = vmul.f32 %v2202_v43, %v515_v12 }
 0x154   : > { %v533_v49 = vmul.f32 %v1910_v46, %v531_v44 }
 0x155   : > { %v2204_v45 = vpop.eup %2203 }
 0x156   : > { %v532_v47 = vmul.f32 %v2204_v45, %v516_v20 }
 0x158   : > { %v534_v50 = vmul.f32 %v1910_v46, %v532_v47 }
 0x159   : > { %v2206_v48 = vpop.eup %2205 }
 0x15a   : > { %v2208_v51 = vpop.eup %2207  ;;  %v497_v53 = vmul.f32 %v2206_v48, %v481_v22  ;;  %v535_v54 = vpack.c.bf16 %v534_v50, %v533_v49  ;;  %v2631_v22 = vld [vmem:[%s2919_s6 + $0x8] sm:$0xff] }
 0x15b   : > { %v496_v55 = vmul.f32 %v2208_v51, %v480_v13 }
 0x15c   : > { %1996 = vmatmul.mubr.msk.bf16.vlgmr.msra.gmra.mrb[0].mxu0 %vm470_vm0, %v535_v54  ;;  %v505_v57 = vmul.f32 %v1910_v46, %v497_v53 }
 0x15d   : > { %2000 = vmatpush3.bf16.msra.mxu0 %v2185_v52  ;;  %2003 = vmatprep.mubr.msk.bf16.mxu0 %vm2332_vm1, %v2331_v29  ;;  %v504_v58 = vmul.f32 %v1910_v46, %v496_v55 }
 0x15e   : > { %2001 = vmatprep.subr.bf16.mxu0 %v2331_v29 }
 0x15f   : > { %v506_v60 = vpack.c.bf16 %v505_v57, %v504_v58 }
 0x161   : > { %2002 = vmatpush3.bf16.msra.mxu0 %v2186_v56 }
 0x162   : > { %2007 = vmatprep.subr.bf16.mxu0 %v2331_v29 }
 0x164   : > { %2004 = vmatmul.mubr.msk.bf16.vlgmr.msra.gmra.mrb[4].mxu0 %vm470_vm0, %v506_v60 }
 0x165   : > { %2008 = vmatpush3.bf16.msra.mxu0 %v2187_v59  ;;  %2011 = vmatprep.mubr.msk.bf16.mxu0 %vm2332_vm1, %v2331_v29 }
 0x166   : > { %2009 = vmatprep.subr.bf16.mxu0 %v2331_v29 }
 0x169   : > { %2010 = vmatpush3.bf16.msra.mxu0 %v2188_v61 }
 0x16a   : > { %2021 = vmatprep.subr.bf16.mxu0 %v2331_v29 }
 0x16c   : > { %2012 = vmatmul.mubr.msk.bf16.vlgmr.msra.gmra.mrb[8].mxu0 %vm470_vm0, %v506_v60 }
 0x16d   : > { %2023 = vmatprep.mubr.msk.bf16.mxu0 %vm2332_vm1, %v2331_v29 }
 0x22f   : > { %v2528_v62 = vpop.f32.mrb[0].mxu0 }
 0x230   : > { %901 = vrot.lane.b32.xlu0 %v2528_v62, %s2926_s17  ;;  %v1997_v63 = vpop.f32.mrb[1].mxu0  ;;  %v2537_v2 = vsub.f32 0.0, %v2528_v62 }
 0x231   : > { %v2532_v0 = vpop.f32.mrb[2].mxu0 }
 0x232   : > { %903 = vrot.lane.b32.xlu1 %v2532_v0, %s2926_s17  ;;  %v1998_v1 = vpop.f32.mrb[3].mxu0  ;;  %v2542_v3 = vsub.f32 0.0, %v2532_v0 }
 0x234   : > { %895 = vrot.lane.b32.xlu0 %v2537_v2, %s2334_s18 }
 0x236   : > { %897 = vrot.lane.b32.xlu1 %v2542_v3, %s2334_s18 }
 0x237   : > { %v2546_v4 = vpop.f32.mrb[4].mxu0 }
 0x238   : > { %1093 = vrot.lane.b32.xlu0 %v2537_v2, %s2335_s19  ;;  %v2005_v5 = vpop.f32.mrb[5].mxu0  ;;  %v2559_v8 = vsub.f32 0.0, %v2546_v4 }
 0x239   : > { %v2550_v6 = vpop.f32.mrb[6].mxu0 }
 0x23a   : > { %1095 = vrot.lane.b32.xlu1 %v2542_v3, %s2335_s19  ;;  %v2006_v7 = vpop.f32.mrb[7].mxu0  ;;  %v2576_v14 = vsub.f32 0.0, %v2550_v6 }
 0x23c   : > { %1134 = vrot.lane.b32.xlu0 %v2546_v4, %s2334_s18 }
 0x23e   : > { %938 = vrot.lane.b32.xlu1 %v2546_v4, %s2926_s17 }
 0x23f   : > { %v706_v9 = vpop.f32.mrb[8].mxu0 }
 0x240   : > { %932 = vrot.lane.b32.xlu0 %v2559_v8, %s2334_s18  ;;  %v2013_v10 = vpop.f32.mrb[9].mxu0 }
 0x241   : > { %v709_v11 = vpop.f32.mrb[10].mxu0 }
 0x242   : > { %v2563_v12 = vpack.c.bf16 %v709_v11, %v706_v9  ;;  %940 = vrot.lane.b32.xlu1 %v2550_v6, %s2926_s17  ;;  %v2014_v13 = vpop.f32.mrb[11].mxu0  ;;  %s2937_s17 = smov 124  }
 0x244   : > { %1099 = vrot.lane.b32.xlu0 %v2528_v62, %s2334_s18  ;;  %2022 = vmatpush3.bf16.msra.mxu0 %v2563_v12 }
 0x245   : > { %2033 = vmatprep.subr.bf16.mxu0 %v2331_v29 }
 0x246   : > { %1136 = vrot.lane.b32.xlu1 %v2550_v6, %s2334_s18 }
 0x248   : > { %1128 = vrot.lane.b32.xlu0 %v2559_v8, %s2335_s19 }
 0x24a   : > { %934 = vrot.lane.b32.xlu1 %v2576_v14, %s2334_s18 }
 0x24c   : > { %1321 = vrot.lane.b32.xlu0 %v2559_v8, %s2336_s20 }
 0x24e   : > { %1101 = vrot.lane.b32.xlu1 %v2532_v0, %s2334_s18  ;;  %s2338_s18 = smov 16  }
 0x250   : > { %1327 = vrot.lane.b32.xlu0 %v2546_v4, %s2335_s19 }
 0x252   : > { %1130 = vrot.lane.b32.xlu1 %v2576_v14, %s2335_s19 }
 0x254   : > { %1286 = vrot.lane.b32.xlu0 %v2537_v2, %s2336_s20 }
 0x256   : > { %1329 = vrot.lane.b32.xlu1 %v2550_v6, %s2335_s19 }
 0x258   : > { %1292 = vrot.lane.b32.xlu0 %v2528_v62, %s2335_s19 }
 0x25a   : > { %1323 = vrot.lane.b32.xlu1 %v2576_v14, %s2336_s20 }
 0x25c   : > { %948 = vrot.lane.b32.xlu0 %v2596_v15, %s2928_s30 }
 0x25e   : > { %1288 = vrot.lane.b32.xlu1 %v2542_v3, %s2336_s20  ;;  %s2341_s20 = smov 120  }
 0x260   : > { %911 = vrot.lane.b32.xlu0 %v2596_v15, %s2928_s30 }
 0x262   : > { %1294 = vrot.lane.b32.xlu1 %v2532_v0, %s2335_s19  ;;  %s2340_s19 = smov 4  }
 0x264   : > { %1142 = vrot.lane.b32.xlu0 %v2596_v15, %s2338_s18 }
 0x266   : > { %950 = vrot.lane.b32.xlu1 %v2610_v16, %s2928_s30 }
 0x268   : > { %1107 = vrot.lane.b32.xlu0 %v2596_v15, %s2338_s18 }
 0x26a   : > { %913 = vrot.lane.b32.xlu1 %v2610_v16, %s2928_s30 }
 0x26e   : > { %1144 = vrot.lane.b32.xlu1 %v2610_v16, %s2338_s18 }
 0x272   : > { %1109 = vrot.lane.b32.xlu1 %v2610_v16, %s2338_s18 }
 0x2a2   : > { %v902_v17 = vpop.permute.xlu0 %901 }
 0x2a4   : > { %v904_v18 = vpop.permute.xlu1 %903 }
 0x2a6   : > { %v896_v20 = vpop.permute.xlu0 %895 }
 0x2a7   : > { %v907_v21 = vsel %vm741_vm2, %v896_v20, %v902_v17 }
 0x2a8   : > { %v919_v23 = vmul.f32 %v907_v21, %v2625_v19  ;;  %v898_v24 = vpop.permute.xlu1 %897 }
 0x2a9   : > { %v908_v25 = vsel %vm741_vm2, %v898_v24, %v904_v18 }
 0x2aa   : > { %v920_v26 = vmul.f32 %v908_v25, %v2631_v22  ;;  %v1094_v27 = vpop.permute.xlu0 %1093  ;;  %923 = vrot.lane.b32.xlu0 %v919_v23, %s2928_s30 }
 0x2ac   : > { %925 = vrot.lane.b32.xlu1 %v920_v26, %s2928_s30  ;;  %v1096_v28 = vpop.permute.xlu1 %1095 }
 0x2ae   : > { %v1135_v30 = vpop.permute.xlu0 %1134 }
 0x2b0   : > { %v939_v31 = vpop.permute.xlu1 %938 }
 0x2b2   : > { %v933_v32 = vpop.permute.xlu0 %932 }
 0x2b3   : > { %v944_v33 = vsel %vm741_vm2, %v933_v32, %v939_v31 }
 0x2b4   : > { %v956_v34 = vmul.f32 %v944_v33, %v2625_v19  ;;  %v941_v35 = vpop.permute.xlu1 %940 }
 0x2b6   : > { %v1100_v36 = vpop.permute.xlu0 %1099  ;;  %960 = vrot.lane.b32.xlu0 %v956_v34, %s2928_s30 }
 0x2b7   : > { %v1105_v42 = vsel %vm741_vm2, %v1094_v27, %v1100_v36 }
 0x2b8   : > { %v1137_v37 = vpop.permute.xlu1 %1136  ;;  %v1115_v46 = vmul.f32 %v1105_v42, %v2625_v19 }
 0x2ba   : > { %v1129_v38 = vpop.permute.xlu0 %1128  ;;  %1335 = vrot.lane.b32.xlu0 %v2596_v15, %s2339_s28 }
 0x2bb   : > { %v1140_v39 = vsel %vm741_vm2, %v1129_v38, %v1135_v30 }
 0x2bc   : > { %v1150_v40 = vmul.f32 %v1140_v39, %v2625_v19  ;;  %v935_v41 = vpop.permute.xlu1 %934 }
 0x2bd   : > { %v945_v43 = vsel %vm741_vm2, %v935_v41, %v941_v35 }
 0x2be   : > { %v957_v44 = vmul.f32 %v945_v43, %v2631_v22  ;;  %v1322_v45 = vpop.permute.xlu0 %1321  ;;  %1154 = vrot.lane.b32.xlu0 %v1150_v40, %s2338_s18 }
 0x2c0   : > { %962 = vrot.lane.b32.xlu1 %v957_v44, %s2928_s30  ;;  %v1102_v47 = vpop.permute.xlu1 %1101 }
 0x2c1   : > { %v1106_v55 = vsel %vm741_vm2, %v1096_v28, %v1102_v47 }
 0x2c2   : > { %v1328_v48 = vpop.permute.xlu0 %1327  ;;  %1119 = vrot.lane.b32.xlu0 %v1115_v46, %s2338_s18  ;;  %v1116_v57 = vmul.f32 %v1106_v55, %v2631_v22 }
 0x2c3   : > { %v1333_v49 = vsel %vm741_vm2, %v1322_v45, %v1328_v48 }
 0x2c4   : > { %v1343_v50 = vmul.f32 %v1333_v49, %v2625_v19  ;;  %1337 = vrot.lane.b32.xlu1 %v2610_v16, %s2339_s28  ;;  %v1131_v51 = vpop.permute.xlu1 %1130 }
 0x2c5   : > { %v1141_v52 = vsel %vm741_vm2, %v1131_v51, %v1137_v37 }
 0x2c6   : > { %v1151_v53 = vmul.f32 %v1141_v52, %v2631_v22  ;;  %v1287_v54 = vpop.permute.xlu0 %1286  ;;  %1347 = vrot.lane.b32.xlu0 %v1343_v50, %s2339_s28 }
 0x2c8   : > { %1156 = vrot.lane.b32.xlu1 %v1151_v53, %s2338_s18  ;;  %v1330_v56 = vpop.permute.xlu1 %1329 }
 0x2ca   : > { %v1293_v58 = vpop.permute.xlu0 %1292  ;;  %1300 = vrot.lane.b32.xlu0 %v2596_v15, %s2339_s28 }
 0x2cb   : > { %v1298_v59 = vsel %vm741_vm2, %v1287_v54, %v1293_v58 }
 0x2cc   : > { %v1308_v60 = vmul.f32 %v1298_v59, %v2625_v19  ;;  %1121 = vrot.lane.b32.xlu1 %v1116_v57, %s2338_s18  ;;  %v1324_v61 = vpop.permute.xlu1 %1323 }
 0x2cd   : > { %v1334_v63 = vsel %vm741_vm2, %v1324_v61, %v1330_v56 }
 0x2ce   : > { %v1344_v1 = vmul.f32 %v1334_v63, %v2631_v22  ;;  %1312 = vrot.lane.b32.xlu0 %v1308_v60, %s2339_s28 }
 0x2d0   : > { %1349 = vrot.lane.b32.xlu1 %v1344_v1, %s2339_s28  ;;  %v1289_v5 = vpop.permute.xlu1 %1288 }
 0x2d2   : > { %755 = vrot.lane.b32.xlu0 %v2559_v8, %s2937_s17  ;;  %v949_v8 = vpop.permute.xlu0 %948 }
 0x2d3   : > { %v954_v32 = vmul.f32 %v949_v8, %v2546_v4 }
 0x2d4   : > { %1302 = vrot.lane.b32.xlu1 %v2610_v16, %s2339_s28  ;;  %v1295_v7 = vpop.permute.xlu1 %1294 }
 0x2d5   : > { %v1299_v9 = vsel %vm741_vm2, %v1289_v5, %v1295_v7 }
 0x2d6   : > { %v1309_v10 = vmul.f32 %v1299_v9, %v2631_v22  ;;  %763 = vrot.lane.b32.xlu0 %v2546_v4, %s2340_s19  ;;  %v912_v13 = vpop.permute.xlu0 %911 }
 0x2d8   : > { %1314 = vrot.lane.b32.xlu1 %v1309_v10, %s2339_s28  ;;  %v951_v11 = vpop.permute.xlu1 %950 }
 0x2d9   : > { %v955_v33 = vmul.f32 %v951_v11, %v2550_v6 }
 0x2da   : > { %727 = vrot.lane.b32.xlu0 %v2537_v2, %s2937_s17  ;;  %v1143_v18 = vpop.permute.xlu0 %1142 }
 0x2db   : > { %v1148_v41 = vmul.f32 %v1143_v18, %v2546_v4 }
 0x2dc   : > { %757 = vrot.lane.b32.xlu1 %v2576_v14, %s2937_s17  ;;  %v914_v17 = vpop.permute.xlu1 %913  ;;  %v917_v14 = vmul.f32 %v912_v13, %v2528_v62 }
 0x2dd   : > { %v918_v24 = vmul.f32 %v914_v17, %v2532_v0 }
 0x2de   : > { %735 = vrot.lane.b32.xlu0 %v2528_v62, %s2340_s19  ;;  %v1108_v21 = vpop.permute.xlu0 %1107 }
 0x2df   : > { %v1113_v47 = vmul.f32 %v1108_v21, %v2528_v62 }
 0x2e0   : > { %765 = vrot.lane.b32.xlu1 %v2550_v6, %s2340_s19  ;;  %v1145_v20 = vpop.permute.xlu1 %1144 }
 0x2e1   : > { %v1149_v42 = vmul.f32 %v1145_v20, %v2550_v6 }
 0x2e4   : > { %729 = vrot.lane.b32.xlu1 %v2542_v3, %s2937_s17  ;;  %v1110_v2 = vpop.permute.xlu1 %1109  ;;  %s2343_s17 = smov 104  }
 0x2e5   : > { %v1114_v48 = vmul.f32 %v1110_v2, %v2532_v0 }
 0x2e8   : > { %737 = vrot.lane.b32.xlu1 %v2532_v0, %s2340_s19 }
 0x31c   : > { %v924_v23 = vpop.permute.xlu0 %923 }
 0x31d   : > { %v929_v26 = vadd.f32 %v924_v23, %v917_v14 }
 0x31e   : > { %v926_v25 = vpop.permute.xlu1 %925 }
 0x31f   : > { %v930_v27 = vadd.f32 %v926_v25, %v918_v24  ;;  %v771_v24 = vmul.f32 %v2596_v15, %v2546_v4  ;;  %v772_v25 = vmul.f32 %v2610_v16, %v2550_v6 }
 0x321   : > { %v931_v28 = vpack.c.bf16 %v930_v27, %v929_v26 }
 0x323   : > { %970 = vrot.lane.b32.xlu1 %v931_v28, %s2341_s20 }
 0x328   : > { %v961_v3 = vpop.permute.xlu0 %960 }
 0x329   : > { %v966_v35 = vadd.f32 %v961_v3, %v954_v32 }
 0x32c   : > { %v1336_v30 = vpop.permute.xlu0 %1335 }
 0x32d   : > { %v1341_v54 = vmul.f32 %v1336_v30, %v2546_v4  ;;  %v744_v4 = vmul.f32 %v2596_v15, %v2528_v62 }
 0x330   : > { %v1155_v31 = vpop.permute.xlu0 %1154 }
 0x331   : > { %v1160_v44 = vadd.f32 %v1155_v31, %v1148_v41 }
 0x332   : > { %v963_v34 = vpop.permute.xlu1 %962 }
 0x333   : > { %v967_v36 = vadd.f32 %v963_v34, %v955_v33 }
 0x334   : > { %v1120_v37 = vpop.permute.xlu0 %1119 }
 0x335   : > { %v968_v38 = vpack.c.bf16 %v967_v36, %v966_v35  ;;  %v1125_v51 = vadd.f32 %v1120_v37, %v1113_v47 }
 0x336   : > { %v1338_v39 = vpop.permute.xlu1 %1337 }
 0x337   : > { %973 = vrot.lane.b32.xlu0 %v968_v38, %s2341_s20  ;;  %v1342_v55 = vmul.f32 %v1338_v39, %v2550_v6  ;;  %v745_v6 = vmul.f32 %v2610_v16, %v2532_v0 }
 0x338   : > { %v1348_v40 = vpop.permute.xlu0 %1347 }
 0x339   : > { %v1353_v58 = vadd.f32 %v1348_v40, %v1341_v54 }
 0x33a   : > { %v1157_v43 = vpop.permute.xlu1 %1156 }
 0x33b   : > { %v1161_v45 = vadd.f32 %v1157_v43, %v1149_v42 }
 0x33c   : > { %v1301_v46 = vpop.permute.xlu0 %1300 }
 0x33d   : > { %v1162_v49 = vpack.c.bf16 %v1161_v45, %v1160_v44  ;;  %v1306_v5 = vmul.f32 %v1301_v46, %v2528_v62 }
 0x33e   : > { %v1122_v50 = vpop.permute.xlu1 %1121 }
 0x33f   : > { %v1126_v52 = vadd.f32 %v1122_v50, %v1114_v48  ;;  %1167 = vrot.lane.b32.xlu0 %v1162_v49, %s2342_s14 }
 0x340   : > { %v1313_v53 = vpop.permute.xlu0 %1312 }
 0x341   : > { %v1127_v56 = vpack.c.bf16 %v1126_v52, %v1125_v51  ;;  %v1318_v10 = vadd.f32 %v1313_v53, %v1306_v5 }
 0x342   : > { %v1350_v57 = vpop.permute.xlu1 %1349 }
 0x343   : > { %v1354_v59 = vadd.f32 %v1350_v57, %v1342_v55  ;;  %1164 = vrot.lane.b32.xlu1 %v1127_v56, %s2342_s14 }
 0x344   : > { %v756_v60 = vpop.permute.xlu0 %755 }
 0x345   : > { %v1355_v61 = vpack.c.bf16 %v1354_v59, %v1353_v58 }
 0x346   : > { %v1303_v63 = vpop.permute.xlu1 %1302 }
 0x347   : > { %1360 = vrot.lane.b32.xlu0 %v1355_v61, %s2343_s17  ;;  %v1307_v7 = vmul.f32 %v1303_v63, %v2532_v0 }
 0x348   : > { %v764_v1 = vpop.permute.xlu0 %763 }
 0x349   : > { %v769_v18 = vsel %vm741_vm2, %v756_v60, %v764_v1 }
 0x34a   : > { %v1315_v9 = vpop.permute.xlu1 %1314  ;;  %v773_v20 = vmul.f32 %v769_v18, %v2625_v19 }
 0x34b   : > { %v1319_v8 = vadd.f32 %v1315_v9, %v1307_v7 }
 0x34c   : > { %v728_v13 = vpop.permute.xlu0 %727  ;;  %v775_v27 = vadd.f32 %v773_v20, %v771_v24 }
 0x34d   : > { %v1320_v11 = vpack.c.bf16 %v1319_v8, %v1318_v10 }
 0x34e   : > { %v758_v17 = vpop.permute.xlu1 %757 }
 0x34f   : > { %1357 = vrot.lane.b32.xlu1 %v1320_v11, %s2343_s17 }
 0x350   : > { %v736_v23 = vpop.permute.xlu0 %735 }
 0x351   : > { %v742_v3 = vsel %vm741_vm2, %v728_v13, %v736_v23 }
 0x352   : > { %v766_v21 = vpop.permute.xlu1 %765  ;;  %v746_v31 = vmul.f32 %v742_v3, %v2625_v19 }
 0x353   : > { %v770_v2 = vsel %vm741_vm2, %v758_v17, %v766_v21 }
 0x354   : > { %v774_v14 = vmul.f32 %v770_v2, %v2631_v22  ;;  %v748_v36 = vadd.f32 %v746_v31, %v744_v4 }
 0x356   : > { %v730_v26 = vpop.permute.xlu1 %729  ;;  %v776_v28 = vadd.f32 %v774_v14, %v772_v25 }
 0x358   : > { %v777_v30 = vpack.c.bf16 %v776_v28, %v775_v27 }
 0x35a   : > { %v738_v32 = vpop.permute.xlu1 %737  ;;  %v784_v33 = vsel %vm779_vm3, %v777_v30, 0 }
 0x35b   : > { %v743_v34 = vsel %vm741_vm2, %v730_v26, %v738_v32  ;;  %2016 = vmatpush3.bf16.xpose.msra.mxu1 %v784_v33 }
 0x35c   : > { %v747_v35 = vmul.f32 %v743_v34, %v2631_v22  ;;  %2027 = vmatprep.subr.bf16.mxu1 %v2331_v29 }
 0x35e   : > { %v749_v37 = vadd.f32 %v747_v35, %v745_v6 }
 0x360   : > { %v750_v38 = vpack.c.bf16 %v749_v37, %v748_v36 }
 0x362   : > { %2018 = vmatmul.mubr.msk.bf16.vlgmr.msra.gmra.mrb[0].mxu1 %vm779_vm3, %v750_v38 }
 0x363   : > { %2029 = vmatprep.mubr.msk.bf16.mxu1 %vm2332_vm1, %v2331_v29 }
 0x395   : > { %v971_v62 = vpop.permute.xlu1 %970 }
 0x3a9   : > { %v974_v19 = vpop.permute.xlu0 %973 }
 0x3aa   : > { %v979_v39 = vsel %vm779_vm3, %v974_v19, 0 }
 0x3ab   : > { %2028 = vmatpush3.bf16.xpose.msra.mxu1 %v979_v39 }
 0x3ac   : > { %2039 = vmatprep.subr.bf16.mxu1 %v2331_v29 }
 0x3b1   : > { %v1168_v0 = vpop.permute.xlu0 %1167 }
 0x3b2   : > { %v1173_v15 = vsel %vm779_vm3, %v1168_v0, 0  ;;  %2030 = vmatmul.mubr.msk.bf16.vlgmr.msra.gmra.mrb[4].mxu1 %vm779_vm3, %v971_v62 }
 0x3b3   : > { %2040 = vmatpush3.bf16.xpose.msra.mxu1 %v1173_v15  ;;  %2041 = vmatprep.mubr.msk.bf16.mxu1 %vm2332_vm1, %v2331_v29 }
 0x3b4   : > { %2051 = vmatprep.subr.bf16.mxu1 %v2331_v29 }
 0x3b5   : > { %v1165_v16 = vpop.permute.xlu1 %1164 }
 0x3b9   : > { %v1361_v22 = vpop.permute.xlu0 %1360 }
 0x3ba   : > { %v1366_v40 = vsel %vm779_vm3, %v1361_v22, 0  ;;  %2042 = vmatmul.mubr.msk.bf16.vlgmr.msra.gmra.mrb[8].mxu1 %vm779_vm3, %v1165_v16 }
 0x3bb   : > { %2052 = vmatpush3.bf16.xpose.msra.mxu1 %v1366_v40  ;;  %2053 = vmatprep.mubr.msk.bf16.mxu1 %vm2332_vm1, %v2331_v29 }
 0x3bc   : > { %2063 = vmatprep.subr.bf16.mxu1 %v2331_v29 }
 0x3c1   : > { %v1358_v41 = vpop.permute.xlu1 %1357 }
 0x3c2   : > { %2054 = vmatmul.mubr.msk.bf16.vlgmr.msra.gmra.mrb[12].mxu1 %vm779_vm3, %v1358_v41 }
 0x3c3   : > { %2067 = vmatprep.mubr.msk.bf16.mxu1 %vm2332_vm1, %v2331_v29 }
 0x435   : > { %v820_v42 = vpop.f32.mrb[0].mxu1 }
 0x436   : > { %v2019_v43 = vpop.f32.mrb[1].mxu1  ;;  %v828_v44 = vsel %vm827_vm4, %v820_v42, -inf }
 0x437   : > { %829 = vmax.xlane.f32.xlu0 %v828_v44  ;;  %v823_v45 = vpop.f32.mrb[2].mxu1 }
 0x438   : > { %v2020_v46 = vpop.f32.mrb[3].mxu1  ;;  %v831_v47 = vsel %vm827_vm4, %v823_v45, -inf }
 0x439   : > { %832 = vmax.xlane.f32.xlu1 %v831_v47 }
 0x485   : > { %v1015_v48 = vpop.f32.mrb[4].mxu1 }
 0x486   : > { %v2031_v49 = vpop.f32.mrb[5].mxu1  ;;  %v1022_v50 = vsel %vm827_vm4, %v1015_v48, -inf }
 0x487   : > { %1023 = vmax.xlane.f32.xlu0 %v1022_v50  ;;  %v1018_v51 = vpop.f32.mrb[6].mxu1 }
 0x488   : > { %v2032_v52 = vpop.f32.mrb[7].mxu1  ;;  %v1025_v53 = vsel %vm827_vm4, %v1018_v51, -inf }
 0x48b   : > { %1026 = vmax.xlane.f32.xlu0 %v1025_v53 }
 0x48d   : > { %v1209_v54 = vpop.f32.mrb[8].mxu1 }
 0x48e   : > { %v2043_v55 = vpop.f32.mrb[9].mxu1  ;;  %v1216_v56 = vsel %vm827_vm4, %v1209_v54, -inf }
 0x48f   : > { %1217 = vmax.xlane.f32.xlu0 %v1216_v56  ;;  %v1212_v57 = vpop.f32.mrb[10].mxu1 }
 0x490   : > { %v2044_v58 = vpop.f32.mrb[11].mxu1  ;;  %v1219_v59 = vsel %vm827_vm4, %v1212_v57, -inf }
 0x491   : > { %1220 = vmax.xlane.f32.xlu1 %v1219_v59 }
 0x495   : > { %v1402_v60 = vpop.f32.mrb[12].mxu1 }
 0x496   : > { %v2055_v61 = vpop.f32.mrb[13].mxu1  ;;  %v1409_v63 = vsel %vm827_vm4, %v1402_v60, -inf }
 0x497   : > { %1410 = vmax.xlane.f32.xlu0 %v1409_v63  ;;  %v1405_v1 = vpop.f32.mrb[14].mxu1 }
 0x498   : > { %v2056_v5 = vpop.f32.mrb[15].mxu1  ;;  %v1412_v7 = vsel %vm827_vm4, %v1405_v1, -inf }
 0x499   : > { %1413 = vmax.xlane.f32.xlu1 %v1412_v7 }
 0x4c4   : > { %v830_v9 = vpop.xlane.xlu0 %829 }
 0x4c5   : > { %v834_v10 = vsub.f32 %v820_v42, %v830_v9 }
 0x4c6   : > { %v833_v8 = vpop.xlane.xlu1 %832 }
 0x4c7   : > { %v836_v11 = vmul.f32 1.442695, %v834_v10  ;;  %v835_v13 = vsub.f32 %v823_v45, %v833_v8 }
 0x4c9   : > { %2209 = vpow2.f32 %v836_v11  ;;  %v838_v17 = vmul.f32 1.442695, %v835_v13 }
 0x4cb   : > { %2211 = vpow2.f32 %v838_v17 }
 0x4d3   : > { %v2210_v18 = vpop.eup %2209 }
 0x4d4   : > { %v840_v20 = vsel %vm827_vm4, %v2210_v18, 0.0 }
 0x4d5   : > { %v2212_v21 = vpop.eup %2211  ;;  %841 = vadd.xlane.f32.xlu0 %v840_v20 }
 0x4d6   : > { %v843_v2 = vsel %vm827_vm4, %v2212_v21, 0.0 }
 0x4d7   : > { %844 = vadd.xlane.f32.xlu1 %v843_v2 }
 0x514   : > { %v1024_v23 = vpop.xlane.xlu0 %1023 }
 0x515   : > { %v1028_v14 = vsub.f32 %v1015_v48, %v1024_v23 }
 0x517   : > { %v1030_v24 = vmul.f32 1.442695, %v1028_v14 }
 0x518   : > { %v1027_v25 = vpop.xlane.xlu0 %1026 }
 0x519   : > { %2213 = vpow2.f32 %v1030_v24  ;;  %v1029_v26 = vsub.f32 %v1018_v51, %v1027_v25 }
 0x51b   : > { %v1032_v27 = vmul.f32 1.442695, %v1029_v26 }
 0x51c   : > { %v1218_v28 = vpop.xlane.xlu0 %1217 }
 0x51d   : > { %2215 = vpow2.f32 %v1032_v27  ;;  %v1222_v3 = vsub.f32 %v1209_v54, %v1218_v28  ;;  %v2189_v27 = vld [vmem:[%s2921_s8] sm:$0xff]  }
 0x51e   : > { %v1221_v30 = vpop.xlane.xlu1 %1220  ;;  %2064 = vmatpush3.bf16.msra.mxu1 %v2189_v27 }
 0x51f   : > { %v1224_v31 = vmul.f32 1.442695, %v1222_v3  ;;  %v1223_v32 = vsub.f32 %v1212_v57, %v1221_v30  ;;  %2065 = vmatprep.subr.bf16.mxu1 %v2331_v29 }
 0x521   : > { %2217 = vpow2.f32 %v1224_v31  ;;  %v1226_v33 = vmul.f32 1.442695, %v1223_v32 }
 0x523   : > { %v2214_v34 = vpop.eup %2213  ;;  %2219 = vpow2.f32 %v1226_v33 }
 0x524   : > { %v1411_v4 = vpop.xlane.xlu0 %1410  ;;  %v1034_v6 = vsel %vm827_vm4, %v2214_v34, 0.0 }
 0x525   : > { %v1415_v35 = vsub.f32 %v1402_v60, %v1411_v4  ;;  %1035 = vadd.xlane.f32.xlu0 %v1034_v6  ;;  %v2190_v4 = vld [vmem:[%s2921_s8 + $0x8] sm:$0xff]  }
 0x526   : > { %v1414_v22 = vpop.xlane.xlu1 %1413  ;;  %2066 = vmatpush3.bf16.msra.mxu1 %v2190_v4  ;;  %v2198_v4 = vld [vmem:[%s2924_s11 + $0x28] sm:$0xff]  }
 0x527   : > { %v2216_v36 = vpop.eup %2215  ;;  %v1417_v37 = vmul.f32 1.442695, %v1415_v35  ;;  %v1416_v40 = vsub.f32 %v1405_v1, %v1414_v22  ;;  %2079 = vmatprep.subr.bf16.mxu1 %v2331_v29 }
 0x528   : > { %v1037_v38 = vsel %vm827_vm4, %v2216_v36, 0.0 }
 0x529   : > { %2221 = vpow2.f32 %v1417_v37  ;;  %1038 = vadd.xlane.f32.xlu1 %v1037_v38  ;;  %v1419_v41 = vmul.f32 1.442695, %v1416_v40 }
 0x52b   : > { %v2218_v19 = vpop.eup %2217  ;;  %2223 = vpow2.f32 %v1419_v41 }
 0x52c   : > { %v1228_v39 = vsel %vm827_vm4, %v2218_v19, 0.0 }
 0x52d   : > { %v2220_v62 = vpop.eup %2219  ;;  %1229 = vadd.xlane.f32.xlu0 %v1228_v39 }
 0x52e   : > { %v1231_v0 = vsel %vm827_vm4, %v2220_v62, 0.0 }
 0x52f   : > { %1232 = vadd.xlane.f32.xlu1 %v1231_v0 }
 0x533   : > { %v2222_v15 = vpop.eup %2221 }
 0x534   : > { %v1421_v16 = vsel %vm827_vm4, %v2222_v15, 0.0 }
 0x535   : > { %1422 = vadd.xlane.f32.xlu0 %v1421_v16  ;;  %v2224_v42 = vpop.eup %2223 }
 0x536   : > { %v1424_v44 = vsel %vm827_vm4, %v2224_v42, 0.0 }
 0x540   : > { %1239 = vrot.lane.b32.xlu1 %v2563_v12, %s2342_s14  ;;  %s444_s14 = sand.u32 1, %s2313_s22  }
 0x54b   : > { %1046 = vrot.lane.b32.xlu0 %v2563_v12, %s2341_s20 }
 0x562   : > { %v842_v43 = vpop.xlane.xlu0 %841 }
 0x563   : > { %2225 = vrcp.f32 %v842_v43 }
 0x564   : > { %1425 = vadd.xlane.f32.xlu1 %v1424_v44  ;;  %v845_v45 = vpop.xlane.xlu1 %844 }
 0x565   : > { %2227 = vrcp.f32 %v845_v45 }
 0x56d   : > { %v2226_v46 = vpop.eup %2225 }
 0x56e   : > { %v848_v48 = vmul.f32 %v2226_v46, %v2210_v18 }
 0x56f   : > { %v2228_v47 = vpop.eup %2227 }
 0x570   : > { %v849_v49 = vmul.f32 %v2228_v47, %v2212_v21 }
 0x572   : > { %v850_v50 = vpack.c.bf16 %v849_v49, %v848_v48 }
 0x574   : > { %2024 = vmatmul.mubr.msk.bf16.vlgmr.msra.gmra.mrb[12].mxu0 %vm827_vm4, %v850_v50  ;;  %v2249_v50 = vld [vmem:[%s2471_s27] sm:$0xff] }
 0x575   : > { %1432 = vrot.lane.b32.xlu1 %v2563_v12, %s2343_s17  ;;  %2035 = vmatprep.mubr.msk.bf16.mxu0 %vm2332_vm1, %v2331_v29  ;;  %s1905_s17 = sshll.u32 %s444_s14, 4 }
 0x5b2   : > { %v1036_v51 = vpop.xlane.xlu0 %1035 }
 0x5b6   : > { %v1039_v52 = vpop.xlane.xlu1 %1038 }
 0x5b7   : > { %2229 = vrcp.f32 %v1039_v52 }
 0x5b8   : > { %2231 = vrcp.f32 %v1036_v51 }
 0x5ba   : > { %v1230_v54 = vpop.xlane.xlu0 %1229 }
 0x5bc   : > { %v1233_v53 = vpop.xlane.xlu1 %1232 }
 0x5bd   : > { %2233 = vrcp.f32 %v1233_v53 }
 0x5be   : > { %2235 = vrcp.f32 %v1230_v54  ;;  %v2250_v54 = vld [vmem:[%s2471_s27 + $0x8] sm:$0xff]  ;;  %s446_s27 = scalar_lea.vmem [#allocation2], %s1905_s17 }
 0x5c0   : > { %v1240_v63 = vpop.permute.xlu1 %1239 }
 0x5c1   : > { %v2230_v55 = vpop.eup %2229 }
 0x5c2   : > { %v1423_v56 = vpop.xlane.xlu0 %1422  ;;  %v2232_v57 = vpop.eup %2231  ;;  %v1043_v58 = vmul.f32 %v2230_v55, %v2216_v36 }
 0x5c3   : > { %v1042_v59 = vmul.f32 %v2232_v57, %v2214_v34  ;;  %2237 = vrcp.f32 %v1423_v56 }
 0x5c5   : > { %v1044_v61 = vpack.c.bf16 %v1043_v58, %v1042_v59 }
 0x5c6   : > { %v1047_v60 = vpop.permute.xlu0 %1046 }
 0x5c7   : > { %2034 = vmatpush3.bf16.msra.mxu0 %v1047_v60  ;;  %v2234_v12 = vpop.eup %2233 }
 0x5c8   : > { %2045 = vmatprep.subr.bf16.mxu0 %v2331_v29  ;;  %v2236_v1 = vpop.eup %2235  ;;  %v1237_v5 = vmul.f32 %v2234_v12, %v2220_v62 }
 0x5c9   : > { %v1236_v7 = vmul.f32 %v2236_v1, %v2218_v19 }
 0x5ca   : > { %2036 = vmatmul.mubr.msk.bf16.vlgmr.msra.gmra.mrb[16].mxu0 %vm827_vm4, %v1044_v61 }
 0x5cb   : > { %2046 = vmatpush3.bf16.msra.mxu0 %v1240_v63  ;;  %2047 = vmatprep.mubr.msk.bf16.mxu0 %vm2332_vm1, %v2331_v29  ;;  %v1238_v9 = vpack.c.bf16 %v1237_v5, %v1236_v7 }
 0x5cc   : > { %2057 = vmatprep.subr.bf16.mxu0 %v2331_v29 }
 0x5cd   : > { %v2238_v11 = vpop.eup %2237 }
 0x5ce   : > { %v1429_v17 = vmul.f32 %v2238_v11, %v2222_v15  ;;  %v2192_v11 = vld [vmem:[%s2923_s10 + $0x8] sm:$0xff]  }
 0x5d2   : > { %2048 = vmatmul.mubr.msk.bf16.vlgmr.msra.gmra.mrb[20].mxu0 %vm827_vm4, %v1238_v9 }
 0x5d3   : > { %2059 = vmatprep.mubr.msk.bf16.mxu0 %vm2332_vm1, %v2331_v29 }
 0x5f1   : > { %v1426_v10 = vpop.xlane.xlu1 %1425 }
 0x5f2   : > { %2239 = vrcp.f32 %v1426_v10 }
 0x5f5   : > { %v1433_v8 = vpop.permute.xlu1 %1432 }
 0x5f6   : > { %2058 = vmatpush3.bf16.msra.mxu0 %v1433_v8  ;;  %v2191_v8 = vld [vmem:[%s2923_s10] sm:$0xff]  }
 0x5f7   : > { %2071 = vmatprep.subr.bf16.mxu0 %v2331_v29 }
 0x5fc   : > { %v2240_v13 = vpop.eup %2239 }
 0x5fd   : > { %v1430_v18 = vmul.f32 %v2240_v13, %v2224_v42  ;;  %v2193_v13 = vld [vmem:[%s2924_s11] sm:$0xff]  }
 0x5ff   : > { %v1431_v20 = vpack.c.bf16 %v1430_v18, %v1429_v17  ;;  %v2194_v17 = vld [vmem:[%s2924_s11 + $0x8] sm:$0xff]   ;;  %v2195_v18 = vld [vmem:[%s2924_s11 + $0x10] sm:$0xff]  }
 0x601   : > { %2060 = vmatmul.mubr.msk.bf16.vlgmr.msra.gmra.mrb[24].mxu0 %vm827_vm4, %v1431_v20 }
 0x602   : > { %2075 = vmatprep.mubr.msk.bf16.mxu0 %vm2332_vm1, %v2331_v29  ;;  %2072 = vmatpush3.bf16.msra.mxu0 %v2191_v8 }
 0x603   : > { %2073 = vmatprep.subr.bf16.mxu0 %v2331_v29 }
 0x606   : > { %2074 = vmatpush3.bf16.msra.mxu0 %v2192_v11 }
 0x647   : > { %v888_v21 = vpop.f32.mrb[12].mxu0 }
 0x648   : > { %v2025_v2 = vpop.f32.mrb[13].mxu0 }
 0x649   : > { %v891_v23 = vpop.f32.mrb[14].mxu0 }
 0x64a   : > { %v2026_v14 = vpop.f32.mrb[15].mxu0 }
 0x69d   : > { %v1086_v24 = vpop.f32.mrb[16].mxu0 }
 0x69e   : > { %v2037_v25 = vpop.f32.mrb[17].mxu0 }
 0x69f   : > { %v1089_v26 = vpop.f32.mrb[18].mxu0 }
 0x6a0   : > { %v2168_v28 = vpack.i.bf16 %v1089_v26, %v1086_v24  ;;  %v2038_v3 = vpop.f32.mrb[19].mxu0 }
 0x6a2   : > { %2169 = vrot.lane.b32.xlu1 %v2168_v28, %s2928_s30  ;;  %v1931_v28 = vld [vmem:[%s2922_s9] ss:$0 sm:$0xff]  ;;  %s1950_s30 = sshll.u32 %s2321_s24, 8  ;;  %s2866_s24 = scalar_lea.sflag [#allocation3], %s444_s14 }
 0x6a3   : > { %s2863_s20 = scalar_lea.hbm %s2925_s12, %s1950_s30 }
 0x6a5   : > { %v1279_v30 = vpop.f32.mrb[20].mxu0 }
 0x6a6   : > { %v2049_v31 = vpop.f32.mrb[21].mxu0 }
 0x6a7   : > { %v1282_v32 = vpop.f32.mrb[22].mxu0 }
 0x6a8   : > { %v2173_v33 = vpack.i.bf16 %v1282_v32, %v1279_v30  ;;  %v2050_v34 = vpop.f32.mrb[23].mxu0 }
 0x6a9   : > { %v2197_v34 = vld [vmem:[%s2924_s11 + $0x20] sm:$0xff]  }
 0x6aa   : > { %2174 = vrot.lane.b32.xlu0 %v2173_v33, %s2338_s18  ;;  %v2196_v33 = vld [vmem:[%s2924_s11 + $0x18] sm:$0xff]   ;;  %s1805_s18 = sshll.u32 %s446_s27, 4  ;;  %s2856_s18 = int_to_ptr.vmem [resolvable:$true] %s1805_s18 }
 0x6ab   : > { %s2251_s17 = scalar_lea.vmem %s2856_s18, 256  ;;  %p2258_p1 = scmp.lt.s32.totalorder %s2856_s18, %s2256_s1 }
 0x6ac   : > { %p2252_p12 = scmp.ne.s32.totalorder %s2856_s18, %s2251_s17  ;;  %p2259_p2 = scmp.lt.s32.totalorder %s2257_s2, %s2251_s17 }
 0x6ae   : > { %p2253_p13 = pnand %p2252_p12, %p2451_p4  ;;  %p2260_p3 = por %p2259_p2, %p2258_p1 }
 0x6b0   : > { %p2254_p0 = pneg %p2253_p13 }
 0x6b2   : > { %p2261_p5 = pnand %p2260_p3, %p2254_p0 }
 0x6d4   : > { %v1472_v6 = vpop.f32.mrb[24].mxu0 }
 0x6d5   : > { %v2061_v35 = vpop.f32.mrb[25].mxu0 }
 0x6d6   : > { %v1475_v36 = vpop.f32.mrb[26].mxu0  ;;  %v2200_v35 = vld [vmem:[%s2924_s11 + $0x38] sm:$0xff]  }
 0x6d7   : > { %v2178_v37 = vpack.i.bf16 %v1475_v36, %v1472_v6  ;;  %v2062_v38 = vpop.f32.mrb[27].mxu0  ;;  %v2199_v6 = vld [vmem:[%s2924_s11 + $0x30] sm:$0xff]  }
 0x6d9   : > { %2179 = vrot.lane.b32.xlu1 %v2178_v37, %s2339_s28 }
 0x714   : > { %v2170_v19 = vpop.permute.xlu1 %2169 }
 0x715   : > { %v2172_v62 = vunpack.i.h.bf16 %v2170_v19  ;;  %v2171_v0 = vunpack.i.l.bf16 %v2170_v19 }
 0x717   : > { %v1504_v40 = vsel %vm779_vm3, %v891_v23, %v2172_v62  ;;  %v1503_v41 = vsel %vm779_vm3, %v888_v21, %v2171_v0 }
 0x71c   : > { %v2175_v39 = vpop.permute.xlu0 %2174 }
 0x71d   : > { %v2177_v15 = vunpack.i.h.bf16 %v2175_v39  ;;  %v2176_v16 = vunpack.i.l.bf16 %v2175_v39 }
 0x71f   : > { %v1505_v44 = vsel %vm827_vm4, %v1503_v41, %v2176_v16  ;;  %v1506_v45 = vsel %vm827_vm4, %v1504_v40, %v2177_v15 }
 0x74b   : > { %v2180_v22 = vpop.permute.xlu1 %2179 }
 0x74c   : > { %v2182_v42 = vunpack.i.h.bf16 %v2180_v22  ;;  %v2181_v43 = vunpack.i.l.bf16 %v2180_v22 }
 0x74e   : > { %v1508_v46 = vsel %vm1507_vm5, %v1505_v44, %v2181_v43  ;;  %v1509_v47 = vsel %vm1507_vm5, %v1506_v45, %v2182_v42 }
 0x74f   : > { %v1510_v48 = vpack.c.bf16 %v1509_v47, %v1508_v46 }
 0x751   : > { %2068 = vmatmul.mubr.msk.bf16.vlgmr.msra.gmra.mrb[16].mxu1 %vm470_vm0, %v1510_v48 }
 0x752   : > { %2095 = vmatprep.mubr.msk.bf16.mxu1 %vm2332_vm1, %v2331_v29  ;;  %2080 = vmatpush3.bf16.msra.mxu1 %v2193_v13 }
 0x753   : > { %2081 = vmatprep.subr.bf16.mxu1 %v2331_v29 }
 0x756   : > { %2082 = vmatpush3.bf16.msra.mxu1 %v2194_v17 }
 0x757   : > { %2083 = vmatprep.subr.bf16.mxu1 %v2331_v29 }
 0x75a   : > { %2084 = vmatpush3.bf16.msra.mxu1 %v2195_v18 }
 0x75b   : > { %2085 = vmatprep.subr.bf16.mxu1 %v2331_v29 }
 0x75e   : > { %2086 = vmatpush3.bf16.msra.mxu1 %v2196_v33 }
 0x75f   : > { %2087 = vmatprep.subr.bf16.mxu1 %v2331_v29 }
 0x762   : > { %2088 = vmatpush3.bf16.msra.mxu1 %v2197_v34 }
 0x763   : > { %2089 = vmatprep.subr.bf16.mxu1 %v2331_v29 }
 0x766   : > { %2090 = vmatpush3.bf16.msra.mxu1 %v2198_v4 }
 0x767   : > { %2091 = vmatprep.subr.bf16.mxu1 %v2331_v29 }
 0x76a   : > { %2092 = vmatpush3.bf16.msra.mxu1 %v2199_v6 }
 0x76b   : > { %2093 = vmatprep.subr.bf16.mxu1 %v2331_v29 }
 0x76e   : > { %2094 = vmatpush3.bf16.msra.mxu1 %v2200_v35 }
 0x824   : > { %v1564_v49 = vpop.f32.mrb[16].mxu1 }
 0x825   : > { %v2798_v51 = vadd.f32 %v2249_v50, %v1564_v49  ;;  %v2069_v52 = vpop.f32.mrb[17].mxu1 }
 0x826   : > { %v1567_v53 = vpop.f32.mrb[18].mxu1 }
 0x827   : > { %v2801_v55 = vadd.f32 %v2250_v54, %v1567_v53  ;;  %v2070_v56 = vpop.f32.mrb[19].mxu1  ;;  %v1574_v57 = vsel %vm470_vm0, %v2798_v51, 0.0 }
 0x828   : > { %1575 = vadd.xlane.f32.xlu0 %v1574_v57 }
 0x829   : > { %v1577_v58 = vsel %vm470_vm0, %v2801_v55, 0.0 }
 0x82a   : > { %1578 = vadd.xlane.f32.xlu1 %v1577_v58 }
 0x8b5   : > { %v1576_v59 = vpop.xlane.xlu0 %1575 }
 0x8b6   : > { %v1580_v60 = vmul.f32 0.03125, %v1576_v59 }
 0x8b7   : > { %v1579_v61 = vpop.xlane.xlu1 %1578 }
 0x8b8   : > { %v1582_v12 = vsub.f32 %v2798_v51, %v1580_v60  ;;  %v1581_v63 = vmul.f32 0.03125, %v1579_v61 }
 0x8ba   : > { %v1583_v1 = vsub.f32 %v2801_v55, %v1581_v63  ;;  %v1584_v5 = vmul.f32 %v1582_v12, %v1582_v12 }
 0x8bc   : > { %v1586_v7 = vsel %vm470_vm0, %v1584_v5, 0.0  ;;  %v1585_v9 = vmul.f32 %v1583_v1, %v1583_v1 }
 0x8bd   : > { %1587 = vadd.xlane.f32.xlu0 %v1586_v7 }
 0x8be   : > { %v1589_v10 = vsel %vm470_vm0, %v1585_v9, 0.0 }
 0x8c1   : > { %1590 = vadd.xlane.f32.xlu0 %v1589_v10 }
 0x94a   : > { %v1588_v20 = vpop.xlane.xlu0 %1587 }
 0x94b   : > { %v1592_v21 = vmul.f32 0.03125, %v1588_v20 }
 0x94d   : > { %v1594_v2 = vadd.f32 1e-05, %v1592_v21 }
 0x94e   : > { %v1591_v23 = vpop.xlane.xlu0 %1590 }
 0x94f   : > { %2241 = vrsqrt.f32 %v1594_v2  ;;  %v1593_v14 = vmul.f32 0.03125, %v1591_v23 }
 0x951   : > { %v1595_v24 = vadd.f32 1e-05, %v1593_v14 }
 0x953   : > { %2243 = vrsqrt.f32 %v1595_v24 }
 0x959   : > { %v2242_v25 = vpop.eup %2241 }
 0x95a   : > { %v1598_v26 = vmul.f32 %v2242_v25, %v1582_v12 }
 0x95c   : > { %v1606_v31 = vmul.f32 %v1931_v28, %v1598_v26 }
 0x95d   : > { %v2244_v27 = vpop.eup %2243 }
 0x95e   : > { %v1599_v3 = vmul.f32 %v2244_v27, %v1583_v1 }
 0x960   : > { %v1607_v30 = vmul.f32 %v1931_v28, %v1599_v3 }
 0x962   : > { %v1608_v32 = vpack.c.bf16 %v1607_v30, %v1606_v31 }
 0x964   : > { %2076 = vmatmul.mubr.msk.bf16.vlgmr.msra.gmra.mrb[28].mxu0 %vm470_vm0, %v1608_v32 }
 0xa37   : > { %v1662_v36 = vpop.f32.mrb[28].mxu0 }
 0xa38   : > { %v1671_v37 = vmul.f32 0.70710677, %v1662_v36  ;;  %v2077_v38 = vpop.f32.mrb[29].mxu0  ;;  %v1669_v22 = vmul.f32 0.5, %v1662_v36 }
 0xa39   : > { %v1665_v19 = vpop.f32.mrb[30].mxu0 }
 0xa3a   : > { %2245 = verf.f32 %v1671_v37  ;;  %v1672_v39 = vmul.f32 0.70710677, %v1665_v19  ;;  %v2078_v62 = vpop.f32.mrb[31].mxu0  ;;  %v1670_v29 = vmul.f32 0.5, %v1665_v19 }
 0xa3c   : > { %2247 = verf.f32 %v1672_v39 }
 0xa44   : > { %v2246_v0 = vpop.eup %2245 }
 0xa45   : > { %v1675_v15 = vadd.f32 1.0, %v2246_v0 }
 0xa46   : > { %v2248_v16 = vpop.eup %2247 }
 0xa47   : > { %v1676_v40 = vadd.f32 1.0, %v2248_v16  ;;  %v1677_v41 = vmul.f32 %v1675_v15, %v1669_v22 }
 0xa49   : > { %v1678_v42 = vmul.f32 %v1676_v40, %v1670_v29 }
 0xa4b   : > { %v1679_v43 = vpack.c.bf16 %v1678_v42, %v1677_v41 }
 0xa4d   : > { %2096 = vmatmul.mubr.bf16.vlgmr.msra.gmra.mrb[20].mxu1 %v1679_v43 }
 0xb20   : > { %v1778_v44 = vpop.f32.mrb[20].mxu1 }
 0xb21   : > { %v1785_v45 = vadd.f32 %v1778_v44, %v2798_v51  ;;  %v2097_v46 = vpop.f32.mrb[21].mxu1 }
 0xb22   : > { %v1781_v47 = vpop.f32.mrb[22].mxu1 }
 0xb23   : > { %1787 = vst.msk [vmem:[%s446_s27] sm:$0xff] %vm470_vm0, %v1785_v45  ;;  %v1786_v48 = vadd.f32 %v1781_v47, %v2801_v55  ;;  %v2098_v49 = vpop.f32.mrb[23].mxu1 }
 0xb25   : > { %1788 = vst.msk [vmem:[%s446_s27 + $0x8] sm:$0xff] %vm470_vm0, %v1786_v48 }
 0xb26   : > { %2264 = shalt.err (!%p2261_p5)
}
 0xb27   : > { %s2265_s14 = scalar_lea.hbm %s2863_s20, 256  ;;  %s2269_s0 = scalar_lea.hbm %s2925_s12, 512 }
 0xb28   : > { %p2266_p6 = scmp.ne.s32.totalorder %s2863_s20, %s2265_s14  ;;  %p2270_p10 = scmp.lt.u32.totalorder %s2863_s20, %s2925_s12 }
 0xb29   : > { %p2271_p11 = scmp.lt.u32.totalorder %s2269_s0, %s2265_s14  ;;  %p2273_p13 = scmp.lt.u32.totalorder %s2265_s14, %s2863_s20 }
 0xb2a   : > { %p2267_p7 = pnand %p2266_p6, %p2451_p4 }
 0xb2b   : > { %p2272_p12 = por %p2271_p11, %p2270_p10 }
 0xb2c   : > { %p2268_p9 = pneg %p2267_p7 }
 0xb2d   : > { %p2274_p0 = por %p2273_p13, %p2272_p12 }
 0xb2f   : > { %p2275_p1 = pnand %p2274_p0, %p2268_p9 }
 0xb31   : > { %2278 = shalt.err (!%p2275_p1)
}
 0xb32   : > { %s2345_s2 = smov 128   ;;  %s2938_s19 = smov 8  }
 0xb33   : > { %2099 = dma.vmem_to_hbm [thread:$0]  (%p2451_p4), %s2856_s18, 256, %s2863_s20, %s2866_s24, %s2345_s2, %s2345_s2, %s2938_s19  }
 0xb34 PF: > { %p2105_p2 = scmp.ge.s32.totalorder %s2329_s26, 2  ;;  %s1820_s17 = sand.u32 1, %s2309_s21  }
 0xb35   : > { %s1821_s14 = scalar_lea.sflag [#allocation3], %s1820_s17 }
 0xb36   : > { %p2102_p3 = pnand %p2105_p2, %p2458_p8 }
 0xb38   : > { %2304 = dma.done.wait (!%p2102_p3), %s1821_s14, 256  }
 0xb39   : > { %2306 = vsyncadd (!%p2102_p3), %s1821_s14, 4294967040  ;;  %s25_s26 = sadd.s32 1, %s2329_s26   ;;  %s2939_s21 = smov %s2313_s22 }
 0xb3a   : > { %p22_p5 = scmp.ge.s32.totalorder %s25_s26, 4   ;;  %s2940_s22 = smov %s2317_s23 }
 0xb3b   : > { %s2941_s23 = smov %s2464_s16  ;;  %s2942_s24 = smov %s2325_s25 }
 0xb3c   : > { %s2943_s25 = smov %s2945_s29  ;;  %24 = sbr.rel (!%p22_p5) target bundleno = 8 (0x8), region = 108 }
 0xb43   :  { %1826 = vsyncpa [#allocation3], 1 }
 0xb44   :  { %1828 = vsyncpa [#allocation3 + $0x1], 1 }

</bundles_post_ra>
